<compile_context>
chip_gen: v5e
topology: v5e:2x2
jax: 0.10.0
libtpu: 0.0.40
codegen_flags: <defaults>
</compile_context>

<pallas_src>
import functools

import jax
import jax.numpy as jnp
from jax.experimental import pallas as pl
from jax.experimental.pallas import tpu as pltpu


def _round_up(x, m):
    return (x + m - 1) // m * m


def _generator_kernel(x_ref, w_ref, b_ref, o_ref, m_ref, l_ref, *, tv):
    """One (row-tile, vocab-chunk) step of log_softmax(x @ W + b).

    x_ref: (tm, d_p)      row tile (constant across the vocab axis)
    w_ref: (d_p, tv)      weight chunk (streams over vocab chunks)
    b_ref: (1, tv)        bias chunk
    o_ref: (tm, v_p)      resident output block; holds raw logits until the
                          final vocab step, then is rewritten with log-probs
    m_ref, l_ref: (tm,1)  f32 running max / running sum-of-exp
    """
    j = pl.program_id(1)
    nv = pl.num_programs(1)

    @pl.when(j == 0)
    def _init():
        m_ref[...] = jnp.full_like(m_ref, -jnp.inf)
        l_ref[...] = jnp.zeros_like(l_ref)

    # MXU matmul with f32 accumulation (inputs may be bf16).
    logits = jnp.dot(x_ref[...], w_ref[...],
                     preferred_element_type=jnp.float32) + b_ref[...]

    # Online (flash-style) log-sum-exp update over vocab chunks.
    m_old = m_ref[...]
    m_new = jnp.maximum(m_old, jnp.max(logits, axis=-1, keepdims=True))
    l_ref[...] = (l_ref[...] * jnp.exp(m_old - m_new)
                  + jnp.sum(jnp.exp(logits - m_new), axis=-1, keepdims=True))
    m_ref[...] = m_new

    # Stash raw logits for this vocab chunk into the resident output block.
    start = pl.multiple_of(j * tv, tv)
    o_ref[:, pl.ds(start, tv)] = logits.astype(o_ref.dtype)

    # Finalize: subtract the full-vocab log-sum-exp on the last vocab step.
    @pl.when(j == nv - 1)
    def _finalize():
        lse = m_ref[...] + jnp.log(l_ref[...])
        o_ref[...] = (o_ref[...].astype(jnp.float32) - lse).astype(o_ref.dtype)


def generator_forward(x, w_t, b, *, tm=256, tv=256,
                      compute_dtype=None, out_dtype=jnp.float32):
    """x: (batch, seq, d_model); w_t: (d_model, vocab); b: (vocab,).

    Returns log_softmax(x @ w_t + b, axis=-1) with shape (batch, seq, vocab).
    """
    batch, seq, d_model = x.shape
    d_model_w, vocab = w_t.shape
    assert d_model_w == d_model
    assert tm % 8 == 0 and tv % 128 == 0

    n = batch * seq
    n_p = _round_up(n, tm)          # pad rows to the row tile
    d_p = _round_up(d_model, 128)   # pad K to full lane width
    v_p = _round_up(vocab, tv)      # pad vocab to the vocab chunk

    cdt = x.dtype if compute_dtype is None else compute_dtype

    x2 = x.reshape(n, d_model).astype(cdt)
    w2 = w_t.astype(cdt)
    b2 = b.astype(jnp.float32)

    # K padding is zeros (no contribution to the dot); vocab padding gets a
    # very negative bias so padded columns never perturb the real softmax.
    if n_p != n or d_p != d_model:
        x2 = jnp.pad(x2, ((0, n_p - n), (0, d_p - d_model)))
    if d_p != d_model or v_p != vocab:
        w2 = jnp.pad(w2, ((0, d_p - d_model), (0, v_p - vocab)))
    if v_p != vocab:
        b2 = jnp.pad(b2, (0, v_p - vocab), constant_values=-1e30)
    b2 = b2.reshape(1, v_p)

    grid = (n_p // tm, v_p // tv)   # rows first (parallel), vocab last (arbitrary)

    in_bytes = jnp.dtype(cdt).itemsize
    out_bytes = jnp.dtype(out_dtype).itemsize

    # Explicit VMEM budget: double-buffered x / weight / bias, resident output
    # block, and the small m/l scratch. Clamped under v7x's 64 MiB physical.
    vmem_needed = (2 * tm * d_p * in_bytes
                   + 2 * d_p * tv * in_bytes
                   + 2 * tv * 4
                   + 2 * tm * v_p * out_bytes
                   + 4 * tm * 4)
    vmem_limit = int(min(64 * 1024 * 1024,
                         max(32 * 1024 * 1024, 2 * vmem_needed)))

    cost = pl.CostEstimate(
        flops=2 * n_p * d_p * v_p,
        transcendentals=n_p * v_p,
        bytes_accessed=(n_p * d_p * in_bytes + d_p * v_p * in_bytes
                        + v_p * 4 + n_p * v_p * out_bytes),
    )

    kernel = functools.partial(_generator_kernel, tv=tv)

    out = pl.pallas_call(
        kernel,
        out_shape=jax.ShapeDtypeStruct((n_p, v_p), out_dtype),
        grid_spec=pltpu.PrefetchScalarGridSpec(
            num_scalar_prefetch=0,
            grid=grid,
            in_specs=[
                pl.BlockSpec((tm, d_p), lambda i, j: (i, 0)),   # x row tile
                pl.BlockSpec((d_p, tv), lambda i, j: (0, j)),   # weight chunk
                pl.BlockSpec((1, tv), lambda i, j: (0, j)),     # bias chunk
            ],
            out_specs=pl.BlockSpec((tm, v_p), lambda i, j: (i, 0)),
            scratch_shapes=[
                pltpu.VMEM((tm, 1), jnp.float32),   # running max
                pltpu.VMEM((tm, 1), jnp.float32),   # running sum of exp
            ],
        ),
        compiler_params=pltpu.CompilerParams(
            dimension_semantics=("parallel", "arbitrary"),
            vmem_limit_bytes=vmem_limit,
        ),
        cost_estimate=cost,
    )(x2, w2, b2)

    return out[:n, :vocab].reshape(batch, seq, vocab)


if __name__ == "__main__":
    # Small shapes consistent with the module's output head.
    batch, seq, d_model, vocab = 2, 8, 128, 512

    key = jax.random.PRNGKey(0)
    kx, kw, kb = jax.random.split(key, 3)

    x = jax.random.normal(kx, (batch, seq, d_model), dtype=jnp.float32)
    # Torch stores Linear weight as (vocab, d_model); we keep its transpose
    # (d_model, vocab) so the kernel matmul is row-major with vocab on lanes.
    w_t = jax.random.normal(kw, (d_model, vocab), dtype=jnp.float32) * 0.02
    b = jax.random.normal(kb, (vocab,), dtype=jnp.float32) * 0.01

    ref = jax.nn.log_softmax(x @ w_t + b, axis=-1)

    # f32 compute path — tight correctness check.
    out = generator_forward(x, w_t, b, tm=256, tv=256,
                            compute_dtype=jnp.float32, out_dtype=jnp.float32)
    out = jax.block_until_ready(out)
    assert out.shape == (batch, seq, vocab)
    assert jnp.allclose(out, ref, atol=1e-4, rtol=1e-5)

    # bf16 matmul-input path (v6e/v7x MXU fast path), f32 accumulation.
    out_bf = generator_forward(x, w_t, b, tm=256, tv=256,
                               compute_dtype=jnp.bfloat16, out_dtype=jnp.float32)
    out_bf = jax.block_until_ready(out_bf)
    assert jnp.allclose(out_bf, ref, atol=5e-2, rtol=5e-2)

    print("KERNEL_OK")
</pallas_src>

<mosaic_0001>
module attributes {stable_mosaic.version = 11 : i64} {
  func.func @_generator_kernel(%arg0: i32, %arg1: i32, %arg2: memref<256x128xf32, #tpu.memory_space<vmem>>, %arg3: memref<128x256xf32, #tpu.memory_space<vmem>>, %arg4: memref<1x256xf32, #tpu.memory_space<vmem>>, %arg5: memref<256x512xf32, #tpu.memory_space<vmem>>, %arg6: memref<256x1xf32, #tpu.memory_space<vmem>>, %arg7: memref<256x1xf32, #tpu.memory_space<vmem>>) attributes {dimension_semantics = [#tpu.dimension_semantics<parallel>, #tpu.dimension_semantics<arbitrary>], iteration_bounds = array<i64: 1, 2>, scalar_prefetch = 0 : i64, scratch_operands = 2 : i64, tpu.core_type = #tpu.core_type<tc>, window_params = [{transform_indices = @transform_0, window_bounds = array<i64: 256, 128>}, {transform_indices = @transform_1, window_bounds = array<i64: 128, 256>}, {transform_indices = @transform_2, window_bounds = array<i64: 1, 256>}, {transform_indices = @transform_3, window_bounds = array<i64: 256, 512>}]} {
    %c0_i32 = arith.constant 0 : i32
    %0 = arith.cmpi eq, %arg1, %c0_i32 : i32
    %1 = arith.extui %0 : i1 to i32
    %c0_i32_0 = arith.constant 0 : i32
    %2 = arith.cmpi ne, %1, %c0_i32_0 : i32
    scf.if %2 {
      %cst_18 = arith.constant 0xFF800000 : f32
      %32 = vector.broadcast %cst_18 : f32 to vector<256x1xf32>
      %c0_19 = arith.constant 0 : index
      %c0_20 = arith.constant 0 : index
      %33 = vector.load %arg6[%c0_19, %c0_20] : memref<256x1xf32, #tpu.memory_space<vmem>>, vector<256x1xf32>
      tpu.vector_store %arg6[%c0_19, %c0_20], %32 {strides = array<i32>} : memref<256x1xf32, #tpu.memory_space<vmem>>, vector<256x1xf32>,
      %cst_21 = arith.constant 0.000000e+00 : f32
      %34 = vector.broadcast %cst_21 : f32 to vector<256x1xf32>
      %c0_22 = arith.constant 0 : index
      %c0_23 = arith.constant 0 : index
      %35 = vector.load %arg7[%c0_22, %c0_23] : memref<256x1xf32, #tpu.memory_space<vmem>>, vector<256x1xf32>
      tpu.vector_store %arg7[%c0_22, %c0_23], %34 {strides = array<i32>} : memref<256x1xf32, #tpu.memory_space<vmem>>, vector<256x1xf32>,
    } else {
    }
    %c0 = arith.constant 0 : index
    %c0_1 = arith.constant 0 : index
    %3 = vector.load %arg2[%c0, %c0_1] : memref<256x128xf32, #tpu.memory_space<vmem>>, vector<256x128xf32>
    %c0_2 = arith.constant 0 : index
    %c0_3 = arith.constant 0 : index
    %4 = vector.load %arg3[%c0_2, %c0_3] : memref<128x256xf32, #tpu.memory_space<vmem>>, vector<128x256xf32>
    %cst = arith.constant dense<0.000000e+00> : vector<256x256xf32>
    %5 = tpu.matmul %3, %4, %cst {dimension_numbers = #tpu.dot_dimension_numbers<[1], [0], [0], [1], [0, 0, 1, 1], [], []>} : vector<256x128xf32>, vector<128x256xf32>, vector<256x256xf32> -> vector<256x256xf32>
    %c0_4 = arith.constant 0 : index
    %c0_5 = arith.constant 0 : index
    %6 = vector.load %arg4[%c0_4, %c0_5] : memref<1x256xf32, #tpu.memory_space<vmem>>, vector<1x256xf32>
    %7 = vector.broadcast %6 : vector<1x256xf32> to vector<256x256xf32>
    %8 = arith.addf %5, %7 : vector<256x256xf32>
    %c0_6 = arith.constant 0 : index
    %c0_7 = arith.constant 0 : index
    %9 = vector.load %arg6[%c0_6, %c0_7] : memref<256x1xf32, #tpu.memory_space<vmem>>, vector<256x1xf32>
    %cst_8 = arith.constant dense<0xFF800000> : vector<256xf32>
    %10 = vector.multi_reduction <maximumf>, %8, %cst_8 [1] : vector<256x256xf32> to vector<256xf32>
    %11 = vector.shape_cast %10 : vector<256xf32> to vector<256x1xf32>
    %12 = arith.maximumf %9, %11 : vector<256x1xf32>
    %c0_9 = arith.constant 0 : index
    %c0_10 = arith.constant 0 : index
    %13 = vector.load %arg7[%c0_9, %c0_10] : memref<256x1xf32, #tpu.memory_space<vmem>>, vector<256x1xf32>
    %14 = arith.subf %9, %12 : vector<256x1xf32>
    %15 = math.exp %14 : vector<256x1xf32>
    %16 = arith.mulf %13, %15 : vector<256x1xf32>
    %17 = vector.broadcast %12 : vector<256x1xf32> to vector<256x256xf32>
    %18 = arith.subf %8, %17 : vector<256x256xf32>
    %19 = math.exp %18 : vector<256x256xf32>
    %cst_11 = arith.constant dense<0.000000e+00> : vector<256xf32>
    %20 = vector.multi_reduction <add>, %19, %cst_11 [1] : vector<256x256xf32> to vector<256xf32>
    %21 = vector.shape_cast %20 : vector<256xf32> to vector<256x1xf32>
    %22 = arith.addf %16, %21 : vector<256x1xf32>
    %c0_12 = arith.constant 0 : index
    %c0_13 = arith.constant 0 : index
    %23 = vector.load %arg7[%c0_12, %c0_13] : memref<256x1xf32, #tpu.memory_space<vmem>>, vector<256x1xf32>
    tpu.vector_store %arg7[%c0_12, %c0_13], %22 {strides = array<i32>} : memref<256x1xf32, #tpu.memory_space<vmem>>, vector<256x1xf32>,
    %c0_14 = arith.constant 0 : index
    %c0_15 = arith.constant 0 : index
    %24 = vector.load %arg6[%c0_14, %c0_15] : memref<256x1xf32, #tpu.memory_space<vmem>>, vector<256x1xf32>
    tpu.vector_store %arg6[%c0_14, %c0_15], %12 {strides = array<i32>} : memref<256x1xf32, #tpu.memory_space<vmem>>, vector<256x1xf32>,
    %c256_i32 = arith.constant 256 : i32
    %25 = arith.muli %arg1, %c256_i32 : i32
    %26 = tpu.assume_multiple %25, 256 : i32
    %c0_16 = arith.constant 0 : index
    %27 = arith.index_cast %26 : i32 to index
    %28 = vector.load %arg5[%c0_16, %27] : memref<256x512xf32, #tpu.memory_space<vmem>>, vector<256x256xf32>
    tpu.vector_store %arg5[%c0_16, %27], %8 {strides = array<i32>} : memref<256x512xf32, #tpu.memory_space<vmem>>, vector<256x256xf32>,
    %c1_i32 = arith.constant 1 : i32
    %29 = arith.cmpi eq, %arg1, %c1_i32 : i32
    %30 = arith.extui %29 : i1 to i32
    %c0_i32_17 = arith.constant 0 : i32
    %31 = arith.cmpi ne, %30, %c0_i32_17 : i32
    scf.if %31 {
      %c0_18 = arith.constant 0 : index
      %c0_19 = arith.constant 0 : index
      %32 = vector.load %arg6[%c0_18, %c0_19] : memref<256x1xf32, #tpu.memory_space<vmem>>, vector<256x1xf32>
      %c0_20 = arith.constant 0 : index
      %c0_21 = arith.constant 0 : index
      %33 = vector.load %arg7[%c0_20, %c0_21] : memref<256x1xf32, #tpu.memory_space<vmem>>, vector<256x1xf32>
      %34 = math.log %33 : vector<256x1xf32>
      %35 = arith.addf %32, %34 : vector<256x1xf32>
      %c0_22 = arith.constant 0 : index
      %c0_23 = arith.constant 0 : index
      %36 = vector.load %arg5[%c0_22, %c0_23] : memref<256x512xf32, #tpu.memory_space<vmem>>, vector<256x512xf32>
      %37 = vector.broadcast %35 : vector<256x1xf32> to vector<256x512xf32>
      %38 = arith.subf %36, %37 : vector<256x512xf32>
      %c0_24 = arith.constant 0 : index
      %c0_25 = arith.constant 0 : index
      %39 = vector.load %arg5[%c0_24, %c0_25] : memref<256x512xf32, #tpu.memory_space<vmem>>, vector<256x512xf32>
      tpu.vector_store %arg5[%c0_24, %c0_25], %38 {strides = array<i32>} : memref<256x512xf32, #tpu.memory_space<vmem>>, vector<256x512xf32>,
    } else {
    }
    return
  }
  func.func @transform_0(%arg0: i32, %arg1: i32) -> (i32, i32) {
    %c0_i32 = arith.constant 0 : i32
    %c0_i32_0 = arith.constant 0 : i32
    return %arg0, %c0_i32 : i32, i32
  }
  func.func @transform_1(%arg0: i32, %arg1: i32) -> (i32, i32) {
    %c0_i32 = arith.constant 0 : i32
    %c0_i32_0 = arith.constant 0 : i32
    return %c0_i32, %arg1 : i32, i32
  }
  func.func @transform_2(%arg0: i32, %arg1: i32) -> (i32, i32) {
    %c0_i32 = arith.constant 0 : i32
    %c0_i32_0 = arith.constant 0 : i32
    return %c0_i32, %arg1 : i32, i32
  }
  func.func @transform_3(%arg0: i32, %arg1: i32) -> (i32, i32) {
    %c0_i32 = arith.constant 0 : i32
    %c0_i32_0 = arith.constant 0 : i32
    return %arg0, %c0_i32 : i32, i32
  }
}

</mosaic_0001>

<bundles_post_ra>
// kernel: tpu_custom_call.1
= control target key start
LH: loop header
LB: loop body
LE: loop exit
PB: predicated region body
PF: predicated region fallthrough
CT: control target
= control target key end

     0   :  { %8 = vsyncpa [#allocation5], 0  ;;  %s4055_s0 = inlined_call_operand.hbm [shape: f32[256,128], index: 0, kind: input, shape index: {}]   ;;  %s4056_s1 = inlined_call_operand.hbm [shape: f32[128,512], index: 1, kind: input, shape index: {}]   ;;  %s4057_s2 = inlined_call_operand.hbm [shape: f32[1,512], index: 2, kind: input, shape index: {}]   ;;  %s4058_s3 = inlined_call_operand.hbm [shape: f32[256,512], index: 3, kind: output, shape index: {}]  }
   0x1   :  { %9 = vsyncpa [#allocation8], 0 }
   0x2   :  { %11 = vsyncpa [#allocation8 + $0x1], 0 }
   0x3   :  { %12 = vsyncpa [#allocation6], 0  ;;  %s3030_s12 = smov 0   ;;  %s3032_s13 = smov 0  }
   0x4   :  { %s3034_s14 = smov 0   ;;  %s3036_s15 = smov 0  }
   0x5   :  { %s3038_s16 = smov 0   ;;  %s3040_s17 = smov 0  }
   0x6 LB: > { %s27_s18 = sadd.s32 1, %s2991_s16  ;;  %s63_s19 = sadd.s32 1, %s2983_s14  ;;  %s2995_s17 = sphi %s3040_s17, %s18_s17   ;;  %s2991_s16 = sphi %s3038_s16, %s4229_s16   ;;  %s2987_s15 = sphi %s3036_s15, %s4228_s15   ;;  %s2983_s14 = sphi %s3034_s14, %s4227_s14   ;;  %s2979_s13 = sphi %s3032_s13, %s4226_s13   ;;  %s2975_s12 = sphi %s3030_s12, %s4225_s12  }
   0x7   : > { %p28_p0 = scmp.ge.s32.totalorder %s27_s18, 2  ;;  %p70_p1 = scmp.ne.s32.totalorder %s2983_s14, %s2979_s13 }
   0x8   : > { %p71_p2 = scmp.eq.s32.totalorder %s2995_s17, 0  ;;  %p2458_p4 = scmp.lt.s32.totalorder %s2995_s17, 2 }
   0x9   : > { %s4231_s18 = smov (%p28_p0, %s27_s18), 0  ;;  %s169_s22 = sand.u32 1, %s2995_s17  }
   0xa   : > { %p3067_p3 = por %p71_p2, %p70_p1  ;;  %s60_s21 = ssub.s32 %s2991_s16, %s4231_s18 }
   0xb   : > { %p61_p5 = scmp.eq.s32.totalorder %s60_s21, 0  ;;  %s171_s23 = sand.u32 1, %s2983_s14  }
   0xc   : > { %s2401_s24 = sshll.u32 %s2991_s16, 4  ;;  %s2384_s26 = sshll.u32 %s171_s23, 8 }
   0xd   : > { %s3078_s25 = scalar_select %p61_p5, %s2983_s14, %s63_s19  }
   0xe   : > { %s178_s29 = scalar_lea.hbm %s4056_s1, %s2401_s24  ;;  %s173_s4 = scalar_lea.vmem [#allocation7], %s2384_s26 }
   0xf   : > { %s179_s30 = sshll.u32 %s178_s29, 4  ;;  %s181_s5 = sshll.u32 %s173_s4, 4  ;;  %s180_s30 = int_to_ptr.hbm [resolvable:$true] %s179_s30  ;;  %s182_s5 = int_to_ptr.vmem [resolvable:$true] %s181_s5 }
  0x10   : > { %p3087_p6 = pnand %p2458_p4, %p3067_p3  ;;  %s3091_s7 = scalar_lea.sflag [#allocation8], %s169_s22 }
  0x11   : > { %s2997_s8 = smov 512   ;;  %s2998_s9 = smov 256  }
  0x12   : > { %s2999_s10 = smov 16   ;;  %s3097_s11 = sadd.s32 4294967295, %s2995_s17  }
  0x13   : > { %2453 = dma.hbm_to_vmem [thread:$0]  (!%p3087_p6), %s180_s30, 4096, %s182_s5, %s3091_s7, %s2997_s8, %s2998_s9, %s2999_s10  }
  0x14   : > { %p76_p7 = scmp.ne.s32.totalorder %s2979_s13, %s2975_s12  ;;  %p77_p8 = scmp.eq.s32.totalorder %s3097_s11, 0 }
  0x15   : > { %p2381_p9 = scmp.ge.s32.totalorder %s2995_s17, 1  ;;  %p139_p10 = scmp.lt.s32.totalorder %s2995_s17, 3 }
  0x16   : > { %p3106_p11 = por %p77_p8, %p76_p7  ;;  %s153_s22 = sshll.u32 %s4055_s0, 4  ;;  %s154_s22 = int_to_ptr.hbm [resolvable:$true] %s153_s22 }
  0x17   : > { %p3113_p12 = pnand %p2381_p9, %p139_p10  ;;  %s3000_s12 = smov [#allocation4]  }
  0x18   : > { %s155_s26 = sshll.u32 %s3000_s12, 4  ;;  %s2387_s27 = sshll.u32 %s171_s23, 1  ;;  %s156_s26 = int_to_ptr.vmem [resolvable:$true] %s155_s26 }
  0x19   : > { %p2446_p13 = pneg %p3113_p12  ;;  %s2388_s28 = sshll.u32 %s2991_s16, 1 }
  0x1a   : > { %s199_s4 = scalar_lea.hbm %s4057_s2, %s2388_s28  ;;  %s3001_s5 = smov 128  }
  0x1b   : > { %p2447_p0 = pnand %p2446_p13, %p77_p8  ;;  %s3002_s8 = smov 8  }
  0x1c   : > { %s201_s9 = sshll.u32 %s199_s4, 4  ;;  %s195_s10 = scalar_lea.vmem [#allocation9], %s2387_s27  ;;  %s202_s9 = int_to_ptr.hbm [resolvable:$true] %s201_s9 }
  0x1d   : > { %2449 = dma.hbm_to_vmem [thread:$0]  (!%p2447_p0), %s154_s22, 4096, %s156_s26, [#allocation5], %s3001_s5, %s3001_s5, %s3002_s8  }
  0x1e   : > { %s203_s20 = sshll.u32 %s195_s10, 4  ;;  %212 = sbr.rel (%p3113_p12) target bundleno = 1070 (0x42e), region = 32  ;;  %s204_s20 = int_to_ptr.vmem [resolvable:$true] %s203_s20 }
  0x1f   : > { %2456 = dma.hbm_to_vmem [thread:$0]  (!%p3087_p6), %s202_s9, 32, %s204_s20, %s3091_s7  }
  0x23   : > { %2962 = dma.done.wait (%p77_p8), [#allocation5], 4096  }
  0x24   : > { %2964 = vsyncadd (%p77_p8), [#allocation5], 4294963200  ;;  %s219_s23 = sand.u32 1, %s3097_s11   ;;  %s221_s21 = sand.u32 1, %s2979_s13  }
  0x25   : > { %s2391_s22 = sshll.u32 %s221_s21, 8  ;;  %s220_s12 = scalar_lea.sflag [#allocation8], %s219_s23 }
  0x26   : > { %s3136_s26 = scalar_lea.vmem [#allocation7], %s2391_s22 }
  0x27   : > { %2966 = dma.done.wait (%p3106_p11), %s220_s12, 4128  }
  0x28   : > { %2968 = vsyncadd (%p3106_p11), %s220_s12, 4294963168  ;;  %s3142_s6 = sshll.u32 %s221_s21, 1  ;;  %p2393_p1 = scmp.ne.s32.totalorder %s2987_s15, 0 }
  0x29   : > { %s233_s7 = scalar_lea.vmem [#allocation9], %s3142_s6 }
  0x2a   : > { %264 = sbr.rel (%p2393_p1) target bundleno = 112 (0x70), region = 48 }
  0x2f   : > { %vm265_vm0 = vcmask 7168   ;;  %v3003_v0 = vmov -inf   ;;  %v3004_v1 = vmov 0.0  }
  0x30   : > { %266 = vst.msk [vmem:[#allocation2] sm:$0xff] %vm265_vm0, %v3003_v0 }
  0x31   : > { %267 = vst.msk [vmem:[#allocation2 + $0x8] sm:$0xff] %vm265_vm0, %v3003_v0 }
  0x32   : > { %268 = vst.msk [vmem:[#allocation2 + $0x10] sm:$0xff] %vm265_vm0, %v3003_v0 }
  0x33   : > { %269 = vst.msk [vmem:[#allocation2 + $0x18] sm:$0xff] %vm265_vm0, %v3003_v0 }
  0x34   : > { %270 = vst.msk [vmem:[#allocation2 + $0x20] sm:$0xff] %vm265_vm0, %v3003_v0 }
  0x35   : > { %271 = vst.msk [vmem:[#allocation2 + $0x28] sm:$0xff] %vm265_vm0, %v3003_v0 }
  0x36   : > { %272 = vst.msk [vmem:[#allocation2 + $0x30] sm:$0xff] %vm265_vm0, %v3003_v0 }
  0x37   : > { %273 = vst.msk [vmem:[#allocation2 + $0x38] sm:$0xff] %vm265_vm0, %v3003_v0 }
  0x38   : > { %274 = vst.msk [vmem:[#allocation2 + $0x40] sm:$0xff] %vm265_vm0, %v3003_v0 }
  0x39   : > { %275 = vst.msk [vmem:[#allocation2 + $0x48] sm:$0xff] %vm265_vm0, %v3003_v0 }
  0x3a   : > { %276 = vst.msk [vmem:[#allocation2 + $0x50] sm:$0xff] %vm265_vm0, %v3003_v0 }
  0x3b   : > { %277 = vst.msk [vmem:[#allocation2 + $0x58] sm:$0xff] %vm265_vm0, %v3003_v0 }
  0x3c   : > { %278 = vst.msk [vmem:[#allocation2 + $0x60] sm:$0xff] %vm265_vm0, %v3003_v0 }
  0x3d   : > { %279 = vst.msk [vmem:[#allocation2 + $0x68] sm:$0xff] %vm265_vm0, %v3003_v0 }
  0x3e   : > { %280 = vst.msk [vmem:[#allocation2 + $0x70] sm:$0xff] %vm265_vm0, %v3003_v0 }
  0x3f   : > { %281 = vst.msk [vmem:[#allocation2 + $0x78] sm:$0xff] %vm265_vm0, %v3003_v0 }
  0x40   : > { %282 = vst.msk [vmem:[#allocation2 + $0x80] sm:$0xff] %vm265_vm0, %v3003_v0 }
  0x41   : > { %283 = vst.msk [vmem:[#allocation2 + $0x88] sm:$0xff] %vm265_vm0, %v3003_v0 }
  0x42   : > { %284 = vst.msk [vmem:[#allocation2 + $0x90] sm:$0xff] %vm265_vm0, %v3003_v0 }
  0x43   : > { %285 = vst.msk [vmem:[#allocation2 + $0x98] sm:$0xff] %vm265_vm0, %v3003_v0 }
  0x44   : > { %286 = vst.msk [vmem:[#allocation2 + $0xa0] sm:$0xff] %vm265_vm0, %v3003_v0 }
  0x45   : > { %287 = vst.msk [vmem:[#allocation2 + $0xa8] sm:$0xff] %vm265_vm0, %v3003_v0 }
  0x46   : > { %288 = vst.msk [vmem:[#allocation2 + $0xb0] sm:$0xff] %vm265_vm0, %v3003_v0 }
  0x47   : > { %289 = vst.msk [vmem:[#allocation2 + $0xb8] sm:$0xff] %vm265_vm0, %v3003_v0 }
  0x48   : > { %290 = vst.msk [vmem:[#allocation2 + $0xc0] sm:$0xff] %vm265_vm0, %v3003_v0 }
  0x49   : > { %291 = vst.msk [vmem:[#allocation2 + $0xc8] sm:$0xff] %vm265_vm0, %v3003_v0 }
  0x4a   : > { %292 = vst.msk [vmem:[#allocation2 + $0xd0] sm:$0xff] %vm265_vm0, %v3003_v0 }
  0x4b   : > { %293 = vst.msk [vmem:[#allocation2 + $0xd8] sm:$0xff] %vm265_vm0, %v3003_v0 }
  0x4c   : > { %294 = vst.msk [vmem:[#allocation2 + $0xe0] sm:$0xff] %vm265_vm0, %v3003_v0 }
  0x4d   : > { %295 = vst.msk [vmem:[#allocation2 + $0xe8] sm:$0xff] %vm265_vm0, %v3003_v0 }
  0x4e   : > { %296 = vst.msk [vmem:[#allocation2 + $0xf0] sm:$0xff] %vm265_vm0, %v3003_v0 }
  0x4f   : > { %297 = vst.msk [vmem:[#allocation2 + $0xf8] sm:$0xff] %vm265_vm0, %v3003_v0 }
  0x50   : > { %298 = vst.msk [vmem:[#allocation3] sm:$0xff] %vm265_vm0, %v3004_v1 }
  0x51   : > { %299 = vst.msk [vmem:[#allocation3 + $0x8] sm:$0xff] %vm265_vm0, %v3004_v1 }
  0x52   : > { %300 = vst.msk [vmem:[#allocation3 + $0x10] sm:$0xff] %vm265_vm0, %v3004_v1 }
  0x53   : > { %301 = vst.msk [vmem:[#allocation3 + $0x18] sm:$0xff] %vm265_vm0, %v3004_v1 }
  0x54   : > { %302 = vst.msk [vmem:[#allocation3 + $0x20] sm:$0xff] %vm265_vm0, %v3004_v1 }
  0x55   : > { %303 = vst.msk [vmem:[#allocation3 + $0x28] sm:$0xff] %vm265_vm0, %v3004_v1 }
  0x56   : > { %304 = vst.msk [vmem:[#allocation3 + $0x30] sm:$0xff] %vm265_vm0, %v3004_v1 }
  0x57   : > { %305 = vst.msk [vmem:[#allocation3 + $0x38] sm:$0xff] %vm265_vm0, %v3004_v1 }
  0x58   : > { %306 = vst.msk [vmem:[#allocation3 + $0x40] sm:$0xff] %vm265_vm0, %v3004_v1 }
  0x59   : > { %307 = vst.msk [vmem:[#allocation3 + $0x48] sm:$0xff] %vm265_vm0, %v3004_v1 }
  0x5a   : > { %308 = vst.msk [vmem:[#allocation3 + $0x50] sm:$0xff] %vm265_vm0, %v3004_v1 }
  0x5b   : > { %309 = vst.msk [vmem:[#allocation3 + $0x58] sm:$0xff] %vm265_vm0, %v3004_v1 }
  0x5c   : > { %310 = vst.msk [vmem:[#allocation3 + $0x60] sm:$0xff] %vm265_vm0, %v3004_v1 }
  0x5d   : > { %311 = vst.msk [vmem:[#allocation3 + $0x68] sm:$0xff] %vm265_vm0, %v3004_v1 }
  0x5e   : > { %312 = vst.msk [vmem:[#allocation3 + $0x70] sm:$0xff] %vm265_vm0, %v3004_v1 }
  0x5f   : > { %313 = vst.msk [vmem:[#allocation3 + $0x78] sm:$0xff] %vm265_vm0, %v3004_v1 }
  0x60   : > { %314 = vst.msk [vmem:[#allocation3 + $0x80] sm:$0xff] %vm265_vm0, %v3004_v1 }
  0x61   : > { %315 = vst.msk [vmem:[#allocation3 + $0x88] sm:$0xff] %vm265_vm0, %v3004_v1 }
  0x62   : > { %316 = vst.msk [vmem:[#allocation3 + $0x90] sm:$0xff] %vm265_vm0, %v3004_v1 }
  0x63   : > { %317 = vst.msk [vmem:[#allocation3 + $0x98] sm:$0xff] %vm265_vm0, %v3004_v1 }
  0x64   : > { %318 = vst.msk [vmem:[#allocation3 + $0xa0] sm:$0xff] %vm265_vm0, %v3004_v1 }
  0x65   : > { %319 = vst.msk [vmem:[#allocation3 + $0xa8] sm:$0xff] %vm265_vm0, %v3004_v1 }
  0x66   : > { %320 = vst.msk [vmem:[#allocation3 + $0xb0] sm:$0xff] %vm265_vm0, %v3004_v1 }
  0x67   : > { %321 = vst.msk [vmem:[#allocation3 + $0xb8] sm:$0xff] %vm265_vm0, %v3004_v1 }
  0x68   : > { %322 = vst.msk [vmem:[#allocation3 + $0xc0] sm:$0xff] %vm265_vm0, %v3004_v1 }
  0x69   : > { %323 = vst.msk [vmem:[#allocation3 + $0xc8] sm:$0xff] %vm265_vm0, %v3004_v1 }
  0x6a   : > { %324 = vst.msk [vmem:[#allocation3 + $0xd0] sm:$0xff] %vm265_vm0, %v3004_v1 }
  0x6b   : > { %325 = vst.msk [vmem:[#allocation3 + $0xd8] sm:$0xff] %vm265_vm0, %v3004_v1 }
  0x6c   : > { %326 = vst.msk [vmem:[#allocation3 + $0xe0] sm:$0xff] %vm265_vm0, %v3004_v1 }
  0x6d   : > { %327 = vst.msk [vmem:[#allocation3 + $0xe8] sm:$0xff] %vm265_vm0, %v3004_v1 }
  0x6e   : > { %328 = vst.msk [vmem:[#allocation3 + $0xf0] sm:$0xff] %vm265_vm0, %v3004_v1 }
  0x6f   : > { %329 = vst.msk [vmem:[#allocation3 + $0xf8] sm:$0xff] %vm265_vm0, %v3004_v1 }
  0x70 PF: > { %v392_v2 = vld [vmem:[%s3136_s26 + $0xf0] sm:$0xff]  ;;  %v393_v3 = vld [vmem:[%s3136_s26 + $0xf8] sm:$0xff]  ;;  %v390_v4 = vld [vmem:[%s3136_s26 + $0xe0] sm:$0xff]  ;;  %s2394_s19 = sshll.u32 %s2987_s15, 8  ;;  %vm1426_vm1 = vcmask 7168   ;;  %p2396_p2 = scmp.ne.s32.totalorder %s2987_s15, 1 }
  0x71   : > { %400 = vmatpush.msra.mxu0 %v392_v2  ;;  %2402 = vmatpush.msra.mxu2 %v392_v2  ;;  %v391_v5 = vld [vmem:[%s3136_s26 + $0xe8] sm:$0xff]  ;;  %v388_v6 = vld [vmem:[%s3136_s26 + $0xd0] sm:$0xff]  ;;  %v389_v7 = vld [vmem:[%s3136_s26 + $0xd8] sm:$0xff]  ;;  %s1492_s24 = sshra.s32 %s2394_s19, 7 }
  0x72   : > { %513 = vmatpush.msra.mxu1 %v393_v3  ;;  %2418 = vmatpush.msra.mxu3 %v393_v3  ;;  %v386_v8 = vld [vmem:[%s3136_s26 + $0xc0] sm:$0xff]  ;;  %v387_v9 = vld [vmem:[%s3136_s26 + $0xc8] sm:$0xff]  ;;  %v384_v10 = vld [vmem:[%s3136_s26 + $0xb0] sm:$0xff]  ;;  %s2395_s27 = sshll.u32 %s1492_s24, 3 }
  0x73   : > { %401 = vmatpush.msra.mxu0 %v390_v4  ;;  %2403 = vmatpush.msra.mxu2 %v390_v4  ;;  %v385_v11 = vld [vmem:[%s3136_s26 + $0xb8] sm:$0xff]  ;;  %v382_v12 = vld [vmem:[%s3136_s26 + $0xa0] sm:$0xff]  ;;  %v383_v13 = vld [vmem:[%s3136_s26 + $0xa8] sm:$0xff]  ;;  %s3255_s28 = scalar_lea.vmem [#allocation10], %s2395_s27 }
  0x74   : > { %514 = vmatpush.msra.mxu1 %v391_v5  ;;  %2419 = vmatpush.msra.mxu3 %v391_v5  ;;  %v380_v14 = vld [vmem:[%s3136_s26 + $0x90] sm:$0xff]  ;;  %v381_v15 = vld [vmem:[%s3136_s26 + $0x98] sm:$0xff]  ;;  %v378_v16 = vld [vmem:[%s3136_s26 + $0x80] sm:$0xff] }
  0x75   : > { %402 = vmatpush.msra.mxu0 %v388_v6  ;;  %2404 = vmatpush.msra.mxu2 %v388_v6  ;;  %v379_v17 = vld [vmem:[%s3136_s26 + $0x88] sm:$0xff]  ;;  %v376_v18 = vld [vmem:[%s3136_s26 + $0x70] sm:$0xff]  ;;  %v377_v19 = vld [vmem:[%s3136_s26 + $0x78] sm:$0xff] }
  0x76   : > { %515 = vmatpush.msra.mxu1 %v389_v7  ;;  %2420 = vmatpush.msra.mxu3 %v389_v7  ;;  %v374_v20 = vld [vmem:[%s3136_s26 + $0x60] sm:$0xff]  ;;  %v375_v21 = vld [vmem:[%s3136_s26 + $0x68] sm:$0xff]  ;;  %v372_v22 = vld [vmem:[%s3136_s26 + $0x50] sm:$0xff] }
  0x77   : > { %403 = vmatpush.msra.mxu0 %v386_v8  ;;  %2405 = vmatpush.msra.mxu2 %v386_v8  ;;  %v373_v23 = vld [vmem:[%s3136_s26 + $0x58] sm:$0xff]  ;;  %v370_v24 = vld [vmem:[%s3136_s26 + $0x40] sm:$0xff]  ;;  %v371_v25 = vld [vmem:[%s3136_s26 + $0x48] sm:$0xff] }
  0x78   : > { %516 = vmatpush.msra.mxu1 %v387_v9  ;;  %2421 = vmatpush.msra.mxu3 %v387_v9  ;;  %v368_v26 = vld [vmem:[%s3136_s26 + $0x30] sm:$0xff]  ;;  %v369_v27 = vld [vmem:[%s3136_s26 + $0x38] sm:$0xff]  ;;  %v366_v28 = vld [vmem:[%s3136_s26 + $0x20] sm:$0xff] }
  0x79   : > { %404 = vmatpush.msra.mxu0 %v384_v10  ;;  %2406 = vmatpush.msra.mxu2 %v384_v10  ;;  %v367_v29 = vld [vmem:[%s3136_s26 + $0x28] sm:$0xff]  ;;  %v364_v30 = vld [vmem:[%s3136_s26 + $0x10] sm:$0xff]  ;;  %v365_v31 = vld [vmem:[%s3136_s26 + $0x18] sm:$0xff] }
  0x7a   : > { %517 = vmatpush.msra.mxu1 %v385_v11  ;;  %2422 = vmatpush.msra.mxu3 %v385_v11  ;;  %v362_v32 = vld [vmem:[%s3136_s26] sm:$0xff]  ;;  %v363_v33 = vld [vmem:[%s3136_s26 + $0x8] sm:$0xff]  ;;  %v332_v38 = vld [vmem:[#allocation4 + $0x10] sm:$0xff] }
  0x7b   : > { %405 = vmatpush.msra.mxu0 %v382_v12  ;;  %2407 = vmatpush.msra.mxu2 %v382_v12  ;;  %v330_v34 = vld [vmem:[#allocation4] sm:$0xff]  ;;  %v331_v36 = vld [vmem:[#allocation4 + $0x8] sm:$0xff]  ;;  %v348_v39 = vld [vmem:[#allocation4 + $0x90] sm:$0xff] }
  0x7c   : > { %518 = vmatpush.msra.mxu1 %v383_v13  ;;  %2423 = vmatpush.msra.mxu3 %v383_v13  ;;  %v346_v35 = vld [vmem:[#allocation4 + $0x80] sm:$0xff]  ;;  %v347_v37 = vld [vmem:[#allocation4 + $0x88] sm:$0xff]  ;;  %v333_v40 = vld [vmem:[#allocation4 + $0x18] sm:$0xff] }
  0x7d   : > { %406 = vmatpush.msra.mxu0 %v380_v14  ;;  %2408 = vmatpush.msra.mxu2 %v380_v14  ;;  %v349_v41 = vld [vmem:[#allocation4 + $0x98] sm:$0xff]  ;;  %v334_v42 = vld [vmem:[#allocation4 + $0x20] sm:$0xff]  ;;  %v351_v44 = vld [vmem:[#allocation4 + $0xa8] sm:$0xff] }
  0x7e   : > { %519 = vmatpush.msra.mxu1 %v381_v15  ;;  %2424 = vmatpush.msra.mxu3 %v381_v15  ;;  %v350_v43 = vld [vmem:[#allocation4 + $0xa0] sm:$0xff]  ;;  %v335_v45 = vld [vmem:[#allocation4 + $0x28] sm:$0xff]  ;;  %v352_v46 = vld [vmem:[#allocation4 + $0xb0] sm:$0xff] }
  0x7f   : > { %407 = vmatpush.msra.mxu0 %v378_v16  ;;  %2409 = vmatpush.msra.mxu2 %v378_v16  ;;  %v336_v47 = vld [vmem:[#allocation4 + $0x30] sm:$0xff]  ;;  %v353_v48 = vld [vmem:[#allocation4 + $0xb8] sm:$0xff]  ;;  %v354_v50 = vld [vmem:[#allocation4 + $0xc0] sm:$0xff] }
  0x80   : > { %520 = vmatpush.msra.mxu1 %v379_v17  ;;  %2425 = vmatpush.msra.mxu3 %v379_v17  ;;  %v337_v49 = vld [vmem:[#allocation4 + $0x38] sm:$0xff]  ;;  %v338_v51 = vld [vmem:[#allocation4 + $0x40] sm:$0xff]  ;;  %v355_v52 = vld [vmem:[#allocation4 + $0xc8] sm:$0xff] }
  0x81   : > { %408 = vmatpush.msra.mxu0 %v376_v18  ;;  %2410 = vmatpush.msra.mxu2 %v376_v18  ;;  %v339_v53 = vld [vmem:[#allocation4 + $0x48] sm:$0xff]  ;;  %v356_v54 = vld [vmem:[#allocation4 + $0xd0] sm:$0xff]  ;;  %v357_v56 = vld [vmem:[#allocation4 + $0xd8] sm:$0xff] }
  0x82   : > { %521 = vmatpush.msra.mxu1 %v377_v19  ;;  %2426 = vmatpush.msra.mxu3 %v377_v19  ;;  %v340_v55 = vld [vmem:[#allocation4 + $0x50] sm:$0xff]  ;;  %v341_v57 = vld [vmem:[#allocation4 + $0x58] sm:$0xff]  ;;  %v358_v58 = vld [vmem:[#allocation4 + $0xe0] sm:$0xff] }
  0x83   : > { %409 = vmatpush.msra.mxu0 %v374_v20  ;;  %2411 = vmatpush.msra.mxu2 %v374_v20  ;;  %v342_v59 = vld [vmem:[#allocation4 + $0x60] sm:$0xff]  ;;  %v359_v60 = vld [vmem:[#allocation4 + $0xe8] sm:$0xff]  ;;  %v360_v62 = vld [vmem:[#allocation4 + $0xf0] sm:$0xff] }
  0x84   : > { %522 = vmatpush.msra.mxu1 %v375_v21  ;;  %2427 = vmatpush.msra.mxu3 %v375_v21  ;;  %v343_v61 = vld [vmem:[#allocation4 + $0x68] sm:$0xff]  ;;  %v344_v63 = vld [vmem:[#allocation4 + $0x70] sm:$0xff]  ;;  %v345_v0 = vld [vmem:[#allocation4 + $0x78] sm:$0xff] }
  0x85   : > { %410 = vmatpush.msra.mxu0 %v372_v22  ;;  %2412 = vmatpush.msra.mxu2 %v372_v22  ;;  %v394_v1 = vld [vmem:[%s233_s7] sm:$0x3]  ;;  %v361_v20 = vld [vmem:[#allocation4 + $0xf8] sm:$0xff] }
  0x86   : > { %523 = vmatpush.msra.mxu1 %v373_v23  ;;  %2428 = vmatpush.msra.mxu3 %v373_v23  ;;  %v3245_v2 = vperm.slane %v394_v1, 0  ;;  %v3247_v3 = vperm.slane %v394_v1, 1 }
  0x87   : > { %411 = vmatpush.msra.mxu0 %v370_v24  ;;  %2413 = vmatpush.msra.mxu2 %v370_v24 }
  0x88   : > { %524 = vmatpush.msra.mxu1 %v371_v25  ;;  %2429 = vmatpush.msra.mxu3 %v371_v25 }
  0x89   : > { %412 = vmatpush.msra.mxu0 %v368_v26  ;;  %2414 = vmatpush.msra.mxu2 %v368_v26 }
  0x8a   : > { %525 = vmatpush.msra.mxu1 %v369_v27  ;;  %2430 = vmatpush.msra.mxu3 %v369_v27 }
  0x8b   : > { %413 = vmatpush.msra.mxu0 %v366_v28  ;;  %2415 = vmatpush.msra.mxu2 %v366_v28 }
  0x8c   : > { %526 = vmatpush.msra.mxu1 %v367_v29  ;;  %2431 = vmatpush.msra.mxu3 %v367_v29 }
  0x8d   : > { %414 = vmatpush.msra.mxu0 %v364_v30  ;;  %2416 = vmatpush.msra.mxu2 %v364_v30 }
  0x8e   : > { %527 = vmatpush.msra.mxu1 %v365_v31  ;;  %2432 = vmatpush.msra.mxu3 %v365_v31 }
  0x8f   : > { %415 = vmatpush.msra.mxu0 %v362_v32  ;;  %2417 = vmatpush.msra.mxu2 %v362_v32 }
  0x90   : > { %528 = vmatpush.msra.mxu1 %v363_v33  ;;  %2433 = vmatpush.msra.mxu3 %v363_v33 }
  0x91   : > { %416 = vmatmul.f32.vlgmr.msra.gmra.mxu0 %v330_v34  ;;  %464 = vmatmul.f32.vlgmr.msra.gmra.mxu2 %v346_v35 }
  0x92   : > { %529 = vmatmul.f32.vlgmr.msra.gmra.mxu1 %v330_v34  ;;  %577 = vmatmul.f32.vlgmr.msra.gmra.mxu3 %v346_v35 }
  0x99   : > { %419 = vmatmul.f32.gmra.mxu0 %v331_v36  ;;  %467 = vmatmul.f32.gmra.mxu2 %v347_v37 }
  0x9a   : > { %532 = vmatmul.f32.gmra.mxu1 %v331_v36  ;;  %580 = vmatmul.f32.gmra.mxu3 %v347_v37 }
  0xa1   : > { %422 = vmatmul.f32.gmra.mxu0 %v332_v38  ;;  %470 = vmatmul.f32.gmra.mxu2 %v348_v39 }
  0xa2   : > { %535 = vmatmul.f32.gmra.mxu1 %v332_v38  ;;  %583 = vmatmul.f32.gmra.mxu3 %v348_v39 }
  0xa9   : > { %425 = vmatmul.f32.gmra.mxu0 %v333_v40  ;;  %473 = vmatmul.f32.gmra.mxu2 %v349_v41 }
  0xaa   : > { %538 = vmatmul.f32.gmra.mxu1 %v333_v40  ;;  %586 = vmatmul.f32.gmra.mxu3 %v349_v41 }
  0xb1   : > { %428 = vmatmul.f32.gmra.mxu0 %v334_v42  ;;  %476 = vmatmul.f32.gmra.mxu2 %v350_v43 }
  0xb2   : > { %541 = vmatmul.f32.gmra.mxu1 %v334_v42  ;;  %589 = vmatmul.f32.gmra.mxu3 %v350_v43 }
  0xb9   : > { %479 = vmatmul.f32.gmra.mxu2 %v351_v44  ;;  %431 = vmatmul.f32.gmra.mxu0 %v335_v45 }
  0xba   : > { %592 = vmatmul.f32.gmra.mxu3 %v351_v44  ;;  %544 = vmatmul.f32.gmra.mxu1 %v335_v45 }
  0xc1   : > { %482 = vmatmul.f32.gmra.mxu2 %v352_v46  ;;  %434 = vmatmul.f32.gmra.mxu0 %v336_v47 }
  0xc2   : > { %595 = vmatmul.f32.gmra.mxu3 %v352_v46  ;;  %547 = vmatmul.f32.gmra.mxu1 %v336_v47 }
  0xc9   : > { %485 = vmatmul.f32.gmra.mxu2 %v353_v48  ;;  %437 = vmatmul.f32.gmra.mxu0 %v337_v49 }
  0xca   : > { %598 = vmatmul.f32.gmra.mxu3 %v353_v48  ;;  %550 = vmatmul.f32.gmra.mxu1 %v337_v49 }
  0xd1   : > { %488 = vmatmul.f32.gmra.mxu2 %v354_v50  ;;  %440 = vmatmul.f32.gmra.mxu0 %v338_v51 }
  0xd2   : > { %601 = vmatmul.f32.gmra.mxu3 %v354_v50  ;;  %553 = vmatmul.f32.gmra.mxu1 %v338_v51 }
  0xd9   : > { %491 = vmatmul.f32.gmra.mxu2 %v355_v52  ;;  %443 = vmatmul.f32.gmra.mxu0 %v339_v53 }
  0xda   : > { %604 = vmatmul.f32.gmra.mxu3 %v355_v52  ;;  %556 = vmatmul.f32.gmra.mxu1 %v339_v53 }
  0xe1   : > { %494 = vmatmul.f32.gmra.mxu2 %v356_v54  ;;  %446 = vmatmul.f32.gmra.mxu0 %v340_v55 }
  0xe2   : > { %607 = vmatmul.f32.gmra.mxu3 %v356_v54  ;;  %559 = vmatmul.f32.gmra.mxu1 %v340_v55 }
  0xe9   : > { %497 = vmatmul.f32.gmra.mxu2 %v357_v56  ;;  %449 = vmatmul.f32.gmra.mxu0 %v341_v57 }
  0xea   : > { %610 = vmatmul.f32.gmra.mxu3 %v357_v56  ;;  %562 = vmatmul.f32.gmra.mxu1 %v341_v57 }
  0xf1   : > { %500 = vmatmul.f32.gmra.mxu2 %v358_v58  ;;  %452 = vmatmul.f32.gmra.mxu0 %v342_v59 }
  0xf2   : > { %613 = vmatmul.f32.gmra.mxu3 %v358_v58  ;;  %565 = vmatmul.f32.gmra.mxu1 %v342_v59 }
  0xf9   : > { %503 = vmatmul.f32.gmra.mxu2 %v359_v60  ;;  %455 = vmatmul.f32.gmra.mxu0 %v343_v61 }
  0xfa   : > { %616 = vmatmul.f32.gmra.mxu3 %v359_v60  ;;  %568 = vmatmul.f32.gmra.mxu1 %v343_v61 }
 0x101   : > { %506 = vmatmul.f32.gmra.mxu2 %v360_v62  ;;  %458 = vmatmul.f32.gmra.mxu0 %v344_v63 }
 0x102   : > { %619 = vmatmul.f32.gmra.mxu3 %v360_v62  ;;  %571 = vmatmul.f32.gmra.mxu1 %v344_v63 }
 0x109   : > { %461 = vmatmul.f32.gmra.mxu0 %v345_v0  ;;  %509 = vmatmul.f32.gmra.mxu2 %v361_v20 }
 0x10a   : > { %574 = vmatmul.f32.gmra.mxu1 %v345_v0  ;;  %622 = vmatmul.f32.gmra.mxu3 %v361_v20 }
 0x10e   : > { %v417_v4 = vpop.f32.mrf.mxu0 }
 0x10f   : > { %v3250_v5 = vadd.f32 %v417_v4, %v3245_v2  ;;  %v530_v6 = vpop.f32.mrf.mxu1 }
 0x110   : > { %v3253_v7 = vadd.f32 %v530_v6, %v3247_v3 }
 0x111   : > { %1496 = vst [vmem:[%s3255_s28] sm:$0xff] %v3250_v5 }
 0x112   : > { %1497 = vst [vmem:[%s3255_s28 + $0x8] sm:$0xff] %v3253_v7  ;;  %v658_v8 = vmax.f32 %v3250_v5, %v3253_v7 }
 0x114   : > { %v465_v9 = vpop.f32.mrf.mxu2  ;;  %659 = vmax.xlane.f32.xlu0 %v658_v8 }
 0x115   : > { %v3264_v10 = vadd.f32 %v465_v9, %v3245_v2  ;;  %v578_v11 = vpop.f32.mrf.mxu3 }
 0x116   : > { %v3267_v12 = vadd.f32 %v578_v11, %v3247_v3  ;;  %v420_v13 = vpop.f32.mrf.mxu0 }
 0x117   : > { %1528 = vst [vmem:[%s3255_s28 + $0x200] sm:$0xff] %v3264_v10  ;;  %v3272_v14 = vadd.f32 %v420_v13, %v3245_v2  ;;  %v533_v15 = vpop.f32.mrf.mxu1 }
 0x118   : > { %1529 = vst [vmem:[%s3255_s28 + $0x208] sm:$0xff] %v3267_v12  ;;  %v3277_v16 = vadd.f32 %v533_v15, %v3247_v3  ;;  %v706_v17 = vmax.f32 %v3264_v10, %v3267_v12 }
 0x119   : > { %1498 = vst [vmem:[%s3255_s28 + $0x20] sm:$0xff] %v3272_v14 }
 0x11a   : > { %1499 = vst [vmem:[%s3255_s28 + $0x28] sm:$0xff] %v3277_v16  ;;  %707 = vmax.xlane.f32.xlu1 %v706_v17  ;;  %v661_v18 = vmax.f32 %v3272_v14, %v3277_v16 }
 0x11c   : > { %v468_v19 = vpop.f32.mrf.mxu2  ;;  %662 = vmax.xlane.f32.xlu0 %v661_v18 }
 0x11d   : > { %v469_v21 = vadd.f32 %v468_v19, %v3245_v2  ;;  %v581_v22 = vpop.f32.mrf.mxu3 }
 0x11e   : > { %v582_v23 = vadd.f32 %v581_v22, %v3247_v3  ;;  %v423_v24 = vpop.f32.mrf.mxu0 }
 0x11f   : > { %1530 = vst [vmem:[%s3255_s28 + $0x220] sm:$0xff] %v469_v21  ;;  %v424_v25 = vadd.f32 %v423_v24, %v3245_v2  ;;  %v536_v26 = vpop.f32.mrf.mxu1 }
 0x120   : > { %1531 = vst [vmem:[%s3255_s28 + $0x228] sm:$0xff] %v582_v23  ;;  %v537_v27 = vadd.f32 %v536_v26, %v3247_v3  ;;  %v709_v28 = vmax.f32 %v469_v21, %v582_v23 }
 0x121   : > { %1500 = vst [vmem:[%s3255_s28 + $0x40] sm:$0xff] %v424_v25 }
 0x122   : > { %1501 = vst [vmem:[%s3255_s28 + $0x48] sm:$0xff] %v537_v27  ;;  %710 = vmax.xlane.f32.xlu2 %v709_v28  ;;  %v664_v29 = vmax.f32 %v424_v25, %v537_v27 }
 0x124   : > { %665 = vmax.xlane.f32.xlu1 %v664_v29  ;;  %v471_v30 = vpop.f32.mrf.mxu2 }
 0x125   : > { %v3296_v31 = vadd.f32 %v471_v30, %v3245_v2  ;;  %v584_v32 = vpop.f32.mrf.mxu3 }
 0x126   : > { %v3299_v33 = vadd.f32 %v584_v32, %v3247_v3  ;;  %v426_v34 = vpop.f32.mrf.mxu0 }
 0x127   : > { %1532 = vst [vmem:[%s3255_s28 + $0x240] sm:$0xff] %v3296_v31  ;;  %v3304_v35 = vadd.f32 %v426_v34, %v3245_v2  ;;  %v539_v36 = vpop.f32.mrf.mxu1 }
 0x128   : > { %1533 = vst [vmem:[%s3255_s28 + $0x248] sm:$0xff] %v3299_v33  ;;  %v3309_v37 = vadd.f32 %v539_v36, %v3247_v3  ;;  %v712_v38 = vmax.f32 %v3296_v31, %v3299_v33 }
 0x129   : > { %1502 = vst [vmem:[%s3255_s28 + $0x60] sm:$0xff] %v3304_v35 }
 0x12a   : > { %1503 = vst [vmem:[%s3255_s28 + $0x68] sm:$0xff] %v3309_v37  ;;  %713 = vmax.xlane.f32.xlu0 %v712_v38  ;;  %v667_v39 = vmax.f32 %v3304_v35, %v3309_v37 }
 0x12c   : > { %668 = vmax.xlane.f32.xlu1 %v667_v39  ;;  %v474_v40 = vpop.f32.mrf.mxu2 }
 0x12d   : > { %v3320_v41 = vadd.f32 %v474_v40, %v3245_v2  ;;  %v587_v42 = vpop.f32.mrf.mxu3 }
 0x12e   : > { %v3323_v43 = vadd.f32 %v587_v42, %v3247_v3  ;;  %v429_v44 = vpop.f32.mrf.mxu0 }
 0x12f   : > { %1534 = vst [vmem:[%s3255_s28 + $0x260] sm:$0xff] %v3320_v41  ;;  %v3328_v45 = vadd.f32 %v429_v44, %v3245_v2  ;;  %v542_v46 = vpop.f32.mrf.mxu1 }
 0x130   : > { %1535 = vst [vmem:[%s3255_s28 + $0x268] sm:$0xff] %v3323_v43  ;;  %v3333_v47 = vadd.f32 %v542_v46, %v3247_v3  ;;  %v715_v49 = vmax.f32 %v3320_v41, %v3323_v43 }
 0x131   : > { %1504 = vst [vmem:[%s3255_s28 + $0x80] sm:$0xff] %v3328_v45 }
 0x132   : > { %1505 = vst [vmem:[%s3255_s28 + $0x88] sm:$0xff] %v3333_v47  ;;  %v670_v48 = vmax.f32 %v3328_v45, %v3333_v47 }
 0x134   : > { %671 = vmax.xlane.f32.xlu2 %v670_v48  ;;  %716 = vmax.xlane.f32.xlu1 %v715_v49  ;;  %v477_v50 = vpop.f32.mrf.mxu2 }
 0x135   : > { %v478_v51 = vadd.f32 %v477_v50, %v3245_v2  ;;  %v590_v52 = vpop.f32.mrf.mxu3 }
 0x136   : > { %v591_v53 = vadd.f32 %v590_v52, %v3247_v3  ;;  %v432_v54 = vpop.f32.mrf.mxu0 }
 0x137   : > { %1536 = vst [vmem:[%s3255_s28 + $0x280] sm:$0xff] %v478_v51  ;;  %v433_v55 = vadd.f32 %v432_v54, %v3245_v2  ;;  %v545_v56 = vpop.f32.mrf.mxu1 }
 0x138   : > { %1537 = vst [vmem:[%s3255_s28 + $0x288] sm:$0xff] %v591_v53  ;;  %v546_v57 = vadd.f32 %v545_v56, %v3247_v3  ;;  %v718_v58 = vmax.f32 %v478_v51, %v591_v53 }
 0x139   : > { %1506 = vst [vmem:[%s3255_s28 + $0xa0] sm:$0xff] %v433_v55 }
 0x13a   : > { %1507 = vst [vmem:[%s3255_s28 + $0xa8] sm:$0xff] %v546_v57  ;;  %v673_v8 = vmax.f32 %v433_v55, %v546_v57 }
 0x13c   : > { %719 = vmax.xlane.f32.xlu2 %v718_v58  ;;  %v480_v59 = vpop.f32.mrf.mxu2 }
 0x13d   : > { %v3352_v60 = vadd.f32 %v480_v59, %v3245_v2  ;;  %v593_v61 = vpop.f32.mrf.mxu3 }
 0x13e   : > { %v3355_v62 = vadd.f32 %v593_v61, %v3247_v3  ;;  %v435_v63 = vpop.f32.mrf.mxu0 }
 0x13f   : > { %1538 = vst [vmem:[%s3255_s28 + $0x2a0] sm:$0xff] %v3352_v60  ;;  %v3360_v0 = vadd.f32 %v435_v63, %v3245_v2  ;;  %v548_v1 = vpop.f32.mrf.mxu1 }
 0x140   : > { %1539 = vst [vmem:[%s3255_s28 + $0x2a8] sm:$0xff] %v3355_v62  ;;  %v721_v4 = vmax.f32 %v3352_v60, %v3355_v62  ;;  %v3367_v6 = vadd.f32 %v548_v1, %v3247_v3 }
 0x141   : > { %1508 = vst [vmem:[%s3255_s28 + $0xc0] sm:$0xff] %v3360_v0 }
 0x142   : > { %722 = vmax.xlane.f32.xlu0 %v721_v4  ;;  %1509 = vst [vmem:[%s3255_s28 + $0xc8] sm:$0xff] %v3367_v6  ;;  %v676_v17 = vmax.f32 %v3360_v0, %v3367_v6 }
 0x144   : > { %674 = vmax.xlane.f32.xlu2 %v673_v8  ;;  %v483_v9 = vpop.f32.mrf.mxu2 }
 0x145   : > { %v484_v11 = vadd.f32 %v483_v9, %v3245_v2  ;;  %v596_v13 = vpop.f32.mrf.mxu3 }
 0x146   : > { %v597_v15 = vadd.f32 %v596_v13, %v3247_v3  ;;  %v438_v18 = vpop.f32.mrf.mxu0 }
 0x147   : > { %1540 = vst [vmem:[%s3255_s28 + $0x2c0] sm:$0xff] %v484_v11  ;;  %v439_v19 = vadd.f32 %v438_v18, %v3245_v2  ;;  %v551_v20 = vpop.f32.mrf.mxu1 }
 0x148   : > { %1541 = vst [vmem:[%s3255_s28 + $0x2c8] sm:$0xff] %v597_v15  ;;  %v724_v21 = vmax.f32 %v484_v11, %v597_v15  ;;  %v552_v22 = vadd.f32 %v551_v20, %v3247_v3 }
 0x149   : > { %1510 = vst [vmem:[%s3255_s28 + $0xe0] sm:$0xff] %v439_v19 }
 0x14a   : > { %725 = vmax.xlane.f32.xlu1 %v724_v21  ;;  %677 = vmax.xlane.f32.xlu0 %v676_v17  ;;  %1511 = vst [vmem:[%s3255_s28 + $0xe8] sm:$0xff] %v552_v22  ;;  %v679_v27 = vmax.f32 %v439_v19, %v552_v22 }
 0x14c   : > { %v486_v23 = vpop.f32.mrf.mxu2 }
 0x14d   : > { %v487_v24 = vadd.f32 %v486_v23, %v3245_v2  ;;  %v599_v25 = vpop.f32.mrf.mxu3 }
 0x14e   : > { %v600_v26 = vadd.f32 %v599_v25, %v3247_v3  ;;  %v441_v28 = vpop.f32.mrf.mxu0 }
 0x14f   : > { %1542 = vst [vmem:[%s3255_s28 + $0x2e0] sm:$0xff] %v487_v24  ;;  %v442_v29 = vadd.f32 %v441_v28, %v3245_v2  ;;  %v554_v30 = vpop.f32.mrf.mxu1 }
 0x150   : > { %1543 = vst [vmem:[%s3255_s28 + $0x2e8] sm:$0xff] %v600_v26  ;;  %v727_v32 = vmax.f32 %v487_v24, %v600_v26  ;;  %v555_v34 = vadd.f32 %v554_v30, %v3247_v3 }
 0x151   : > { %1512 = vst [vmem:[%s3255_s28 + $0x100] sm:$0xff] %v442_v29 }
 0x152   : > { %728 = vmax.xlane.f32.xlu2 %v727_v32  ;;  %680 = vmax.xlane.f32.xlu1 %v679_v27  ;;  %1513 = vst [vmem:[%s3255_s28 + $0x108] sm:$0xff] %v555_v34  ;;  %v682_v42 = vmax.f32 %v442_v29, %v555_v34 }
 0x154   : > { %v489_v36 = vpop.f32.mrf.mxu2 }
 0x155   : > { %v3392_v38 = vadd.f32 %v489_v36, %v3245_v2  ;;  %v602_v39 = vpop.f32.mrf.mxu3 }
 0x156   : > { %v3395_v40 = vadd.f32 %v602_v39, %v3247_v3  ;;  %v444_v44 = vpop.f32.mrf.mxu0 }
 0x157   : > { %1544 = vst [vmem:[%s3255_s28 + $0x300] sm:$0xff] %v3392_v38  ;;  %v3400_v46 = vadd.f32 %v444_v44, %v3245_v2  ;;  %v557_v48 = vpop.f32.mrf.mxu1 }
 0x158   : > { %1545 = vst [vmem:[%s3255_s28 + $0x308] sm:$0xff] %v3395_v40  ;;  %v730_v49 = vmax.f32 %v3392_v38, %v3395_v40  ;;  %v3407_v50 = vadd.f32 %v557_v48, %v3247_v3 }
 0x159   : > { %1514 = vst [vmem:[%s3255_s28 + $0x120] sm:$0xff] %v3400_v46 }
 0x15a   : > { %683 = vmax.xlane.f32.xlu2 %v682_v42  ;;  %731 = vmax.xlane.f32.xlu0 %v730_v49  ;;  %1515 = vst [vmem:[%s3255_s28 + $0x128] sm:$0xff] %v3407_v50  ;;  %v685_v55 = vmax.f32 %v3400_v46, %v3407_v50 }
 0x15c   : > { %v492_v51 = vpop.f32.mrf.mxu2 }
 0x15d   : > { %v493_v52 = vadd.f32 %v492_v51, %v3245_v2  ;;  %v605_v53 = vpop.f32.mrf.mxu3  ;;  %v3005_v51 = vmov 0  }
 0x15e   : > { %v606_v54 = vadd.f32 %v605_v53, %v3247_v3  ;;  %v447_v56 = vpop.f32.mrf.mxu0  ;;  %2524 = vset.pattern.permute.xlu1 %v3005_v51  ;;  %2523 = vset.pattern.permute.xlu2 %v3005_v51 }
 0x15f   : > { %1546 = vst [vmem:[%s3255_s28 + $0x320] sm:$0xff] %v493_v52  ;;  %v448_v57 = vadd.f32 %v447_v56, %v3245_v2  ;;  %v560_v58 = vpop.f32.mrf.mxu1  ;;  %2525 = vset.pattern.permute.xlu0 %v3005_v51  ;;  %v3524_v51 = vld [vmem:[#allocation2 + $0x10] sm:$0xff] }
 0x160   : > { %1547 = vst [vmem:[%s3255_s28 + $0x328] sm:$0xff] %v606_v54  ;;  %v733_v59 = vmax.f32 %v493_v52, %v606_v54  ;;  %v561_v61 = vadd.f32 %v560_v58, %v3247_v3 }
 0x161   : > { %1516 = vst [vmem:[%s3255_s28 + $0x140] sm:$0xff] %v448_v57 }
 0x162   : > { %734 = vmax.xlane.f32.xlu1 %v733_v59  ;;  %686 = vmax.xlane.f32.xlu0 %v685_v55  ;;  %1517 = vst [vmem:[%s3255_s28 + $0x148] sm:$0xff] %v561_v61  ;;  %v688_v9 = vmax.f32 %v448_v57, %v561_v61 }
 0x163   : > { %4108 = vst [vmem:[#allocation15_spill] sm:$0xff] %v3524_v51 }
 0x164   : > { %v495_v63 = vpop.f32.mrf.mxu2 }
 0x165   : > { %v496_v1 = vadd.f32 %v495_v63, %v3245_v2  ;;  %v608_v4 = vpop.f32.mrf.mxu3 }
 0x166   : > { %v609_v8 = vadd.f32 %v608_v4, %v3247_v3  ;;  %v450_v11 = vpop.f32.mrf.mxu0 }
 0x167   : > { %1548 = vst [vmem:[%s3255_s28 + $0x340] sm:$0xff] %v496_v1  ;;  %v451_v13 = vadd.f32 %v450_v11, %v3245_v2  ;;  %v563_v15 = vpop.f32.mrf.mxu1 }
 0x168   : > { %1549 = vst [vmem:[%s3255_s28 + $0x348] sm:$0xff] %v609_v8  ;;  %v736_v17 = vmax.f32 %v496_v1, %v609_v8  ;;  %v564_v18 = vadd.f32 %v563_v15, %v3247_v3 }
 0x169   : > { %1518 = vst [vmem:[%s3255_s28 + $0x160] sm:$0xff] %v451_v13 }
 0x16a   : > { %737 = vmax.xlane.f32.xlu2 %v736_v17  ;;  %689 = vmax.xlane.f32.xlu1 %v688_v9  ;;  %1519 = vst [vmem:[%s3255_s28 + $0x168] sm:$0xff] %v564_v18  ;;  %v691_v23 = vmax.f32 %v451_v13, %v564_v18  ;;  %v3474_v9 = vld [vmem:[#allocation2] sm:$0xff] }
 0x16c   : > { %v498_v19 = vpop.f32.mrf.mxu2 }
 0x16d   : > { %v3432_v20 = vadd.f32 %v498_v19, %v3245_v2  ;;  %v611_v21 = vpop.f32.mrf.mxu3 }
 0x16e   : > { %v3435_v22 = vadd.f32 %v611_v21, %v3247_v3  ;;  %v453_v24 = vpop.f32.mrf.mxu0 }
 0x16f   : > { %1550 = vst [vmem:[%s3255_s28 + $0x360] sm:$0xff] %v3432_v20  ;;  %v3440_v25 = vadd.f32 %v453_v24, %v3245_v2  ;;  %v566_v26 = vpop.f32.mrf.mxu1 }
 0x170   : > { %1551 = vst [vmem:[%s3255_s28 + $0x368] sm:$0xff] %v3435_v22  ;;  %v739_v27 = vmax.f32 %v3432_v20, %v3435_v22  ;;  %v3447_v28 = vadd.f32 %v566_v26, %v3247_v3 }
 0x171   : > { %1520 = vst [vmem:[%s3255_s28 + $0x180] sm:$0xff] %v3440_v25 }
 0x172   : > { %692 = vmax.xlane.f32.xlu2 %v691_v23  ;;  %740 = vmax.xlane.f32.xlu0 %v739_v27  ;;  %1521 = vst [vmem:[%s3255_s28 + $0x188] sm:$0xff] %v3447_v28  ;;  %v694_v36 = vmax.f32 %v3440_v25, %v3447_v28  ;;  %v3500_v27 = vld [vmem:[#allocation2 + $0x80] sm:$0xff] }
 0x174   : > { %v501_v29 = vpop.f32.mrf.mxu2 }
 0x175   : > { %v502_v30 = vadd.f32 %v501_v29, %v3245_v2  ;;  %v614_v32 = vpop.f32.mrf.mxu3 }
 0x176   : > { %v615_v34 = vadd.f32 %v614_v32, %v3247_v3  ;;  %v456_v39 = vpop.f32.mrf.mxu0 }
 0x177   : > { %1552 = vst [vmem:[%s3255_s28 + $0x380] sm:$0xff] %v502_v30  ;;  %v457_v42 = vadd.f32 %v456_v39, %v3245_v2  ;;  %v569_v44 = vpop.f32.mrf.mxu1 }
 0x178   : > { %1553 = vst [vmem:[%s3255_s28 + $0x388] sm:$0xff] %v615_v34  ;;  %v742_v48 = vmax.f32 %v502_v30, %v615_v34  ;;  %v570_v49 = vadd.f32 %v569_v44, %v3247_v3  ;;  %v3504_v30 = vld [vmem:[#allocation2 + $0x8] sm:$0xff] }
 0x179   : > { %1522 = vst [vmem:[%s3255_s28 + $0x1a0] sm:$0xff] %v457_v42 }
 0x17a   : > { %743 = vmax.xlane.f32.xlu1 %v742_v48  ;;  %695 = vmax.xlane.f32.xlu0 %v694_v36  ;;  %1523 = vst [vmem:[%s3255_s28 + $0x1a8] sm:$0xff] %v570_v49  ;;  %v697_v56 = vmax.f32 %v457_v42, %v570_v49  ;;  %v3522_v48 = vld [vmem:[#allocation2 + $0x88] sm:$0xff] }
 0x17b   : > { %4107 = vst [vmem:[#allocation14_spill] sm:$0xff] %v3522_v48 }
 0x17c   : > { %v504_v52 = vpop.f32.mrf.mxu2 }
 0x17d   : > { %v505_v53 = vadd.f32 %v504_v52, %v3245_v2  ;;  %v617_v54 = vpop.f32.mrf.mxu3 }
 0x17e   : > { %v618_v55 = vadd.f32 %v617_v54, %v3247_v3  ;;  %v459_v57 = vpop.f32.mrf.mxu0 }
 0x17f   : > { %1554 = vst [vmem:[%s3255_s28 + $0x3a0] sm:$0xff] %v505_v53  ;;  %v460_v58 = vadd.f32 %v459_v57, %v3245_v2  ;;  %v572_v59 = vpop.f32.mrf.mxu1 }
 0x180   : > { %1555 = vst [vmem:[%s3255_s28 + $0x3a8] sm:$0xff] %v618_v55  ;;  %v745_v61 = vmax.f32 %v505_v53, %v618_v55  ;;  %v573_v63 = vadd.f32 %v572_v59, %v3247_v3 }
 0x181   : > { %1524 = vst [vmem:[%s3255_s28 + $0x1c0] sm:$0xff] %v460_v58 }
 0x182   : > { %746 = vmax.xlane.f32.xlu2 %v745_v61  ;;  %698 = vmax.xlane.f32.xlu1 %v697_v56  ;;  %1525 = vst [vmem:[%s3255_s28 + $0x1c8] sm:$0xff] %v573_v63  ;;  %v700_v13 = vmax.f32 %v460_v58, %v573_v63  ;;  %v3539_v56 = vld [vmem:[#allocation2 + $0x90] sm:$0xff]  ;;  %v3541_v58 = vld [vmem:[#allocation2 + $0x18] sm:$0xff] }
 0x183   : > { %v3615_v63 = vld [vmem:[#allocation2 + $0x30] sm:$0xff] }
 0x184   : > { %v507_v1 = vpop.f32.mrf.mxu2 }
 0x185   : > { %v3472_v4 = vadd.f32 %v507_v1, %v3245_v2  ;;  %v620_v8 = vpop.f32.mrf.mxu3 }
 0x186   : > { %v3477_v11 = vadd.f32 %v620_v8, %v3247_v3  ;;  %v462_v15 = vpop.f32.mrf.mxu0 }
 0x187   : > { %1556 = vst [vmem:[%s3255_s28 + $0x3c0] sm:$0xff] %v3472_v4  ;;  %v3482_v17 = vadd.f32 %v462_v15, %v3245_v2  ;;  %v575_v18 = vpop.f32.mrf.mxu1  ;;  %v660_v19 = vpop.xlane.xlu0 %659 }
 0x188   : > { %1557 = vst [vmem:[%s3255_s28 + $0x3c8] sm:$0xff] %v3477_v11  ;;  %v748_v21 = vmax.f32 %v3472_v4, %v3477_v11  ;;  %v3489_v23 = vadd.f32 %v575_v18, %v3247_v3  ;;  %v3492_v24 = vmax.f32 %v3474_v9, %v660_v19 }
 0x189   : > { %1526 = vst [vmem:[%s3255_s28 + $0x1e0] sm:$0xff] %v3482_v17 }
 0x18a   : > { %701 = vmax.xlane.f32.xlu2 %v700_v13  ;;  %749 = vmax.xlane.f32.xlu0 %v748_v21  ;;  %1527 = vst [vmem:[%s3255_s28 + $0x1e8] sm:$0xff] %v3489_v23  ;;  %v703_v34 = vmax.f32 %v3482_v17, %v3489_v23  ;;  %v3561_v21 = vld [vmem:[#allocation2 + $0x20] sm:$0xff] }
 0x18b   : > { %1459 = vst.msk [vmem:[#allocation2] sm:$0xff] %vm1426_vm1, %v3492_v24 }
 0x18c   : > { %v510_v8 = vpop.f32.mrf.mxu2  ;;  %4111 = vst [vmem:[#allocation18_spill] sm:$0xff] %v3561_v21 }
 0x18d   : > { %v708_v29 = vpop.xlane.xlu1 %707  ;;  %v623_v13 = vpop.f32.mrf.mxu3  ;;  %v511_v18 = vadd.f32 %v510_v8, %v3245_v2  ;;  %v3595_v2 = vld [vmem:[#allocation2 + $0x28] sm:$0xff] }
 0x18e   : > { %v3507_v32 = vmax.f32 %v3500_v27, %v708_v29  ;;  %v624_v19 = vadd.f32 %v623_v13, %v3247_v3  ;;  %v3563_v29 = vld [vmem:[#allocation2 + $0x98] sm:$0xff]  ;;  %4117 = vst [vmem:[#allocation24_spill] sm:$0xff] %v3595_v2 }
 0x18f   : > { %v663_v36 = vpop.xlane.xlu0 %662  ;;  %1558 = vst [vmem:[%s3255_s28 + $0x3e0] sm:$0xff] %v511_v18 }
 0x190   : > { %1475 = vst.msk [vmem:[#allocation2 + $0x80] sm:$0xff] %vm1426_vm1, %v3507_v32  ;;  %v3516_v42 = vmax.f32 %v3504_v30, %v663_v36 }
 0x191   : > { %4112 = vst [vmem:[#allocation19_spill] sm:$0xff] %v3563_v29 }
 0x192   : > { %704 = vmax.xlane.f32.xlu0 %v703_v34  ;;  %1460 = vst.msk [vmem:[#allocation2 + $0x8] sm:$0xff] %vm1426_vm1, %v3516_v42 }
 0x193   : > { %1559 = vst [vmem:[%s3255_s28 + $0x3e8] sm:$0xff] %v624_v19 }
 0x195   : > { %v711_v49 = vpop.xlane.xlu2 %710 }
 0x196   : > { %v3527_v52 = vmax.f32 %v3522_v48, %v711_v49 }
 0x197   : > { %v666_v53 = vpop.xlane.xlu1 %665 }
 0x198   : > { %4109 = vst [vmem:[#allocation16_spill] sm:$0xff] %v3527_v52  ;;  %v3534_v55 = vmax.f32 %v3524_v51, %v666_v53 }
 0x199   : > { %1476 = vst.msk [vmem:[#allocation2 + $0x88] sm:$0xff] %vm1426_vm1, %v3527_v52 }
 0x19a   : > { %4110 = vst [vmem:[#allocation17_spill] sm:$0xff] %v3534_v55 }
 0x19b   : > { %1461 = vst.msk [vmem:[#allocation2 + $0x10] sm:$0xff] %vm1426_vm1, %v3534_v55  ;;  %1028 = vperm.xlu1 %2524, %v3507_v32  }
 0x19d   : > { %v714_v57 = vpop.xlane.xlu0 %713 }
 0x19e   : > { %v3544_v59 = vmax.f32 %v3539_v56, %v714_v57  ;;  %v3582_v57 = vld [vmem:[#allocation2 + $0xa0] sm:$0xff] }
 0x19f   : > { %v669_v61 = vpop.xlane.xlu1 %668  ;;  %4115 = vst [vmem:[#allocation22_spill] sm:$0xff] %v3582_v57 }
 0x1a0   : > { %1477 = vst.msk [vmem:[#allocation2 + $0x90] sm:$0xff] %vm1426_vm1, %v3544_v59  ;;  %v3551_v1 = vmax.f32 %v3541_v58, %v669_v61 }
 0x1a2   : > { %1462 = vst.msk [vmem:[#allocation2 + $0x18] sm:$0xff] %vm1426_vm1, %v3551_v1  ;;  %948 = vperm.xlu2 %2523, %v3492_v24  }
 0x1a6   : > { %953 = vperm.xlu0 %2525, %v3516_v42  }
 0x1a7   : > { %v672_v34 = vpop.xlane.xlu2 %671  ;;  %v717_v36 = vpop.xlane.xlu1 %716 }
 0x1a8   : > { %v3568_v49 = vmax.f32 %v3561_v21, %v672_v34  ;;  %v3571_v53 = vmax.f32 %v3563_v29, %v717_v36  ;;  %v3593_v34 = vld [vmem:[#allocation2 + $0xa8] sm:$0xff]  ;;  %v3691_v21 = vld [vmem:[#allocation2 + $0xd0] sm:$0xff] }
 0x1a9   : > { %4129 = vst [vmem:[#allocation36_spill] sm:$0xff] %v3691_v21 }
 0x1aa   : > { %4113 = vst [vmem:[#allocation20_spill] sm:$0xff] %v3568_v49  ;;  %1038 = vperm.xlu2 %2523, %v3544_v59  }
 0x1ab   : > { %4114 = vst [vmem:[#allocation21_spill] sm:$0xff] %v3571_v53 }
 0x1ac   : > { %1463 = vst.msk [vmem:[#allocation2 + $0x20] sm:$0xff] %vm1426_vm1, %v3568_v49 }
 0x1ad   : > { %1478 = vst.msk [vmem:[#allocation2 + $0x98] sm:$0xff] %vm1426_vm1, %v3571_v53 }
 0x1ae   : > { %1033 = vperm.xlu0 %2525, %v3527_v52  }
 0x1af   : > { %v720_v61 = vpop.xlane.xlu2 %719 }
 0x1b0   : > { %v3586_v8 = vmax.f32 %v3582_v57, %v720_v61 }
 0x1b2   : > { %4116 = vst [vmem:[#allocation23_spill] sm:$0xff] %v3586_v8  ;;  %963 = vperm.xlu2 %2523, %v3551_v1  }
 0x1b3   : > { %1479 = vst.msk [vmem:[#allocation2 + $0xa0] sm:$0xff] %vm1426_vm1, %v3586_v8 }
 0x1b5   : > { %v723_v36 = vpop.xlane.xlu0 %722 }
 0x1b6   : > { %v3598_v3 = vmax.f32 %v3593_v34, %v723_v36  ;;  %1048 = vperm.xlu0 %2525, %v3586_v8   ;;  %v3613_v36 = vld [vmem:[#allocation2 + $0xb0] sm:$0xff]  ;;  %v3634_v8 = vld [vmem:[#allocation2 + $0x38] sm:$0xff] }
 0x1b7   : > { %v675_v61 = vpop.xlane.xlu2 %674  ;;  %4119 = vst [vmem:[#allocation26_spill] sm:$0xff] %v3613_v36 }
 0x1b8   : > { %1480 = vst.msk [vmem:[#allocation2 + $0xa8] sm:$0xff] %vm1426_vm1, %v3598_v3  ;;  %v3606_v13 = vmax.f32 %v3595_v2, %v675_v61  ;;  %v751_v2 = vmax.f32 %v511_v18, %v624_v19  ;;  %v3652_v19 = vld [vmem:[#allocation2 + $0x40] sm:$0xff] }
 0x1b9   : > { %4122 = vst [vmem:[#allocation29_spill] sm:$0xff] %v3634_v8 }
 0x1ba   : > { %4118 = vst [vmem:[#allocation25_spill] sm:$0xff] %v3606_v13  ;;  %968 = vperm.xlu2 %2523, %v3568_v49  }
 0x1bb   : > { %1464 = vst.msk [vmem:[#allocation2 + $0x28] sm:$0xff] %vm1426_vm1, %v3606_v13 }
 0x1bc   : > { %4125 = vst [vmem:[#allocation32_spill] sm:$0xff] %v3652_v19 }
 0x1bd   : > { %v726_v39 = vpop.xlane.xlu1 %725  ;;  %v678_v54 = vpop.xlane.xlu0 %677 }
 0x1be   : > { %v3618_v44 = vmax.f32 %v3613_v36, %v726_v39  ;;  %v3621_v61 = vmax.f32 %v3615_v63, %v678_v54  ;;  %v3632_v39 = vld [vmem:[#allocation2 + $0xb8] sm:$0xff] }
 0x1bf   : > { %4121 = vst [vmem:[#allocation28_spill] sm:$0xff] %v3632_v39 }
 0x1c0   : > { %4120 = vst [vmem:[#allocation27_spill] sm:$0xff] %v3618_v44 }
 0x1c1   : > { %1481 = vst.msk [vmem:[#allocation2 + $0xb0] sm:$0xff] %vm1426_vm1, %v3618_v44 }
 0x1c2   : > { %1465 = vst.msk [vmem:[#allocation2 + $0x30] sm:$0xff] %vm1426_vm1, %v3621_v61  ;;  %1053 = vperm.xlu2 %2523, %v3598_v3  }
 0x1c5   : > { %v729_v54 = vpop.xlane.xlu2 %728  ;;  %752 = vmax.xlane.f32.xlu1 %v751_v2  ;;  %v681_v57 = vpop.xlane.xlu1 %680  ;;  %v3654_v2 = vld [vmem:[#allocation2 + $0xc0] sm:$0xff] }
 0x1c6   : > { %v3637_v15 = vmax.f32 %v3632_v39, %v729_v54  ;;  %v3640_v36 = vmax.f32 %v3634_v8, %v681_v57 }
 0x1c8   : > { %4123 = vst [vmem:[#allocation30_spill] sm:$0xff] %v3637_v15  ;;  %1063 = vperm.xlu0 %2525, %v3637_v15  }
 0x1c9   : > { %4124 = vst [vmem:[#allocation31_spill] sm:$0xff] %v3640_v36 }
 0x1ca   : > { %1482 = vst.msk [vmem:[#allocation2 + $0xb8] sm:$0xff] %vm1426_vm1, %v3637_v15  ;;  %978 = vperm.xlu2 %2523, %v3621_v61  }
 0x1cb   : > { %1466 = vst.msk [vmem:[#allocation2 + $0x38] sm:$0xff] %vm1426_vm1, %v3640_v36 }
 0x1cd   : > { %v684_v57 = vpop.xlane.xlu2 %683  ;;  %v732_v54 = vpop.xlane.xlu0 %731 }
 0x1ce   : > { %v3657_v26 = vmax.f32 %v3652_v19, %v684_v57  ;;  %v3660_v39 = vmax.f32 %v3654_v2, %v732_v54  ;;  %v3672_v57 = vld [vmem:[#allocation2 + $0xc8] sm:$0xff] }
 0x1cf   : > { %4127 = vst [vmem:[#allocation34_spill] sm:$0xff] %v3672_v57  ;;  %v3674_v54 = vld [vmem:[#allocation2 + $0x48] sm:$0xff] }
 0x1d0   : > { %4126 = vst [vmem:[#allocation33_spill] sm:$0xff] %v3657_v26  ;;  %988 = vperm.xlu0 %2525, %v3657_v26  }
 0x1d1   : > { %1467 = vst.msk [vmem:[#allocation2 + $0x40] sm:$0xff] %vm1426_vm1, %v3657_v26 }
 0x1d2   : > { %1483 = vst.msk [vmem:[#allocation2 + $0xc0] sm:$0xff] %vm1426_vm1, %v3660_v39  ;;  %1068 = vperm.xlu2 %2523, %v3660_v39  }
 0x1d5   : > { %v735_v8 = vpop.xlane.xlu1 %734  ;;  %v687_v49 = vpop.xlane.xlu0 %686 }
 0x1d6   : > { %v3677_v18 = vmax.f32 %v3672_v57, %v735_v8  ;;  %v3680_v19 = vmax.f32 %v3674_v54, %v687_v49  ;;  %v3693_v8 = vld [vmem:[#allocation2 + $0x50] sm:$0xff] }
 0x1d7   : > { %4130 = vst [vmem:[#allocation37_spill] sm:$0xff] %v3693_v8 }
 0x1d8   : > { %4128 = vst [vmem:[#allocation35_spill] sm:$0xff] %v3677_v18 }
 0x1d9   : > { %1484 = vst.msk [vmem:[#allocation2 + $0xc8] sm:$0xff] %vm1426_vm1, %v3677_v18 }
 0x1da   : > { %1468 = vst.msk [vmem:[#allocation2 + $0x48] sm:$0xff] %vm1426_vm1, %v3680_v19  ;;  %993 = vperm.xlu2 %2523, %v3680_v19  }
 0x1dd   : > { %v738_v49 = vpop.xlane.xlu2 %737  ;;  %v690_v51 = vpop.xlane.xlu1 %689 }
 0x1de   : > { %v3696_v29 = vmax.f32 %v3691_v21, %v738_v49  ;;  %v3699_v15 = vmax.f32 %v3693_v8, %v690_v51  ;;  %958 = vperm.xlu1 %2524, %v3534_v55   ;;  %v3711_v49 = vld [vmem:[#allocation2 + $0x58] sm:$0xff] }
 0x1df   : > { %4133 = vst [vmem:[#allocation40_spill] sm:$0xff] %v3711_v49  ;;  %v3713_v51 = vld [vmem:[#allocation2 + $0xd8] sm:$0xff] }
 0x1e0   : > { %4131 = vst [vmem:[#allocation38_spill] sm:$0xff] %v3696_v29  ;;  %1078 = vperm.xlu0 %2525, %v3696_v29  }
 0x1e1   : > { %4132 = vst [vmem:[#allocation39_spill] sm:$0xff] %v3699_v15 }
 0x1e2   : > { %1485 = vst.msk [vmem:[#allocation2 + $0xd0] sm:$0xff] %vm1426_vm1, %v3696_v29 }
 0x1e3   : > { %1469 = vst.msk [vmem:[#allocation2 + $0x50] sm:$0xff] %vm1426_vm1, %v3699_v15 }
 0x1e4   : > { %4134 = vst [vmem:[#allocation41_spill] sm:$0xff] %v3713_v51 }
 0x1e5   : > { %v693_v52 = vpop.xlane.xlu2 %692  ;;  %v741_v55 = vpop.xlane.xlu0 %740 }
 0x1e6   : > { %v3716_v48 = vmax.f32 %v3711_v49, %v693_v52  ;;  %v3719_v26 = vmax.f32 %v3713_v51, %v741_v55  ;;  %1043 = vperm.xlu1 %2524, %v3571_v53   ;;  %v3732_v52 = vld [vmem:[#allocation2 + $0xe0] sm:$0xff] }
 0x1e7   : > { %4137 = vst [vmem:[#allocation44_spill] sm:$0xff] %v3732_v52  ;;  %v3734_v55 = vld [vmem:[#allocation2 + $0x60] sm:$0xff] }
 0x1e8   : > { %4135 = vst [vmem:[#allocation42_spill] sm:$0xff] %v3716_v48  ;;  %1003 = vperm.xlu0 %2525, %v3716_v48   ;;  %1083 = vperm.xlu2 %2523, %v3719_v26  }
 0x1e9   : > { %4136 = vst [vmem:[#allocation43_spill] sm:$0xff] %v3719_v26 }
 0x1ea   : > { %1470 = vst.msk [vmem:[#allocation2 + $0x58] sm:$0xff] %vm1426_vm1, %v3716_v48 }
 0x1eb   : > { %1486 = vst.msk [vmem:[#allocation2 + $0xd8] sm:$0xff] %vm1426_vm1, %v3719_v26 }
 0x1ec   : > { %4138 = vst [vmem:[#allocation45_spill] sm:$0xff] %v3734_v55 }
 0x1ed   : > { %v744_v21 = vpop.xlane.xlu1 %743  ;;  %v696_v8 = vpop.xlane.xlu0 %695 }
 0x1ee   : > { %v3737_v57 = vmax.f32 %v3732_v52, %v744_v21  ;;  %v3740_v49 = vmax.f32 %v3734_v55, %v696_v8  ;;  %973 = vperm.xlu1 %2524, %v3606_v13   ;;  %v3752_v21 = vld [vmem:[#allocation2 + $0xe8] sm:$0xff] }
 0x1ef   : > { %4141 = vst [vmem:[#allocation48_spill] sm:$0xff] %v3752_v21  ;;  %v3754_v8 = vld [vmem:[#allocation2 + $0x68] sm:$0xff] }
 0x1f0   : > { %4139 = vst [vmem:[#allocation46_spill] sm:$0xff] %v3737_v57  ;;  %1008 = vperm.xlu2 %2523, %v3740_v49  }
 0x1f1   : > { %4140 = vst [vmem:[#allocation47_spill] sm:$0xff] %v3740_v49 }
 0x1f2   : > { %1487 = vst.msk [vmem:[#allocation2 + $0xe0] sm:$0xff] %vm1426_vm1, %v3737_v57 }
 0x1f3   : > { %1471 = vst.msk [vmem:[#allocation2 + $0x60] sm:$0xff] %vm1426_vm1, %v3740_v49 }
 0x1f4   : > { %4142 = vst [vmem:[#allocation49_spill] sm:$0xff] %v3754_v8 }
 0x1f5   : > { %v747_v26 = vpop.xlane.xlu2 %746  ;;  %v699_v13 = vpop.xlane.xlu1 %698 }
 0x1f6   : > { %v3757_v51 = vmax.f32 %v3752_v21, %v747_v26  ;;  %v3760_v29 = vmax.f32 %v3754_v8, %v699_v13  ;;  %1058 = vperm.xlu1 %2524, %v3618_v44   ;;  %v3772_v26 = vld [vmem:[#allocation2 + $0x70] sm:$0xff] }
 0x1f7   : > { %4145 = vst [vmem:[#allocation52_spill] sm:$0xff] %v3772_v26  ;;  %v3774_v13 = vld [vmem:[#allocation2 + $0xf0] sm:$0xff] }
 0x1f8   : > { %4143 = vst [vmem:[#allocation50_spill] sm:$0xff] %v3757_v51  ;;  %1093 = vperm.xlu0 %2525, %v3757_v51  }
 0x1f9   : > { %4144 = vst [vmem:[#allocation51_spill] sm:$0xff] %v3760_v29 }
 0x1fa   : > { %1488 = vst.msk [vmem:[#allocation2 + $0xe8] sm:$0xff] %vm1426_vm1, %v3757_v51 }
 0x1fb   : > { %1472 = vst.msk [vmem:[#allocation2 + $0x68] sm:$0xff] %vm1426_vm1, %v3760_v29 }
 0x1fc   : > { %4146 = vst [vmem:[#allocation53_spill] sm:$0xff] %v3774_v13 }
 0x1fd   : > { %v702_v49 = vpop.xlane.xlu2 %701  ;;  %v750_v44 = vpop.xlane.xlu0 %749 }
 0x1fe   : > { %v3777_v55 = vmax.f32 %v3772_v26, %v702_v49  ;;  %v3780_v48 = vmax.f32 %v3774_v13, %v750_v44  ;;  %983 = vperm.xlu1 %2524, %v3640_v36   ;;  %v3793_v44 = vld [vmem:[#allocation2 + $0x78] sm:$0xff] }
 0x1ff   : > { %4149 = vst [vmem:[#allocation56_spill] sm:$0xff] %v3793_v44 }
 0x200   : > { %4147 = vst [vmem:[#allocation54_spill] sm:$0xff] %v3777_v55  ;;  %1018 = vperm.xlu0 %2525, %v3777_v55   ;;  %1098 = vperm.xlu2 %2523, %v3780_v48  }
 0x201   : > { %4148 = vst [vmem:[#allocation55_spill] sm:$0xff] %v3780_v48 }
 0x202   : > { %1473 = vst.msk [vmem:[#allocation2 + $0x70] sm:$0xff] %vm1426_vm1, %v3777_v55 }
 0x203   : > { %1489 = vst.msk [vmem:[#allocation2 + $0xf0] sm:$0xff] %vm1426_vm1, %v3780_v48 }
 0x205   : > { %v949_v49 = vpop.permute.xlu2 %948  ;;  %v705_v21 = vpop.xlane.xlu0 %704 }
 0x206   : > { %v3796_v8 = vmax.f32 %v3793_v44, %v705_v21  ;;  %1073 = vperm.xlu1 %2524, %v3677_v18   ;;  %v1106_v26 = vsub.f32 %v3250_v5, %v949_v49  ;;  %v1107_v21 = vsub.f32 %v3253_v7, %v949_v49 }
 0x208   : > { %4150 = vst [vmem:[#allocation57_spill] sm:$0xff] %v3796_v8  ;;  %1023 = vperm.xlu2 %2523, %v3796_v8   ;;  %v1170_v18 = vmul.f32 1.442695, %v1106_v26  ;;  %v1172_v36 = vmul.f32 1.442695, %v1107_v21 }
 0x209   : > { %1474 = vst.msk [vmem:[#allocation2 + $0x78] sm:$0xff] %vm1426_vm1, %v3796_v8 }
 0x20a   : > { %2526 = vpow2.f32 %v1170_v18 }
 0x20b   : > { %2528 = vpow2.f32 %v1172_v36 }
 0x20d   : > { %v1039_v51 = vpop.permute.xlu2 %1038  ;;  %v1029_v48 = vpop.permute.xlu1 %1028 }
 0x20e   : > { %998 = vperm.xlu1 %2524, %v3699_v15   ;;  %v1138_v52 = vsub.f32 %v3264_v10, %v1029_v48  ;;  %v1139_v5 = vsub.f32 %v3267_v12, %v1029_v48  ;;  %v1142_v10 = vsub.f32 %v3296_v31, %v1039_v51  ;;  %v1143_v18 = vsub.f32 %v3299_v33, %v1039_v51 }
 0x210   : > { %v1236_v26 = vmul.f32 1.442695, %v1139_v5  ;;  %v2527_v8 = vpop.eup %2526 }
 0x211   : > { %v2529_v21 = vpop.eup %2528 }
 0x215   : > { %v964_v55 = vpop.permute.xlu2 %963 }
 0x216   : > { %1088 = vperm.xlu1 %2524, %v3737_v57   ;;  %v1234_v57 = vmul.f32 1.442695, %v1138_v52  ;;  %v1113_v31 = vsub.f32 %v3309_v37, %v964_v55 }
 0x218   : > { %v954_v13 = vpop.permute.xlu0 %953  ;;  %2530 = vpow2.f32 %v1234_v57  ;;  %v1112_v57 = vsub.f32 %v3304_v35, %v964_v55  ;;  %v1184_v51 = vmul.f32 1.442695, %v1113_v31  ;;  %v3821_v35 = vld [vmem:[#allocation2 + $0xf8] sm:$0xff] }
 0x219   : > { %v1108_v44 = vsub.f32 %v3272_v14, %v954_v13  ;;  %v1109_v15 = vsub.f32 %v3277_v16, %v954_v13  ;;  %v1298_v16 = vadd.f32 %v2529_v21, %v2527_v8  ;;  %v1242_v13 = vmul.f32 1.442695, %v1142_v10 }
 0x21a   : > { %v1182_v33 = vmul.f32 1.442695, %v1112_v57 }
 0x21b   : > { %v1174_v7 = vmul.f32 1.442695, %v1108_v44  ;;  %v1176_v49 = vmul.f32 1.442695, %v1109_v15 }
 0x21d   : > { %v3810_v53 = vpop.permute.xlu2 %968  ;;  %2532 = vpow2.f32 %v1174_v7 }
 0x21e   : > { %1013 = vperm.xlu1 %2524, %v3760_v29   ;;  %2534 = vpow2.f32 %v1176_v49  ;;  %v2531_v36 = vpop.eup %2530  ;;  %v1244_v29 = vmul.f32 1.442695, %v1143_v18 }
 0x21f   : > { %2536 = vpow2.f32 %v1236_v26 }
 0x220   : > { %2538 = vpow2.f32 %v1242_v13 }
 0x221   : > { %2540 = vpow2.f32 %v1244_v29 }
 0x222   : > { %2542 = vpow2.f32 %v1182_v33 }
 0x223   : > { %v2533_v12 = vpop.eup %2532  ;;  %2544 = vpow2.f32 %v1184_v51 }
 0x224   : > { %v2535_v48 = vpop.eup %2534 }
 0x225   : > { %v1054_v14 = vpop.permute.xlu2 %1053  ;;  %v2537_v15 = vpop.eup %2536  ;;  %v1301_v44 = vadd.f32 %v2535_v48, %v2533_v12 }
 0x226   : > { %v1346_v5 = vadd.f32 %v2537_v15, %v2531_v36  ;;  %v2539_v8 = vpop.eup %2538  ;;  %v1148_v49 = vsub.f32 %v3352_v60, %v1054_v14  ;;  %v1149_v21 = vsub.f32 %v3355_v62, %v1054_v14 }
 0x227   : > { %v2541_v7 = vpop.eup %2540 }
 0x228   : > { %v1352_v29 = vadd.f32 %v2541_v7, %v2539_v8  ;;  %v1254_v37 = vmul.f32 1.442695, %v1148_v49  ;;  %v1256_v18 = vmul.f32 1.442695, %v1149_v21  ;;  %v1034_v49 = vpop.permute.xlu0 %1033 }
 0x22a   : > { %1299 = vadd.xlane.f32.xlu0 %v1298_v16  ;;  %v2543_v16 = vpop.eup %2542  ;;  %2546 = vpow2.f32 %v1254_v37 }
 0x22b   : > { %v2545_v60 = vpop.eup %2544  ;;  %2548 = vpow2.f32 %v1256_v18 }
 0x22c   : > { %v1307_v12 = vadd.f32 %v2545_v60, %v2543_v16 }
 0x22d   : > { %v979_v52 = vpop.permute.xlu2 %978 }
 0x22e   : > { %v1118_v62 = vsub.f32 %v3360_v0, %v979_v52  ;;  %v1119_v14 = vsub.f32 %v3367_v6, %v979_v52 }
 0x230   : > { %v1194_v48 = vmul.f32 1.442695, %v1118_v62  ;;  %v1196_v15 = vmul.f32 1.442695, %v1119_v14  ;;  %v2547_v57 = vpop.eup %2546 }
 0x231   : > { %1302 = vadd.xlane.f32.xlu2 %v1301_v44  ;;  %v2549_v31 = vpop.eup %2548 }
 0x232   : > { %1347 = vadd.xlane.f32.xlu0 %v1346_v5  ;;  %2550 = vpow2.f32 %v1194_v48  ;;  %v1361_v33 = vadd.f32 %v2549_v31, %v2547_v57  ;;  %v1049_v57 = vpop.permute.xlu0 %1048 }
 0x233   : > { %2552 = vpow2.f32 %v1196_v15 }
 0x235   : > { %v1069_v26 = vpop.permute.xlu2 %1068 }
 0x236   : > { %v1154_v44 = vsub.f32 %v3392_v38, %v1069_v26  ;;  %v1155_v5 = vsub.f32 %v3395_v40, %v1069_v26  ;;  %v2719_v26 = vld [vmem:[%s3255_s28 + $0x228] sm:$0xff] }
 0x237   : > { %v1141_v18 = vsub.f32 %v2719_v26, %v1034_v49 }
 0x238   : > { %v753_v10 = vpop.xlane.xlu1 %752  ;;  %v1266_v0 = vmul.f32 1.442695, %v1154_v44  ;;  %v1268_v6 = vmul.f32 1.442695, %v1155_v5  ;;  %v2551_v52 = vpop.eup %2550  ;;  %v2720_v5 = vld [vmem:[%s3255_s28 + $0x40] sm:$0xff] }
 0x239   : > { %v3824_v55 = vmax.f32 %v3821_v35, %v753_v10  ;;  %1353 = vadd.xlane.f32.xlu2 %v1352_v29  ;;  %v2553_v8 = vpop.eup %2552  ;;  %v2718_v10 = vld [vmem:[%s3255_s28 + $0x220] sm:$0xff] }
 0x23a   : > { %2554 = vpow2.f32 %v1266_v0  ;;  %v1316_v38 = vadd.f32 %v2553_v8, %v2551_v52  ;;  %v1140_v37 = vsub.f32 %v2718_v10, %v1034_v49  ;;  %v1114_v8 = vsub.f32 %v3328_v45, %v3810_v53 }
 0x23b   : > { %v849_v13 = vsub.f32 %v3821_v35, %v3824_v55  ;;  %1490 = vst.msk [vmem:[#allocation2 + $0xf8] sm:$0xff] %vm1426_vm1, %v3824_v55  ;;  %1103 = vperm.xlu1 %2524, %v3824_v55   ;;  %2556 = vpow2.f32 %v1268_v6 }
 0x23c   : > { %v1238_v48 = vmul.f32 1.442695, %v1140_v37  ;;  %v1186_v45 = vmul.f32 1.442695, %v1114_v8 }
 0x23d   : > { %v994_v36 = vpop.permute.xlu2 %993 }
 0x23e   : > { %v1124_v7 = vsub.f32 %v3400_v46, %v994_v36  ;;  %v1125_v21 = vsub.f32 %v3407_v50, %v994_v36  ;;  %v1240_v50 = vmul.f32 1.442695, %v1141_v18 }
 0x240   : > { %v1206_v40 = vmul.f32 1.442695, %v1124_v7  ;;  %v1208_v16 = vmul.f32 1.442695, %v1125_v21  ;;  %v2555_v62 = vpop.eup %2554 }
 0x241   : > { %1308 = vadd.xlane.f32.xlu2 %v1307_v12  ;;  %v2557_v12 = vpop.eup %2556 }
 0x242   : > { %2558 = vpow2.f32 %v1206_v40  ;;  %v1370_v15 = vadd.f32 %v2557_v12, %v2555_v62 }
 0x243   : > { %2560 = vpow2.f32 %v1208_v16  ;;  %v3853_v16 = vpop.permute.xlu0 %1063 }
 0x244   : > { %2562 = vpow2.f32 %v1238_v48 }
 0x245   : > { %v1084_v51 = vpop.permute.xlu2 %1083  ;;  %2564 = vpow2.f32 %v1240_v50 }
 0x246   : > { %v1160_v14 = vsub.f32 %v3432_v20, %v1084_v51  ;;  %v1161_v46 = vsub.f32 %v3435_v22, %v1084_v51  ;;  %v2721_v22 = vld [vmem:[%s3255_s28 + $0x48] sm:$0xff] }
 0x248   : > { %v1278_v36 = vmul.f32 1.442695, %v1160_v14  ;;  %v1280_v31 = vmul.f32 1.442695, %v1161_v46  ;;  %v2559_v52 = vpop.eup %2558  ;;  %v2723_v46 = vld [vmem:[%s3255_s28 + $0x288] sm:$0xff] }
 0x249   : > { %1362 = vadd.xlane.f32.xlu2 %v1361_v33  ;;  %v2561_v21 = vpop.eup %2560 }
 0x24a   : > { %2566 = vpow2.f32 %v1278_v36  ;;  %v2563_v37 = vpop.eup %2562  ;;  %v1325_v40 = vadd.f32 %v2561_v21, %v2559_v52 }
 0x24b   : > { %2568 = vpow2.f32 %v1280_v31  ;;  %v2565_v26 = vpop.eup %2564 }
 0x24d   : > { %v1009_v60 = vpop.permute.xlu2 %1008 }
 0x250   : > { %v959_v29 = vpop.permute.xlu1 %958 }
 0x251   : > { %1317 = vadd.xlane.f32.xlu2 %v1316_v38  ;;  %v1110_v33 = vsub.f32 %v2720_v5, %v959_v29  ;;  %v1111_v51 = vsub.f32 %v2721_v22, %v959_v29  ;;  %v1115_v38 = vsub.f32 %v3333_v47, %v3810_v53  ;;  %v1131_v29 = vsub.f32 %v3447_v28, %v1009_v60  ;;  %v2567_v47 = vpop.eup %2566  ;;  %v2722_v53 = vld [vmem:[%s3255_s28 + $0x280] sm:$0xff] }
 0x252   : > { %v1146_v14 = vsub.f32 %v2722_v53, %v1049_v57  ;;  %v1147_v28 = vsub.f32 %v2723_v46, %v1049_v57 }
 0x253   : > { %v1180_v10 = vmul.f32 1.442695, %v1111_v51  ;;  %v1188_v18 = vmul.f32 1.442695, %v1115_v38  ;;  %v2726_v38 = vld [vmem:[%s3255_s28 + $0x2c8] sm:$0xff] }
 0x254   : > { %v1250_v5 = vmul.f32 1.442695, %v1146_v14  ;;  %v1252_v57 = vmul.f32 1.442695, %v1147_v28 }
 0x258   : > { %v1044_v44 = vpop.permute.xlu1 %1043 }
 0x259   : > { %v1144_v0 = vsub.f32 %v3320_v41, %v1044_v44  ;;  %v1145_v20 = vsub.f32 %v3323_v43, %v1044_v44  ;;  %1371 = vadd.xlane.f32.xlu2 %v1370_v15  ;;  %v1130_v41 = vsub.f32 %v3440_v25, %v1009_v60  ;;  %v1178_v43 = vmul.f32 1.442695, %v1110_v33  ;;  %v2569_v25 = vpop.eup %2568 }
 0x25a   : > { %v3845_v6 = vpop.permute.xlu2 %1098  ;;  %v1220_v60 = vmul.f32 1.442695, %v1131_v29  ;;  %v1349_v15 = vadd.f32 %v2565_v26, %v2563_v37  ;;  %v1379_v22 = vadd.f32 %v2569_v25, %v2567_v47  ;;  %v3862_v29 = vpop.permute.xlu0 %988  ;;  %v2727_v37 = vld [vmem:[%s3255_s28 + $0xa8] sm:$0xff] }
 0x25b   : > { %v1246_v7 = vmul.f32 1.442695, %v1144_v0  ;;  %v1248_v49 = vmul.f32 1.442695, %v1145_v20  ;;  %v1218_v12 = vmul.f32 1.442695, %v1130_v41  ;;  %v1167_v14 = vsub.f32 %v3477_v11, %v3845_v6 }
 0x25c   : > { %v2728_v11 = vld [vmem:[%s3255_s28 + $0x2e0] sm:$0xff] }
 0x25d   : > { %2570 = vpow2.f32 %v1246_v7 }
 0x25e   : > { %2572 = vpow2.f32 %v1248_v49  ;;  %v2725_v49 = vld [vmem:[%s3255_s28 + $0x2c0] sm:$0xff] }
 0x25f   : > { %2574 = vpow2.f32 %v1178_v43 }
 0x260   : > { %v974_v62 = vpop.permute.xlu1 %973  ;;  %2576 = vpow2.f32 %v1180_v10  ;;  %v1166_v10 = vsub.f32 %v3472_v4, %v3845_v6  ;;  %v1152_v6 = vsub.f32 %v2728_v11, %v3853_v16 }
 0x261   : > { %1326 = vadd.xlane.f32.xlu2 %v1325_v40  ;;  %2578 = vpow2.f32 %v1186_v45  ;;  %v1117_v45 = vsub.f32 %v2727_v37, %v974_v62 }
 0x262   : > { %v1024_v48 = vpop.permute.xlu2 %1023  ;;  %2580 = vpow2.f32 %v1188_v18  ;;  %v1290_v46 = vmul.f32 1.442695, %v1166_v10  ;;  %v2732_v10 = vld [vmem:[%s3255_s28 + $0x100] sm:$0xff] }
 0x263   : > { %v2571_v50 = vpop.eup %2570  ;;  %v1136_v36 = vsub.f32 %v3482_v17, %v1024_v48  ;;  %v1137_v44 = vsub.f32 %v3489_v23, %v1024_v48  ;;  %2582 = vpow2.f32 %v1218_v12  ;;  %v2724_v23 = vld [vmem:[%s3255_s28 + $0xa0] sm:$0xff]  ;;  %v1192_v4 = vmul.f32 1.442695, %v1117_v45 }
 0x264   : > { %v2573_v31 = vpop.eup %2572  ;;  %2584 = vpow2.f32 %v1220_v60  ;;  %v1116_v7 = vsub.f32 %v2724_v23, %v974_v62  ;;  %v1292_v48 = vmul.f32 1.442695, %v1167_v14  ;;  %v1262_v23 = vmul.f32 1.442695, %v1152_v6  ;;  %v2733_v45 = vld [vmem:[%s3255_s28 + $0x320] sm:$0xff] }
 0x265   : > { %1350 = vadd.xlane.f32.xlu1 %v1349_v15  ;;  %v1355_v33 = vadd.f32 %v2573_v31, %v2571_v50  ;;  %v2575_v0 = vpop.eup %2574  ;;  %v1230_v20 = vmul.f32 1.442695, %v1136_v36  ;;  %v1232_v17 = vmul.f32 1.442695, %v1137_v44  ;;  %2586 = vpow2.f32 %v1250_v5  ;;  %v2729_v15 = vld [vmem:[%s3255_s28 + $0xe0] sm:$0xff]  ;;  %v2730_v44 = vld [vmem:[%s3255_s28 + $0xe8] sm:$0xff] }
 0x266   : > { %v2577_v51 = vpop.eup %2576  ;;  %2588 = vpow2.f32 %v1252_v57  ;;  %v1190_v12 = vmul.f32 1.442695, %v1116_v7  ;;  %v2731_v57 = vld [vmem:[%s3255_s28 + $0x2e8] sm:$0xff]  ;;  %v1122_v37 = vsub.f32 %v2732_v10, %v3862_v29 }
 0x267   : > { %1356 = vadd.xlane.f32.xlu0 %v1355_v33  ;;  %v2579_v8 = vpop.eup %2578  ;;  %2590 = vpow2.f32 %v1230_v20  ;;  %v1304_v47 = vadd.f32 %v2577_v51, %v2575_v0  ;;  %v1153_v0 = vsub.f32 %v2731_v57, %v3853_v16  ;;  %v3875_v20 = vpop.permute.xlu0 %1078 }
 0x268   : > { %v1059_v52 = vpop.permute.xlu1 %1058  ;;  %v2581_v43 = vpop.eup %2580  ;;  %2592 = vpow2.f32 %v1232_v17 }
 0x269   : > { %v1150_v21 = vsub.f32 %v2725_v49, %v1059_v52  ;;  %v1151_v41 = vsub.f32 %v2726_v38, %v1059_v52  ;;  %1380 = vadd.xlane.f32.xlu2 %v1379_v22  ;;  %v2583_v40 = vpop.eup %2582  ;;  %v1310_v25 = vadd.f32 %v2581_v43, %v2579_v8  ;;  %v1264_v49 = vmul.f32 1.442695, %v1153_v0  ;;  %v2739_v0 = vld [vmem:[%s3255_s28 + $0x348] sm:$0xff] }
 0x26a   : > { %v2585_v53 = vpop.eup %2584 }
 0x26b   : > { %v1258_v26 = vmul.f32 1.442695, %v1150_v21  ;;  %v1260_v18 = vmul.f32 1.442695, %v1151_v41  ;;  %v2587_v62 = vpop.eup %2586  ;;  %v1334_v28 = vadd.f32 %v2585_v53, %v2583_v40  ;;  %v2735_v53 = vld [vmem:[%s3255_s28 + $0x108] sm:$0xff] }
 0x26c   : > { %v2589_v60 = vpop.eup %2588  ;;  %v1123_v14 = vsub.f32 %v2735_v53, %v3862_v29 }
 0x26d   : > { %2594 = vpow2.f32 %v1258_v26  ;;  %1305 = vadd.xlane.f32.xlu1 %v1304_v47  ;;  %v2591_v36 = vpop.eup %2590  ;;  %v1358_v52 = vadd.f32 %v2589_v60, %v2587_v62  ;;  %v2734_v26 = vld [vmem:[%s3255_s28 + $0x328] sm:$0xff]  ;;  %v1202_v60 = vmul.f32 1.442695, %v1122_v37  ;;  %v2741_v37 = vld [vmem:[%s3255_s28 + $0x380] sm:$0xff] }
 0x26e   : > { %2596 = vpow2.f32 %v1260_v18  ;;  %v2593_v33 = vpop.eup %2592 }
 0x26f   : > { %1311 = vadd.xlane.f32.xlu0 %v1310_v25  ;;  %2598 = vpow2.f32 %v1190_v12  ;;  %v1343_v21 = vadd.f32 %v2593_v33, %v2591_v36  ;;  %v2738_v33 = vld [vmem:[%s3255_s28 + $0x148] sm:$0xff] }
 0x270   : > { %v984_v50 = vpop.permute.xlu1 %983  ;;  %2600 = vpow2.f32 %v1192_v4 }
 0x271   : > { %v1120_v31 = vsub.f32 %v2729_v15, %v984_v50  ;;  %v1121_v5 = vsub.f32 %v2730_v44, %v984_v50  ;;  %1335 = vadd.xlane.f32.xlu2 %v1334_v28  ;;  %2602 = vpow2.f32 %v1290_v46  ;;  %v1004_v28 = vpop.permute.xlu0 %1003  ;;  %v1204_v50 = vmul.f32 1.442695, %v1123_v14  ;;  %v2736_v15 = vld [vmem:[%s3255_s28 + $0x340] sm:$0xff] }
 0x272   : > { %2604 = vpow2.f32 %v1292_v48  ;;  %v2737_v44 = vld [vmem:[%s3255_s28 + $0x140] sm:$0xff] }
 0x273   : > { %v2595_v22 = vpop.eup %2594  ;;  %v1198_v51 = vmul.f32 1.442695, %v1120_v31  ;;  %v1200_v17 = vmul.f32 1.442695, %v1121_v5  ;;  %v1158_v31 = vsub.f32 %v2736_v15, %v3875_v20 }
 0x274   : > { %v2597_v8 = vpop.eup %2596 }
 0x275   : > { %2606 = vpow2.f32 %v1198_v51  ;;  %1359 = vadd.xlane.f32.xlu1 %v1358_v52  ;;  %v1364_v7 = vadd.f32 %v2597_v8, %v2595_v22  ;;  %v2599_v16 = vpop.eup %2598  ;;  %v1159_v22 = vsub.f32 %v2739_v0, %v3875_v20 }
 0x276   : > { %2608 = vpow2.f32 %v1200_v17  ;;  %v2601_v38 = vpop.eup %2600 }
 0x277   : > { %1365 = vadd.xlane.f32.xlu0 %v1364_v7  ;;  %v2603_v43 = vpop.eup %2602  ;;  %2610 = vpow2.f32 %v1262_v23  ;;  %v1313_v62 = vadd.f32 %v2601_v38, %v2599_v16 }
 0x278   : > { %v1074_v41 = vpop.permute.xlu1 %1073  ;;  %v2605_v47 = vpop.eup %2604  ;;  %2612 = vpow2.f32 %v1264_v49  ;;  %v1274_v49 = vmul.f32 1.442695, %v1158_v31  ;;  %v2745_v31 = vld [vmem:[%s3255_s28 + $0x1a0] sm:$0xff] }
 0x279   : > { %v1156_v40 = vsub.f32 %v2733_v45, %v1074_v41  ;;  %v1157_v18 = vsub.f32 %v2734_v26, %v1074_v41  ;;  %1344 = vadd.xlane.f32.xlu2 %v1343_v21  ;;  %v1388_v11 = vadd.f32 %v2605_v47, %v2603_v43  ;;  %v3889_v7 = vpop.permute.xlu0 %1093  ;;  %v1276_v21 = vmul.f32 1.442695, %v1159_v22  ;;  %v2740_v43 = vld [vmem:[%s3255_s28 + $0x160] sm:$0xff] }
 0x27a   : > { %v1128_v10 = vsub.f32 %v2740_v43, %v1004_v28 }
 0x27b   : > { %v2607_v12 = vpop.eup %2606  ;;  %v1270_v25 = vmul.f32 1.442695, %v1156_v40  ;;  %v1272_v4 = vmul.f32 1.442695, %v1157_v18  ;;  %v2742_v40 = vld [vmem:[%s3255_s28 + $0x388] sm:$0xff] }
 0x27c   : > { %v2609_v46 = vpop.eup %2608  ;;  %v2743_v18 = vld [vmem:[%s3255_s28 + $0x168] sm:$0xff] }
 0x27d   : > { %2614 = vpow2.f32 %v1270_v25  ;;  %1314 = vadd.xlane.f32.xlu1 %v1313_v62  ;;  %v1319_v48 = vadd.f32 %v2609_v46, %v2607_v12  ;;  %v2611_v36 = vpop.eup %2610  ;;  %v1129_v47 = vsub.f32 %v2743_v18, %v1004_v28  ;;  %v1214_v62 = vmul.f32 1.442695, %v1128_v10  ;;  %v2748_v10 = vld [vmem:[%s3255_s28 + $0x3a0] sm:$0xff] }
 0x27e   : > { %2616 = vpow2.f32 %v1272_v4  ;;  %v2613_v29 = vpop.eup %2612  ;;  %v4151_v28 = vsub.f32 %v3474_v9, %v3492_v24 }
 0x27f   : > { %1320 = vadd.xlane.f32.xlu0 %v1319_v48  ;;  %2618 = vpow2.f32 %v1202_v60  ;;  %v1367_v8 = vadd.f32 %v2613_v29, %v2611_v36  ;;  %v1216_v60 = vmul.f32 1.442695, %v1129_v47 }
 0x280   : > { %v999_v6 = vpop.permute.xlu1 %998  ;;  %2620 = vpow2.f32 %v1204_v50  ;;  %v850_v36 = vmul.f32 1.442695, %v4151_v28 }
 0x281   : > { %v1126_v5 = vsub.f32 %v2737_v44, %v999_v6  ;;  %v1127_v57 = vsub.f32 %v2738_v33, %v999_v6  ;;  %1389 = vadd.xlane.f32.xlu2 %v1388_v11  ;;  %v1019_v48 = vpop.permute.xlu0 %1018  ;;  %v2744_v6 = vld [vmem:[%s3255_s28 + $0x1c0] sm:$0xff] }
 0x282   : > { %v1134_v15 = vsub.f32 %v2744_v6, %v1019_v48 }
 0x283   : > { %v2615_v51 = vpop.eup %2614  ;;  %v1210_v17 = vmul.f32 1.442695, %v1126_v5  ;;  %v1212_v52 = vmul.f32 1.442695, %v1127_v57  ;;  %v2746_v5 = vld [vmem:[%s3255_s28 + $0x1a8] sm:$0xff] }
 0x284   : > { %v2617_v23 = vpop.eup %2616  ;;  %v2747_v57 = vld [vmem:[%s3255_s28 + $0x1c8] sm:$0xff] }
 0x285   : > { %2622 = vpow2.f32 %v1210_v17  ;;  %1368 = vadd.xlane.f32.xlu1 %v1367_v8  ;;  %v1373_v16 = vadd.f32 %v2617_v23, %v2615_v51  ;;  %v2619_v38 = vpop.eup %2618  ;;  %v1135_v0 = vsub.f32 %v2747_v57, %v1019_v48  ;;  %v1226_v23 = vmul.f32 1.442695, %v1134_v15  ;;  %v804_v57 = vld [vmem:[#allocation3 + $0x90] sm:$0xff] }
 0x286   : > { %2624 = vpow2.f32 %v1212_v52  ;;  %v2621_v20 = vpop.eup %2620  ;;  %v4152_v52 = vsub.f32 %v3504_v30, %v3516_v42  ;;  %v1164_v30 = vsub.f32 %v2748_v10, %v3889_v7  ;;  %v786_v42 = vld [vmem:[#allocation3] sm:$0xff]  ;;  %v4155_v15 = vsub.f32 %v3541_v58, %v3551_v1 }
 0x287   : > { %1374 = vadd.xlane.f32.xlu0 %v1373_v16  ;;  %2626 = vpow2.f32 %v1274_v49  ;;  %v1322_v25 = vadd.f32 %v2621_v20, %v2619_v38  ;;  %v1228_v16 = vmul.f32 1.442695, %v1135_v0  ;;  %v4153_v38 = vsub.f32 %v3500_v27, %v3507_v32 }
 0x288   : > { %v1089_v41 = vpop.permute.xlu1 %1088  ;;  %2628 = vpow2.f32 %v1276_v21  ;;  %v852_v8 = vmul.f32 1.442695, %v4152_v52  ;;  %v4154_v27 = vsub.f32 %v3539_v56, %v3544_v59 }
 0x289   : > { %v1162_v45 = vsub.f32 %v2741_v37, %v1089_v41  ;;  %v1163_v26 = vsub.f32 %v2742_v40, %v1089_v41  ;;  %v882_v20 = vmul.f32 1.442695, %v4153_v38  ;;  %v2749_v37 = vld [vmem:[%s3255_s28 + $0x3a8] sm:$0xff]  ;;  %v789_v38 = vld [vmem:[#allocation3 + $0x18] sm:$0xff] }
 0x28a   : > { %v886_v32 = vmul.f32 1.442695, %v4154_v27  ;;  %v4158_v27 = vsub.f32 %v3654_v2, %v3660_v39 }
 0x28b   : > { %v2623_v53 = vpop.eup %2622  ;;  %v1282_v14 = vmul.f32 1.442695, %v1162_v45  ;;  %v1284_v12 = vmul.f32 1.442695, %v1163_v26  ;;  %v1165_v45 = vsub.f32 %v2749_v37, %v3889_v7 }
 0x28c   : > { %v2625_v4 = vpop.eup %2624 }
 0x28d   : > { %2630 = vpow2.f32 %v1282_v14  ;;  %1323 = vadd.xlane.f32.xlu1 %v1322_v25  ;;  %v1328_v46 = vadd.f32 %v2625_v4, %v2623_v53  ;;  %v2627_v50 = vpop.eup %2626  ;;  %v1286_v53 = vmul.f32 1.442695, %v1164_v30  ;;  %v1288_v4 = vmul.f32 1.442695, %v1165_v45 }
 0x28e   : > { %2632 = vpow2.f32 %v1284_v12  ;;  %v2629_v11 = vpop.eup %2628 }
 0x28f   : > { %1329 = vadd.xlane.f32.xlu0 %v1328_v46  ;;  %2634 = vpow2.f32 %v1214_v62  ;;  %v1376_v9 = vadd.f32 %v2629_v11, %v2627_v50  ;;  %v802_v50 = vld [vmem:[#allocation3 + $0x80] sm:$0xff] }
 0x290   : > { %v1014_v29 = vpop.permute.xlu1 %1013  ;;  %2636 = vpow2.f32 %v1216_v60  ;;  %v787_v60 = vld [vmem:[#allocation3 + $0x8] sm:$0xff] }
 0x291   : > { %v1132_v44 = vsub.f32 %v2745_v31, %v1014_v29  ;;  %v1133_v33 = vsub.f32 %v2746_v5, %v1014_v29  ;;  %2638 = vpow2.f32 %v850_v36  ;;  %v856_v31 = vmul.f32 1.442695, %v4155_v15 }
 0x293   : > { %v2631_v22 = vpop.eup %2630  ;;  %v1222_v51 = vmul.f32 1.442695, %v1132_v44  ;;  %v1224_v17 = vmul.f32 1.442695, %v1133_v33 }
 0x294   : > { %v2633_v24 = vpop.eup %2632 }
 0x295   : > { %2640 = vpow2.f32 %v1222_v51  ;;  %1377 = vadd.xlane.f32.xlu1 %v1376_v9  ;;  %v1382_v49 = vadd.f32 %v2633_v24, %v2631_v22  ;;  %v2635_v21 = vpop.eup %2634  ;;  %v2750_v24 = vld [vmem:[%s3255_s28 + $0x3e0] sm:$0xff] }
 0x296   : > { %2642 = vpow2.f32 %v1224_v17  ;;  %v2637_v41 = vpop.eup %2636  ;;  %v4156_v17 = vsub.f32 %v3593_v34, %v3598_v3  ;;  %v4157_v34 = vsub.f32 %v3615_v63, %v3621_v61  ;;  %v792_v61 = vld [vmem:[#allocation3 + $0x30] sm:$0xff] }
 0x297   : > { %1383 = vadd.xlane.f32.xlu0 %v1382_v49  ;;  %2644 = vpow2.f32 %v852_v8  ;;  %v2639_v43 = vpop.eup %2638  ;;  %v1331_v26 = vadd.f32 %v2637_v41, %v2635_v21  ;;  %v2751_v8 = vld [vmem:[%s3255_s28 + $0x3e8] sm:$0xff] }
 0x298   : > { %2646 = vpow2.f32 %v1226_v23  ;;  %v914_v47 = vmul.f32 %v2639_v43, %v786_v42  ;;  %v892_v9 = vmul.f32 1.442695, %v4156_v17  ;;  %v862_v43 = vmul.f32 1.442695, %v4157_v34  ;;  %v807_v42 = vld [vmem:[#allocation3 + $0xa8] sm:$0xff] }
 0x299   : > { %2648 = vpow2.f32 %v1228_v16 }
 0x29a   : > { %2650 = vpow2.f32 %v882_v20 }
 0x29b   : > { %v2641_v40 = vpop.eup %2640  ;;  %2652 = vpow2.f32 %v886_v32  ;;  %v898_v32 = vmul.f32 1.442695, %v4158_v27  ;;  %v4180_v27 = vld [vmem:[#allocation26_spill] sm:$0xff] }
 0x29c   : > { %v2643_v18 = vpop.eup %2642  ;;  %2654 = vpow2.f32 %v1286_v53 }
 0x29d   : > { %1332 = vadd.xlane.f32.xlu1 %v1331_v26  ;;  %v1300_v14 = vpop.xlane.xlu0 %1299  ;;  %v1337_v12 = vadd.f32 %v2643_v18, %v2641_v40  ;;  %v2645_v25 = vpop.eup %2644  ;;  %2656 = vpow2.f32 %v1288_v4 }
 0x29e   : > { %v1394_v62 = vadd.f32 %v1300_v14, %v914_v47  ;;  %v2647_v46 = vpop.eup %2646  ;;  %v915_v56 = vmul.f32 %v2645_v25, %v787_v60  ;;  %2658 = vpow2.f32 %v856_v31 }
 0x29f   : > { %1338 = vadd.xlane.f32.xlu0 %v1337_v12  ;;  %v2649_v7 = vpop.eup %2648  ;;  %2660 = vpow2.f32 %v892_v9  ;;  %v4159_v12 = vsub.f32 %v3674_v54, %v3680_v19  ;;  %v4167_v19 = vld [vmem:[#allocation15_spill] sm:$0xff] }
 0x2a0   : > { %1427 = vst.msk [vmem:[#allocation3] sm:$0xff] %vm1426_vm1, %v1394_v62  ;;  %v2651_v48 = vpop.eup %2650  ;;  %v1340_v59 = vadd.f32 %v2649_v7, %v2647_v46  ;;  %v810_v62 = vld [vmem:[#allocation3 + $0xc0] sm:$0xff]  ;;  %v4161_v7 = vld [vmem:[#allocation16_spill] sm:$0xff] }
 0x2a1   : > { %v930_v36 = vmul.f32 %v2651_v48, %v802_v50  ;;  %v2653_v6 = vpop.eup %2652  ;;  %v868_v25 = vmul.f32 1.442695, %v4159_v12  ;;  %v4160_v46 = vld [vmem:[#allocation14_spill] sm:$0xff]  ;;  %v4163_v48 = vld [vmem:[#allocation19_spill] sm:$0xff]  ;;  %v4164_v50 = vld [vmem:[#allocation21_spill] sm:$0xff] }
 0x2a2   : > { %v2655_v5 = vpop.eup %2654  ;;  %v932_v0 = vmul.f32 %v2653_v6, %v804_v57  ;;  %v4162_v39 = vsub.f32 %v4160_v46, %v4161_v7  ;;  %v4169_v6 = vld [vmem:[#allocation43_spill] sm:$0xff]  ;;  %v790_v7 = vld [vmem:[#allocation3 + $0x20] sm:$0xff] }
 0x2a3   : > { %v2657_v33 = vpop.eup %2656 }
 0x2a4   : > { %v1303_v28 = vpop.xlane.xlu2 %1302  ;;  %v1385_v22 = vadd.f32 %v2657_v33, %v2655_v5  ;;  %v2659_v49 = vpop.eup %2658  ;;  %v884_v2 = vmul.f32 1.442695, %v4162_v39  ;;  %v795_v5 = vld [vmem:[#allocation3 + $0x48] sm:$0xff] }
 0x2a5   : > { %v1395_v11 = vadd.f32 %v1303_v28, %v915_v56  ;;  %1341 = vadd.xlane.f32.xlu1 %v1340_v59  ;;  %v1348_v29 = vpop.xlane.xlu0 %1347  ;;  %v917_v20 = vmul.f32 %v2659_v49, %v789_v38  ;;  %v2661_v10 = vpop.eup %2660  ;;  %v4165_v56 = vsub.f32 %v4163_v48, %v4164_v50  ;;  %v798_v48 = vld [vmem:[#allocation3 + $0x60] sm:$0xff] }
 0x2a6   : > { %v1410_v44 = vadd.f32 %v1348_v29, %v930_v36  ;;  %v935_v40 = vmul.f32 %v2661_v10, %v807_v42  ;;  %v4168_v29 = vld [vmem:[#allocation41_spill] sm:$0xff]  ;;  %v4177_v10 = vld [vmem:[#allocation22_spill] sm:$0xff] }
 0x2a7   : > { %1428 = vst.msk [vmem:[#allocation3 + $0x8] sm:$0xff] %vm1426_vm1, %v1395_v11  ;;  %v888_v59 = vmul.f32 1.442695, %v4165_v56  ;;  %v4166_v11 = vld [vmem:[#allocation17_spill] sm:$0xff]  ;;  %v4170_v15 = vsub.f32 %v4168_v29, %v4169_v6 }
 0x2a8   : > { %1443 = vst.msk [vmem:[#allocation3 + $0x80] sm:$0xff] %vm1426_vm1, %v1410_v44  ;;  %v820_v54 = vsub.f32 %v4167_v19, %v4166_v11 }
 0x2a9   : > { %v904_v31 = vmul.f32 1.442695, %v4170_v15  ;;  %v4189_v15 = vld [vmem:[#allocation29_spill] sm:$0xff] }
 0x2aa   : > { %v854_v33 = vmul.f32 1.442695, %v820_v54 }
 0x2ac   : > { %v1354_v51 = vpop.xlane.xlu2 %1353 }
 0x2ad   : > { %v1412_v58 = vadd.f32 %v1354_v51, %v932_v0  ;;  %v1104_v1 = vpop.permute.xlu1 %1103  ;;  %1386 = vadd.xlane.f32.xlu1 %v1385_v22  ;;  %v4171_v22 = vld [vmem:[#allocation18_spill] sm:$0xff]  ;;  %v4172_v51 = vld [vmem:[#allocation20_spill] sm:$0xff] }
 0x2ae   : > { %v1168_v52 = vsub.f32 %v2750_v24, %v1104_v1  ;;  %v1169_v23 = vsub.f32 %v2751_v8, %v1104_v1  ;;  %v4173_v17 = vsub.f32 %v4171_v22, %v4172_v51  ;;  %v803_v1 = vld [vmem:[#allocation3 + $0x88] sm:$0xff]  ;;  %v4174_v8 = vld [vmem:[#allocation45_spill] sm:$0xff] }
 0x2af   : > { %1445 = vst.msk [vmem:[#allocation3 + $0x90] sm:$0xff] %vm1426_vm1, %v1412_v58  ;;  %v4192_v51 = vld [vmem:[#allocation53_spill] sm:$0xff] }
 0x2b0   : > { %v1294_v16 = vmul.f32 1.442695, %v1168_v52  ;;  %v1296_v21 = vmul.f32 1.442695, %v1169_v23  ;;  %v858_v9 = vmul.f32 1.442695, %v4173_v17 }
 0x2b1   : > { %v4175_v23 = vld [vmem:[#allocation47_spill] sm:$0xff] }
 0x2b2   : > { %2662 = vpow2.f32 %v1294_v16  ;;  %v4176_v49 = vsub.f32 %v4174_v8, %v4175_v23  ;;  %v4193_v17 = vld [vmem:[#allocation55_spill] sm:$0xff]  ;;  %v801_v23 = vld [vmem:[#allocation3 + $0x78] sm:$0xff] }
 0x2b3   : > { %2664 = vpow2.f32 %v1296_v21  ;;  %v805_v21 = vld [vmem:[#allocation3 + $0x98] sm:$0xff] }
 0x2b4   : > { %v1309_v41 = vpop.xlane.xlu2 %1308  ;;  %2666 = vpow2.f32 %v862_v43  ;;  %v874_v16 = vmul.f32 1.442695, %v4176_v49 }
 0x2b5   : > { %v1397_v3 = vadd.f32 %v1309_v41, %v917_v20  ;;  %2668 = vpow2.f32 %v898_v32  ;;  %v4181_v32 = vld [vmem:[#allocation27_spill] sm:$0xff] }
 0x2b6   : > { %2670 = vpow2.f32 %v868_v25  ;;  %v4183_v25 = vld [vmem:[#allocation56_spill] sm:$0xff] }
 0x2b7   : > { %1430 = vst.msk [vmem:[#allocation3 + $0x18] sm:$0xff] %vm1426_vm1, %v1397_v3  ;;  %2672 = vpow2.f32 %v884_v2  ;;  %v813_v3 = vld [vmem:[#allocation3 + $0xd8] sm:$0xff] }
 0x2b8   : > { %v2663_v30 = vpop.eup %2662  ;;  %2674 = vpow2.f32 %v888_v59  ;;  %v4186_v59 = vld [vmem:[#allocation24_spill] sm:$0xff] }
 0x2b9   : > { %v2665_v37 = vpop.eup %2664  ;;  %2676 = vpow2.f32 %v904_v31  ;;  %v4190_v31 = vld [vmem:[#allocation31_spill] sm:$0xff] }
 0x2ba   : > { %v1391_v45 = vadd.f32 %v2665_v37, %v2663_v30  ;;  %v2667_v63 = vpop.eup %2666  ;;  %2678 = vpow2.f32 %v854_v33  ;;  %v4178_v30 = vld [vmem:[#allocation23_spill] sm:$0xff] }
 0x2bb   : > { %v920_v47 = vmul.f32 %v2667_v63, %v792_v61  ;;  %v2669_v4 = vpop.eup %2668  ;;  %2680 = vpow2.f32 %v858_v9  ;;  %v4179_v42 = vsub.f32 %v4177_v10, %v4178_v30  ;;  %v4182_v63 = vsub.f32 %v4180_v27, %v4181_v32  ;;  %v4198_v30 = vld [vmem:[#allocation34_spill] sm:$0xff]  ;;  %v793_v32 = vld [vmem:[#allocation3 + $0x38] sm:$0xff] }
 0x2bc   : > { %1392 = vadd.xlane.f32.xlu0 %v1391_v45  ;;  %v1363_v26 = vpop.xlane.xlu2 %1362  ;;  %v938_v60 = vmul.f32 %v2669_v4, %v810_v62  ;;  %v2671_v44 = vpop.eup %2670  ;;  %2682 = vpow2.f32 %v874_v16  ;;  %v4184_v4 = vld [vmem:[#allocation57_spill] sm:$0xff]  ;;  %v4194_v9 = vsub.f32 %v4192_v51, %v4193_v17  ;;  %v4210_v17 = vld [vmem:[#allocation44_spill] sm:$0xff] }
 0x2bd   : > { %v1415_v18 = vadd.f32 %v1363_v26, %v935_v40  ;;  %v923_v57 = vmul.f32 %v2671_v44, %v795_v5  ;;  %v2673_v0 = vpop.eup %2672  ;;  %v890_v37 = vmul.f32 1.442695, %v4179_v42  ;;  %v894_v61 = vmul.f32 1.442695, %v4182_v63  ;;  %v4199_v42 = vld [vmem:[#allocation35_spill] sm:$0xff] }
 0x2be   : > { %v2675_v52 = vpop.eup %2674  ;;  %v931_v38 = vmul.f32 %v2673_v0, %v803_v1  ;;  %v4185_v62 = vsub.f32 %v4183_v25, %v4184_v4  ;;  %v4191_v44 = vsub.f32 %v4189_v15, %v4190_v31  ;;  %v808_v1 = vld [vmem:[#allocation3 + $0xb0] sm:$0xff]  ;;  %v4202_v4 = vld [vmem:[#allocation33_spill] sm:$0xff] }
 0x2bf   : > { %1448 = vst.msk [vmem:[#allocation3 + $0xa8] sm:$0xff] %vm1426_vm1, %v1415_v18  ;;  %v2677_v20 = vpop.eup %2676  ;;  %v933_v43 = vmul.f32 %v2675_v52, %v805_v21  ;;  %2684 = vpow2.f32 %v890_v37  ;;  %v4195_v21 = vld [vmem:[#allocation28_spill] sm:$0xff]  ;;  %v4200_v37 = vsub.f32 %v4198_v30, %v4199_v42  ;;  %v4216_v30 = vld [vmem:[#allocation49_spill] sm:$0xff]  ;;  %v4217_v42 = vld [vmem:[#allocation51_spill] sm:$0xff] }
 0x2c0   : > { %v941_v26 = vmul.f32 %v2677_v20, %v813_v3  ;;  %v2679_v18 = vpop.eup %2678  ;;  %v880_v46 = vmul.f32 1.442695, %v4185_v62  ;;  %2686 = vpow2.f32 %v894_v61  ;;  %v864_v5 = vmul.f32 1.442695, %v4191_v44  ;;  %v4201_v25 = vld [vmem:[#allocation32_spill] sm:$0xff] }
 0x2c1   : > { %v2681_v12 = vpop.eup %2680  ;;  %v4203_v62 = vsub.f32 %v4201_v25, %v4202_v4  ;;  %v4207_v44 = vld [vmem:[#allocation36_spill] sm:$0xff] }
 0x2c2   : > { %v2683_v2 = vpop.eup %2682  ;;  %v918_v56 = vmul.f32 %v2681_v12, %v790_v7  ;;  %2688 = vpow2.f32 %v880_v46 }
 0x2c3   : > { %v926_v29 = vmul.f32 %v2683_v2, %v798_v48  ;;  %v866_v46 = vmul.f32 1.442695, %v4203_v62  ;;  %v4204_v48 = vld [vmem:[#allocation37_spill] sm:$0xff] }
 0x2c4   : > { %v1318_v53 = vpop.xlane.xlu2 %1317 }
 0x2c5   : > { %v1400_v14 = vadd.f32 %v1318_v53, %v920_v47  ;;  %v788_v53 = vld [vmem:[#allocation3 + $0x10] sm:$0xff]  ;;  %v2685_v6 = vpop.eup %2684 }
 0x2c6   : > { %v916_v39 = vmul.f32 %v2679_v18, %v788_v53  ;;  %v2687_v22 = vpop.eup %2686  ;;  %v816_v53 = vld [vmem:[#allocation3 + $0xf0] sm:$0xff] }
 0x2c7   : > { %1433 = vst.msk [vmem:[#allocation3 + $0x30] sm:$0xff] %vm1426_vm1, %v1400_v14  ;;  %v936_v16 = vmul.f32 %v2687_v22, %v808_v1 }
 0x2c8   : > { %v2689_v52 = vpop.eup %2688 }
 0x2cc   : > { %v1372_v28 = vpop.xlane.xlu2 %1371 }
 0x2cd   : > { %v1418_v36 = vadd.f32 %v1372_v28, %v938_v60  ;;  %v4187_v28 = vld [vmem:[#allocation25_spill] sm:$0xff] }
 0x2cf   : > { %1451 = vst.msk [vmem:[#allocation3 + $0xc0] sm:$0xff] %vm1426_vm1, %v1418_v36  ;;  %v4188_v36 = vsub.f32 %v4186_v59, %v4187_v28 }
 0x2d1   : > { %v860_v11 = vmul.f32 1.442695, %v4188_v36  ;;  %v809_v36 = vld [vmem:[#allocation3 + $0xb8] sm:$0xff] }
 0x2d3   : > { %2690 = vpow2.f32 %v860_v11 }
 0x2d4   : > { %v1327_v58 = vpop.xlane.xlu2 %1326  ;;  %2692 = vpow2.f32 %v864_v5  ;;  %v4208_v5 = vld [vmem:[#allocation38_spill] sm:$0xff] }
 0x2d5   : > { %v1403_v24 = vadd.f32 %v1327_v58, %v923_v57  ;;  %v806_v57 = vld [vmem:[#allocation3 + $0xa0] sm:$0xff]  ;;  %v910_v58 = vmul.f32 1.442695, %v4194_v9 }
 0x2d6   : > { %v4211_v9 = vld [vmem:[#allocation46_spill] sm:$0xff] }
 0x2d7   : > { %1436 = vst.msk [vmem:[#allocation3 + $0x48] sm:$0xff] %vm1426_vm1, %v1403_v24  ;;  %v934_v24 = vmul.f32 %v2685_v6, %v806_v57  ;;  %2694 = vpow2.f32 %v910_v58  ;;  %v4212_v58 = vsub.f32 %v4210_v17, %v4211_v9  ;;  %v817_v17 = vld [vmem:[#allocation3 + $0xf8] sm:$0xff] }
 0x2d8   : > { %v1351_v41 = vpop.xlane.xlu1 %1350 }
 0x2d9   : > { %v1411_v34 = vadd.f32 %v1351_v41, %v931_v38  ;;  %v4196_v38 = vld [vmem:[#allocation30_spill] sm:$0xff]  ;;  %v2691_v10 = vpop.eup %2690  ;;  %v906_v1 = vmul.f32 1.442695, %v4212_v58 }
 0x2da   : > { %v1357_v45 = vpop.xlane.xlu0 %1356  ;;  %v4197_v20 = vsub.f32 %v4195_v21, %v4196_v38  ;;  %v2693_v27 = vpop.eup %2692  ;;  %v4213_v38 = vld [vmem:[#allocation40_spill] sm:$0xff] }
 0x2db   : > { %1444 = vst.msk [vmem:[#allocation3 + $0x88] sm:$0xff] %vm1426_vm1, %v1411_v34  ;;  %v1413_v40 = vadd.f32 %v1357_v45, %v933_v43  ;;  %v929_v43 = vmul.f32 %v2689_v52, %v801_v23  ;;  %v900_v45 = vmul.f32 1.442695, %v4200_v37  ;;  %v921_v12 = vmul.f32 %v2693_v27, %v793_v32 }
 0x2dc   : > { %v1381_v47 = vpop.xlane.xlu2 %1380  ;;  %v896_v41 = vmul.f32 1.442695, %v4197_v20  ;;  %v4214_v20 = vld [vmem:[#allocation42_spill] sm:$0xff]  ;;  %v4218_v37 = vsub.f32 %v4216_v30, %v4217_v42 }
 0x2dd   : > { %1446 = vst.msk [vmem:[#allocation3 + $0x98] sm:$0xff] %vm1426_vm1, %v1413_v40  ;;  %v1421_v14 = vadd.f32 %v1381_v47, %v941_v26  ;;  %v791_v26 = vld [vmem:[#allocation3 + $0x28] sm:$0xff]  ;;  %v2695_v61 = vpop.eup %2694 }
 0x2de   : > { %2696 = vpow2.f32 %v896_v41  ;;  %v919_v63 = vmul.f32 %v2691_v10, %v791_v26  ;;  %v944_v2 = vmul.f32 %v2695_v61, %v816_v53  ;;  %v4215_v41 = vsub.f32 %v4213_v38, %v4214_v20  ;;  %v4220_v53 = vld [vmem:[#allocation54_spill] sm:$0xff] }
 0x2df   : > { %1454 = vst.msk [vmem:[#allocation3 + $0xd8] sm:$0xff] %vm1426_vm1, %v1421_v14  ;;  %2698 = vpow2.f32 %v900_v45  ;;  %v876_v45 = vmul.f32 1.442695, %v4218_v37 }
 0x2e0   : > { %v1306_v60 = vpop.xlane.xlu1 %1305  ;;  %2700 = vpow2.f32 %v866_v46  ;;  %v797_v46 = vld [vmem:[#allocation3 + $0x58] sm:$0xff] }
 0x2e1   : > { %v1396_v50 = vadd.f32 %v1306_v60, %v916_v39 }
 0x2e2   : > { %v1312_v19 = vpop.xlane.xlu0 %1311 }
 0x2e3   : > { %1429 = vst.msk [vmem:[#allocation3 + $0x10] sm:$0xff] %vm1426_vm1, %v1396_v50  ;;  %v1398_v54 = vadd.f32 %v1312_v19, %v918_v56  ;;  %v4205_v50 = vld [vmem:[#allocation39_spill] sm:$0xff] }
 0x2e4   : > { %v1336_v33 = vpop.xlane.xlu2 %1335  ;;  %v2697_v60 = vpop.eup %2696  ;;  %v4206_v56 = vsub.f32 %v4204_v48, %v4205_v50 }
 0x2e5   : > { %1431 = vst.msk [vmem:[#allocation3 + $0x20] sm:$0xff] %vm1426_vm1, %v1398_v54  ;;  %v1406_v0 = vadd.f32 %v1336_v33, %v926_v29  ;;  %v2699_v19 = vpop.eup %2698  ;;  %v811_v54 = vld [vmem:[#allocation3 + $0xc8] sm:$0xff]  ;;  %v937_v29 = vmul.f32 %v2697_v60, %v809_v36  ;;  %v4209_v33 = vsub.f32 %v4207_v44, %v4208_v5 }
 0x2e6   : > { %v870_v59 = vmul.f32 1.442695, %v4206_v56  ;;  %v939_v31 = vmul.f32 %v2699_v19, %v811_v54  ;;  %v2701_v51 = vpop.eup %2700  ;;  %v4222_v56 = vld [vmem:[#allocation48_spill] sm:$0xff]  ;;  %v815_v5 = vld [vmem:[#allocation3 + $0xe8] sm:$0xff] }
 0x2e7   : > { %1439 = vst.msk [vmem:[#allocation3 + $0x60] sm:$0xff] %vm1426_vm1, %v1406_v0  ;;  %v902_v57 = vmul.f32 1.442695, %v4209_v33 }
 0x2e8   : > { %v1360_v8 = vpop.xlane.xlu1 %1359  ;;  %2702 = vpow2.f32 %v870_v59  ;;  %v4223_v59 = vld [vmem:[#allocation50_spill] sm:$0xff] }
 0x2e9   : > { %v1414_v49 = vadd.f32 %v1360_v8, %v934_v24  ;;  %v794_v24 = vld [vmem:[#allocation3 + $0x40] sm:$0xff]  ;;  %2704 = vpow2.f32 %v902_v57  ;;  %v796_v8 = vld [vmem:[#allocation3 + $0x50] sm:$0xff] }
 0x2ea   : > { %v1366_v3 = vpop.xlane.xlu0 %1365  ;;  %v922_v23 = vmul.f32 %v2701_v51, %v794_v24  ;;  %2706 = vpow2.f32 %v906_v1 }
 0x2eb   : > { %1447 = vst.msk [vmem:[#allocation3 + $0xa0] sm:$0xff] %vm1426_vm1, %v1414_v49  ;;  %v1416_v34 = vadd.f32 %v1366_v3, %v936_v16  ;;  %v872_v3 = vmul.f32 1.442695, %v4215_v41 }
 0x2ec   : > { %v1345_v40 = vpop.xlane.xlu2 %1344 }
 0x2ed   : > { %1449 = vst.msk [vmem:[#allocation3 + $0xb0] sm:$0xff] %vm1426_vm1, %v1416_v34  ;;  %v1409_v18 = vadd.f32 %v1345_v40, %v929_v43  ;;  %v812_v40 = vld [vmem:[#allocation3 + $0xd0] sm:$0xff]  ;;  %2708 = vpow2.f32 %v872_v3 }
 0x2ee   : > { %v2703_v52 = vpop.eup %2702  ;;  %2710 = vpow2.f32 %v876_v45 }
 0x2ef   : > { %1442 = vst.msk [vmem:[#allocation3 + $0x78] sm:$0xff] %vm1426_vm1, %v1409_v18  ;;  %v924_v21 = vmul.f32 %v2703_v52, %v796_v8  ;;  %v2705_v10 = vpop.eup %2704  ;;  %v814_v18 = vld [vmem:[#allocation3 + $0xe0] sm:$0xff] }
 0x2f0   : > { %v1315_v47 = vpop.xlane.xlu1 %1314  ;;  %v2707_v26 = vpop.eup %2706  ;;  %v940_v27 = vmul.f32 %v2705_v10, %v812_v40 }
 0x2f1   : > { %v1399_v14 = vadd.f32 %v1315_v47, %v919_v63  ;;  %v942_v61 = vmul.f32 %v2707_v26, %v814_v18  ;;  %v4219_v47 = vld [vmem:[#allocation52_spill] sm:$0xff] }
 0x2f2   : > { %v1321_v7 = vpop.xlane.xlu0 %1320 }
 0x2f3   : > { %1432 = vst.msk [vmem:[#allocation3 + $0x28] sm:$0xff] %vm1426_vm1, %v1399_v14  ;;  %v1401_v39 = vadd.f32 %v1321_v7, %v921_v12  ;;  %v4221_v14 = vsub.f32 %v4219_v47, %v4220_v53  ;;  %v2709_v62 = vpop.eup %2708 }
 0x2f4   : > { %v1390_v28 = vpop.xlane.xlu2 %1389  ;;  %v2711_v7 = vpop.eup %2710 }
 0x2f5   : > { %1434 = vst.msk [vmem:[#allocation3 + $0x38] sm:$0xff] %vm1426_vm1, %v1401_v39  ;;  %v1424_v11 = vadd.f32 %v1390_v28, %v944_v2  ;;  %v878_v12 = vmul.f32 1.442695, %v4221_v14  ;;  %v799_v39 = vld [vmem:[#allocation3 + $0x68] sm:$0xff]  ;;  %v925_v2 = vmul.f32 %v2709_v62, %v797_v46  ;;  %v4224_v28 = vsub.f32 %v4222_v56, %v4223_v59 }
 0x2f6   : > { %v927_v50 = vmul.f32 %v2711_v7, %v799_v39 }
 0x2f7   : > { %1457 = vst.msk [vmem:[#allocation3 + $0xf0] sm:$0xff] %vm1426_vm1, %v1424_v11  ;;  %2712 = vpow2.f32 %v878_v12  ;;  %v908_v36 = vmul.f32 1.442695, %v4224_v28 }
 0x2f8   : > { %v1369_v6 = vpop.xlane.xlu1 %1368 }
 0x2f9   : > { %v1417_v15 = vadd.f32 %v1369_v6, %v937_v29  ;;  %v800_v29 = vld [vmem:[#allocation3 + $0x70] sm:$0xff]  ;;  %2714 = vpow2.f32 %v908_v36 }
 0x2fa   : > { %v1375_v0 = vpop.xlane.xlu0 %1374 }
 0x2fb   : > { %1450 = vst.msk [vmem:[#allocation3 + $0xb8] sm:$0xff] %vm1426_vm1, %v1417_v15  ;;  %v1419_v22 = vadd.f32 %v1375_v0, %v939_v31  ;;  %v912_v0 = vmul.f32 1.442695, %v849_v13 }
 0x2fd   : > { %1452 = vst.msk [vmem:[#allocation3 + $0xc8] sm:$0xff] %vm1426_vm1, %v1419_v22  ;;  %v2713_v54 = vpop.eup %2712  ;;  %2716 = vpow2.f32 %v912_v0 }
 0x2fe   : > { %v928_v6 = vmul.f32 %v2713_v54, %v800_v29 }
 0x2ff   : > { %v2715_v44 = vpop.eup %2714 }
 0x300   : > { %v1324_v49 = vpop.xlane.xlu1 %1323  ;;  %v943_v33 = vmul.f32 %v2715_v44, %v815_v5 }
 0x301   : > { %v1402_v16 = vadd.f32 %v1324_v49, %v922_v23 }
 0x302   : > { %v1330_v34 = vpop.xlane.xlu0 %1329 }
 0x303   : > { %1435 = vst.msk [vmem:[#allocation3 + $0x40] sm:$0xff] %vm1426_vm1, %v1402_v16  ;;  %v1404_v43 = vadd.f32 %v1330_v34, %v924_v21  ;;  %v2717_v51 = vpop.eup %2716 }
 0x304   : > { %v945_v9 = vmul.f32 %v2717_v51, %v817_v17 }
 0x305   : > { %1437 = vst.msk [vmem:[#allocation3 + $0x50] sm:$0xff] %vm1426_vm1, %v1404_v43 }
 0x308   : > { %v1378_v32 = vpop.xlane.xlu1 %1377 }
 0x309   : > { %v1420_v63 = vadd.f32 %v1378_v32, %v940_v27 }
 0x30a   : > { %v1384_v25 = vpop.xlane.xlu0 %1383 }
 0x30b   : > { %1453 = vst.msk [vmem:[#allocation3 + $0xd0] sm:$0xff] %vm1426_vm1, %v1420_v63  ;;  %v1422_v4 = vadd.f32 %v1384_v25, %v942_v61 }
 0x30d   : > { %1455 = vst.msk [vmem:[#allocation3 + $0xe0] sm:$0xff] %vm1426_vm1, %v1422_v4 }
 0x310   : > { %v1333_v60 = vpop.xlane.xlu1 %1332 }
 0x311   : > { %v1405_v48 = vadd.f32 %v1333_v60, %v925_v2 }
 0x312   : > { %v1339_v11 = vpop.xlane.xlu0 %1338 }
 0x313   : > { %1438 = vst.msk [vmem:[#allocation3 + $0x58] sm:$0xff] %vm1426_vm1, %v1405_v48  ;;  %v1407_v19 = vadd.f32 %v1339_v11, %v927_v50 }
 0x315   : > { %1440 = vst.msk [vmem:[#allocation3 + $0x68] sm:$0xff] %vm1426_vm1, %v1407_v19 }
 0x318   : > { %v1342_v15 = vpop.xlane.xlu1 %1341 }
 0x319   : > { %v1408_v31 = vadd.f32 %v1342_v15, %v928_v6 }
 0x31b   : > { %1441 = vst.msk [vmem:[#allocation3 + $0x70] sm:$0xff] %vm1426_vm1, %v1408_v31 }
 0x320   : > { %v1387_v57 = vpop.xlane.xlu1 %1386 }
 0x321   : > { %v1423_v22 = vadd.f32 %v1387_v57, %v943_v33 }
 0x323   : > { %1456 = vst.msk [vmem:[#allocation3 + $0xe8] sm:$0xff] %vm1426_vm1, %v1423_v22 }
 0x32e   : > { %1563 = sbr.rel (%p2396_p2) target bundleno = 1064 (0x428), region = 52 }
 0x32f   : > { %v1393_v58 = vpop.xlane.xlu0 %1392 }
 0x330   : > { %v1425_v1 = vadd.f32 %v1393_v58, %v945_v9 }
 0x332   : > { %1458 = vst.msk [vmem:[#allocation3 + $0xf8] sm:$0xff] %vm1426_vm1, %v1425_v1 }
 0x333   : > { %v1600_v24 = vld [vmem:[#allocation3 + $0x20] sm:$0xff]  ;;  %v3006_v52 = vmov 0   ;;  %v1598_v35 = vld [vmem:[#allocation3 + $0x10] sm:$0xff]  ;;  %v1601_v13 = vld [vmem:[#allocation3 + $0x28] sm:$0xff] }
 0x334   : > { %2754 = vset.pattern.permute.xlu2 %v3006_v52  ;;  %2753 = vset.pattern.permute.xlu1 %v3006_v52  ;;  %2755 = vlog2.f32 %v1600_v24  ;;  %v1596_v55 = vld [vmem:[#allocation3] sm:$0xff]  ;;  %v1599_v8 = vld [vmem:[#allocation3 + $0x18] sm:$0xff]  ;;  %v1597_v23 = vld [vmem:[#allocation3 + $0x8] sm:$0xff] }
 0x335   : > { %2752 = vset.pattern.permute.xlu0 %v3006_v52  ;;  %2757 = vlog2.f32 %v1598_v35  ;;  %v1568_v16 = vld [vmem:[#allocation2 + $0x20] sm:$0xff]  ;;  %v1566_v20 = vld [vmem:[#allocation2 + $0x10] sm:$0xff]  ;;  %v1603_v10 = vld [vmem:[#allocation3 + $0x38] sm:$0xff] }
 0x336   : > { %2759 = vlog2.f32 %v1596_v55  ;;  %v1604_v41 = vld [vmem:[#allocation3 + $0x40] sm:$0xff]  ;;  %v1602_v45 = vld [vmem:[#allocation3 + $0x30] sm:$0xff]  ;;  %v1569_v63 = vld [vmem:[#allocation2 + $0x28] sm:$0xff] }
 0x337   : > { %2761 = vlog2.f32 %v1601_v13  ;;  %v1564_v43 = vld [vmem:[#allocation2] sm:$0xff]  ;;  %v1567_v47 = vld [vmem:[#allocation2 + $0x18] sm:$0xff]  ;;  %v1565_v14 = vld [vmem:[#allocation2 + $0x8] sm:$0xff] }
 0x338   : > { %2763 = vlog2.f32 %v1599_v8  ;;  %v1607_v25 = vld [vmem:[#allocation3 + $0x58] sm:$0xff]  ;;  %v1606_v46 = vld [vmem:[#allocation3 + $0x50] sm:$0xff]  ;;  %v1605_v2 = vld [vmem:[#allocation3 + $0x48] sm:$0xff] }
 0x339   : > { %2765 = vlog2.f32 %v1597_v23  ;;  %v1572_v50 = vld [vmem:[#allocation2 + $0x40] sm:$0xff]  ;;  %v1571_v59 = vld [vmem:[#allocation2 + $0x38] sm:$0xff]  ;;  %v1570_v36 = vld [vmem:[#allocation2 + $0x30] sm:$0xff] }
 0x33a   : > { %v2756_v49 = vpop.eup %2755  ;;  %2767 = vlog2.f32 %v1604_v41  ;;  %v1610_v19 = vld [vmem:[#allocation3 + $0x70] sm:$0xff]  ;;  %v1609_v6 = vld [vmem:[#allocation3 + $0x68] sm:$0xff]  ;;  %v1608_v44 = vld [vmem:[#allocation3 + $0x60] sm:$0xff] }
 0x33b   : > { %v2758_v21 = vpop.eup %2757  ;;  %v1637_v38 = vmul.f32 0.6931472, %v2756_v49  ;;  %2769 = vlog2.f32 %v1603_v10  ;;  %v1575_v57 = vld [vmem:[#allocation2 + $0x58] sm:$0xff]  ;;  %v1574_v22 = vld [vmem:[#allocation2 + $0x50] sm:$0xff]  ;;  %v1573_v17 = vld [vmem:[#allocation2 + $0x48] sm:$0xff] }
 0x33c   : > { %v2760_v3 = vpop.eup %2759  ;;  %v1633_v34 = vmul.f32 0.6931472, %v2758_v21  ;;  %2771 = vlog2.f32 %v1602_v45  ;;  %v1613_v58 = vld [vmem:[#allocation3 + $0x88] sm:$0xff]  ;;  %v1612_v52 = vld [vmem:[#allocation3 + $0x80] sm:$0xff]  ;;  %v1611_v13 = vld [vmem:[#allocation3 + $0x78] sm:$0xff] }
 0x33d   : > { %v2762_v30 = vpop.eup %2761  ;;  %v1696_v42 = vadd.f32 %v1637_v38, %v1568_v16  ;;  %v1629_v37 = vmul.f32 0.6931472, %v2760_v3  ;;  %2773 = vlog2.f32 %v1607_v25  ;;  %v1578_v49 = vld [vmem:[#allocation2 + $0x70] sm:$0xff]  ;;  %v1577_v21 = vld [vmem:[#allocation2 + $0x68] sm:$0xff]  ;;  %v1616_v3 = vld [vmem:[#allocation3 + $0xa0] sm:$0xff] }
 0x33e   : > { %v2764_v40 = vpop.eup %2763  ;;  %v1694_v26 = vadd.f32 %v1633_v34, %v1566_v20  ;;  %v1639_v32 = vmul.f32 0.6931472, %v2762_v30  ;;  %2775 = vlog2.f32 %v1606_v46  ;;  %v1576_v20 = vld [vmem:[#allocation2 + $0x60] sm:$0xff]  ;;  %v1615_v10 = vld [vmem:[#allocation3 + $0x98] sm:$0xff] }
 0x33f   : > { %v2766_v18 = vpop.eup %2765  ;;  %1874 = vperm.xlu2 %2754, %v1696_v42   ;;  %v1692_v27 = vadd.f32 %v1629_v37, %v1564_v43  ;;  %v1635_v61 = vmul.f32 0.6931472, %v2764_v40  ;;  %2777 = vlog2.f32 %v1605_v2  ;;  %v1614_v37 = vld [vmem:[#allocation3 + $0x90] sm:$0xff] }
 0x340   : > { %1864 = vperm.xlu1 %2753, %v1694_v26   ;;  %v1631_v53 = vmul.f32 0.6931472, %v2766_v18  ;;  %v1697_v12 = vadd.f32 %v1639_v32, %v1569_v63  ;;  %v2768_v4 = vpop.eup %2767  ;;  %2779 = vlog2.f32 %v1610_v19  ;;  %v1581_v26 = vld [vmem:[#allocation2 + $0x88] sm:$0xff]  ;;  %v1579_v63 = vld [vmem:[#allocation2 + $0x78] sm:$0xff] }
 0x341   : > { %1854 = vperm.xlu0 %2752, %v1692_v27   ;;  %v1695_v62 = vadd.f32 %v1635_v61, %v1567_v47  ;;  %v2770_v7 = vpop.eup %2769  ;;  %v1645_v48 = vmul.f32 0.6931472, %v2768_v4  ;;  %2781 = vlog2.f32 %v1609_v6  ;;  %v1580_v27 = vld [vmem:[#allocation2 + $0x80] sm:$0xff]  ;;  %v1619_v47 = vld [vmem:[#allocation3 + $0xb8] sm:$0xff] }
 0x342   : > { %v1693_v39 = vadd.f32 %v1631_v53, %v1565_v14  ;;  %v2772_v60 = vpop.eup %2771  ;;  %v1643_v56 = vmul.f32 0.6931472, %v2770_v7  ;;  %2783 = vlog2.f32 %v1608_v44 }
 0x343   : > { %v1641_v28 = vmul.f32 0.6931472, %v2772_v60  ;;  %v1700_v11 = vadd.f32 %v1645_v48, %v1572_v50  ;;  %v2774_v54 = vpop.eup %2773  ;;  %2785 = vlog2.f32 %v1613_v58  ;;  %v1583_v60 = vld [vmem:[#allocation2 + $0x98] sm:$0xff]  ;;  %v1582_v50 = vld [vmem:[#allocation2 + $0x90] sm:$0xff] }
 0x344   : > { %v1699_v29 = vadd.f32 %v1643_v56, %v1571_v59  ;;  %v2776_v15 = vpop.eup %2775  ;;  %v1651_v33 = vmul.f32 0.6931472, %v2774_v54  ;;  %2787 = vlog2.f32 %v1612_v52  ;;  %v1622_v59 = vld [vmem:[#allocation3 + $0xd0] sm:$0xff] }
 0x345   : > { %v1698_v31 = vadd.f32 %v1641_v28, %v1570_v36  ;;  %v2778_v5 = vpop.eup %2777  ;;  %v1649_v0 = vmul.f32 0.6931472, %v2776_v15  ;;  %2789 = vlog2.f32 %v1611_v13 }
 0x346   : > { %v1647_v51 = vmul.f32 0.6931472, %v2778_v5  ;;  %v1703_v9 = vadd.f32 %v1651_v33, %v1575_v57  ;;  %v2780_v1 = vpop.eup %2779  ;;  %2791 = vlog2.f32 %v1616_v3  ;;  %v1586_v5 = vld [vmem:[#allocation2 + $0xb0] sm:$0xff]  ;;  %v1585_v57 = vld [vmem:[#allocation2 + $0xa8] sm:$0xff] }
 0x347   : > { %1879 = vperm.xlu2 %2754, %v1697_v12   ;;  %v1702_v24 = vadd.f32 %v1649_v0, %v1574_v22  ;;  %v2782_v35 = vpop.eup %2781  ;;  %v1657_v23 = vmul.f32 0.6931472, %v2780_v1  ;;  %2793 = vlog2.f32 %v1615_v10  ;;  %v1618_v12 = vld [vmem:[#allocation3 + $0xb0] sm:$0xff]  ;;  %v1625_v22 = vld [vmem:[#allocation3 + $0xe8] sm:$0xff] }
 0x348   : > { %1869 = vperm.xlu1 %2753, %v1695_v62   ;;  %v1701_v55 = vadd.f32 %v1647_v51, %v1573_v17  ;;  %v2784_v8 = vpop.eup %2783  ;;  %v1655_v16 = vmul.f32 0.6931472, %v2782_v35  ;;  %2795 = vlog2.f32 %v1614_v37  ;;  %v1617_v62 = vld [vmem:[#allocation3 + $0xa8] sm:$0xff]  ;;  %v1592_v37 = vld [vmem:[#allocation2 + $0xe0] sm:$0xff] }
 0x349   : > { %1859 = vperm.xlu0 %2752, %v1693_v39   ;;  %v1653_v38 = vmul.f32 0.6931472, %v2784_v8  ;;  %v1706_v41 = vadd.f32 %v1657_v23, %v1578_v49  ;;  %v2786_v34 = vpop.eup %2785  ;;  %2797 = vlog2.f32 %v1619_v47  ;;  %v1584_v39 = vld [vmem:[#allocation2 + $0xa0] sm:$0xff]  ;;  %v1589_v8 = vld [vmem:[#allocation2 + $0xc8] sm:$0xff]  ;;  %v1595_v47 = vld [vmem:[#allocation2 + $0xf8] sm:$0xff] }
 0x34a   : > { %v1705_v43 = vadd.f32 %v1655_v16, %v1577_v21  ;;  %v2788_v30 = vpop.eup %2787  ;;  %v1663_v40 = vmul.f32 0.6931472, %v2786_v34  ;;  %2799 = vlog2.f32 %v1618_v12  ;;  %v1588_v49 = vld [vmem:[#allocation2 + $0xc0] sm:$0xff]  ;;  %v1626_v34 = vld [vmem:[#allocation3 + $0xf0] sm:$0xff] }
 0x34b   : > { %v1704_v42 = vadd.f32 %v1653_v38, %v1576_v20  ;;  %v2790_v45 = vpop.eup %2789  ;;  %v1661_v18 = vmul.f32 0.6931472, %v2788_v30  ;;  %2801 = vlog2.f32 %v1617_v62  ;;  %v1627_v20 = vld [vmem:[#allocation3 + $0xf8] sm:$0xff]  ;;  %v1593_v30 = vld [vmem:[#allocation2 + $0xe8] sm:$0xff] }
 0x34c   : > { %v1659_v32 = vmul.f32 0.6931472, %v2790_v45  ;;  %v1709_v61 = vadd.f32 %v1663_v40, %v1581_v26  ;;  %v2792_v53 = vpop.eup %2791  ;;  %2803 = vlog2.f32 %v1622_v59  ;;  %v1591_v40 = vld [vmem:[#allocation2 + $0xd8] sm:$0xff]  ;;  %v1741_v62 = vld [vmem:[#allocation10 + $0x88] sm:$0xff] }
 0x34d   : > { %v1708_v14 = vadd.f32 %v1661_v18, %v1580_v27  ;;  %v2794_v25 = vpop.eup %2793  ;;  %v1669_v7 = vmul.f32 0.6931472, %v2792_v53  ;;  %v1745_v59 = vld [vmem:[#allocation10 + $0xa8] sm:$0xff] }
 0x34e   : > { %v1707_v4 = vadd.f32 %v1659_v32, %v1579_v63  ;;  %v2796_v46 = vpop.eup %2795  ;;  %v1667_v2 = vmul.f32 0.6931472, %v2794_v25 }
 0x34f   : > { %1894 = vperm.xlu2 %2754, %v1700_v11   ;;  %v1665_v48 = vmul.f32 0.6931472, %v2796_v46  ;;  %v1712_v56 = vadd.f32 %v1669_v7, %v1584_v39  ;;  %v2798_v28 = vpop.eup %2797  ;;  %v1621_v11 = vld [vmem:[#allocation3 + $0xc8] sm:$0xff]  ;;  %v1742_v46 = vld [vmem:[#allocation10 + $0x90] sm:$0xff]  ;;  %v1743_v7 = vld [vmem:[#allocation10 + $0x98] sm:$0xff] }
 0x350   : > { %1889 = vperm.xlu1 %2753, %v1699_v29   ;;  %v1711_v36 = vadd.f32 %v1667_v2, %v1583_v60  ;;  %v2800_v19 = vpop.eup %2799  ;;  %v1620_v29 = vld [vmem:[#allocation3 + $0xc0] sm:$0xff]  ;;  %v1675_v15 = vmul.f32 0.6931472, %v2798_v28  ;;  %2805 = vlog2.f32 %v1621_v11  ;;  %v1746_v28 = vld [vmem:[#allocation10 + $0xb0] sm:$0xff] }
 0x351   : > { %1884 = vperm.xlu0 %2752, %v1698_v31   ;;  %v1710_v54 = vadd.f32 %v1665_v48, %v1582_v50  ;;  %v2802_v6 = vpop.eup %2801  ;;  %v1587_v31 = vld [vmem:[#allocation2 + $0xb8] sm:$0xff]  ;;  %v1673_v44 = vmul.f32 0.6931472, %v2800_v19  ;;  %2807 = vlog2.f32 %v1620_v29 }
 0x352   : > { %v1671_v33 = vmul.f32 0.6931472, %v2802_v6  ;;  %v1715_v0 = vadd.f32 %v1675_v15, %v1587_v31  ;;  %v2804_v51 = vpop.eup %2803  ;;  %2809 = vlog2.f32 %v1625_v22  ;;  %v1756_v15 = vld [vmem:[#allocation10 + $0x100] sm:$0xff]  ;;  %v1757_v31 = vld [vmem:[#allocation10 + $0x108] sm:$0xff] }
 0x353   : > { %v1714_v17 = vadd.f32 %v1673_v44, %v1586_v5  ;;  %v1681_v35 = vmul.f32 0.6931472, %v2804_v51  ;;  %v1758_v44 = vld [vmem:[#allocation10 + $0x110] sm:$0xff]  ;;  %v1759_v5 = vld [vmem:[#allocation10 + $0x118] sm:$0xff] }
 0x354   : > { %v1713_v1 = vadd.f32 %v1671_v33, %v1585_v57 }
 0x356   : > { %v2806_v58 = vpop.eup %2805 }
 0x357   : > { %1909 = vperm.xlu2 %2754, %v1703_v9   ;;  %v1624_v9 = vld [vmem:[#allocation3 + $0xe0] sm:$0xff]  ;;  %v2808_v52 = vpop.eup %2807  ;;  %v1679_v13 = vmul.f32 0.6931472, %v2806_v58  ;;  %v1770_v58 = vld [vmem:[#allocation10 + $0x170] sm:$0xff] }
 0x358   : > { %1904 = vperm.xlu1 %2753, %v1702_v24   ;;  %v1623_v24 = vld [vmem:[#allocation3 + $0xd8] sm:$0xff]  ;;  %2811 = vlog2.f32 %v1624_v9  ;;  %v1677_v23 = vmul.f32 0.6931472, %v2808_v52  ;;  %v2810_v21 = vpop.eup %2809  ;;  %v1769_v9 = vld [vmem:[#allocation10 + $0x168] sm:$0xff]  ;;  %v1732_v52 = vld [vmem:[#allocation10 + $0x40] sm:$0xff] }
 0x359   : > { %1899 = vperm.xlu0 %2752, %v1701_v55   ;;  %v1590_v55 = vld [vmem:[#allocation2 + $0xd0] sm:$0xff]  ;;  %2813 = vlog2.f32 %v1623_v24  ;;  %v1717_v38 = vadd.f32 %v1679_v13, %v1589_v8  ;;  %v1687_v10 = vmul.f32 0.6931472, %v2810_v21  ;;  %v1735_v21 = vld [vmem:[#allocation10 + $0x58] sm:$0xff] }
 0x35a   : > { %v1718_v16 = vadd.f32 %v1681_v35, %v1590_v55  ;;  %v1716_v3 = vadd.f32 %v1677_v23, %v1588_v49  ;;  %2815 = vlog2.f32 %v1627_v20  ;;  %v1733_v8 = vld [vmem:[#allocation10 + $0x48] sm:$0xff] }
 0x35b   : > { %2817 = vlog2.f32 %v1626_v34  ;;  %v1721_v26 = vadd.f32 %v1687_v10, %v1593_v30  ;;  %v1726_v30 = vld [vmem:[#allocation10 + $0x10] sm:$0xff] }
 0x35f   : > { %1924 = vperm.xlu2 %2754, %v1706_v41   ;;  %v2812_v41 = vpop.eup %2811 }
 0x360   : > { %1919 = vperm.xlu1 %2753, %v1705_v43   ;;  %v2814_v43 = vpop.eup %2813 }
 0x361   : > { %1914 = vperm.xlu0 %2752, %v1704_v42   ;;  %v1685_v42 = vmul.f32 0.6931472, %v2812_v41  ;;  %v1683_v45 = vmul.f32 0.6931472, %v2814_v43  ;;  %v2816_v27 = vpop.eup %2815  ;;  %v1724_v41 = vld [vmem:[#allocation10] sm:$0xff]  ;;  %v1725_v43 = vld [vmem:[#allocation10 + $0x8] sm:$0xff] }
 0x362   : > { %v2818_v63 = vpop.eup %2817 }
 0x363   : > { %v1720_v18 = vadd.f32 %v1685_v42, %v1592_v37  ;;  %v1719_v32 = vadd.f32 %v1683_v45, %v1591_v40  ;;  %v1689_v53 = vmul.f32 0.6931472, %v2818_v63  ;;  %v1727_v42 = vld [vmem:[#allocation10 + $0x18] sm:$0xff]  ;;  %v1780_v40 = vld [vmem:[#allocation10 + $0x1c0] sm:$0xff]  ;;  %v1782_v63 = vld [vmem:[#allocation10 + $0x1d0] sm:$0xff] }
 0x367   : > { %1939 = vperm.xlu2 %2754, %v1709_v61   ;;  %v1691_v61 = vmul.f32 0.6931472, %v2816_v27  ;;  %v1781_v27 = vld [vmem:[#allocation10 + $0x1c8] sm:$0xff] }
 0x368   : > { %1934 = vperm.xlu1 %2753, %v1708_v14   ;;  %v1594_v14 = vld [vmem:[#allocation2 + $0xf0] sm:$0xff] }
 0x369   : > { %1929 = vperm.xlu0 %2752, %v1707_v4   ;;  %v1723_v12 = vadd.f32 %v1691_v61, %v1595_v47  ;;  %v1722_v25 = vadd.f32 %v1689_v53, %v1594_v14  ;;  %v1740_v4 = vld [vmem:[#allocation10 + $0x80] sm:$0xff]  ;;  %v1783_v61 = vld [vmem:[#allocation10 + $0x1d8] sm:$0xff] }
 0x36a   : > { %v1736_v14 = vld [vmem:[#allocation10 + $0x60] sm:$0xff] }
 0x36f   : > { %1954 = vperm.xlu2 %2754, %v1712_v56   ;;  %v1744_v56 = vld [vmem:[#allocation10 + $0xa0] sm:$0xff] }
 0x370   : > { %1949 = vperm.xlu1 %2753, %v1711_v36   ;;  %v1747_v36 = vld [vmem:[#allocation10 + $0xb8] sm:$0xff] }
 0x371   : > { %1944 = vperm.xlu0 %2752, %v1710_v54  }
 0x377   : > { %1969 = vperm.xlu2 %2754, %v1715_v0  }
 0x378   : > { %1964 = vperm.xlu1 %2753, %v1714_v17   ;;  %v1768_v17 = vld [vmem:[#allocation10 + $0x160] sm:$0xff] }
 0x379   : > { %1959 = vperm.xlu0 %2752, %v1713_v1   ;;  %v1771_v1 = vld [vmem:[#allocation10 + $0x178] sm:$0xff] }
 0x37f   : > { %1984 = vperm.xlu2 %2754, %v1718_v16   ;;  %v1734_v16 = vld [vmem:[#allocation10 + $0x50] sm:$0xff] }
 0x380   : > { %1979 = vperm.xlu1 %2753, %v1717_v38  }
 0x381   : > { %1974 = vperm.xlu0 %2752, %v1716_v3  }
 0x387   : > { %1999 = vperm.xlu2 %2754, %v1721_v26  }
 0x388   : > { %1994 = vperm.xlu1 %2753, %v1720_v18  }
 0x389   : > { %1989 = vperm.xlu0 %2752, %v1719_v32  }
 0x390   : > { %2009 = vperm.xlu1 %2753, %v1723_v12  }
 0x391   : > { %2004 = vperm.xlu0 %2752, %v1722_v25  }
 0x399   : > { %v1875_v39 = vpop.permute.xlu2 %1874 }
 0x39a   : > { %v2028_v2 = vsub.f32 %v1740_v4, %v1875_v39  ;;  %v2029_v60 = vsub.f32 %v1741_v62, %v1875_v39  ;;  %v2030_v48 = vsub.f32 %v1742_v46, %v1875_v39  ;;  %v2031_v50 = vsub.f32 %v1743_v7, %v1875_v39  ;;  %v1737_v4 = vld [vmem:[#allocation10 + $0x68] sm:$0xff]  ;;  %v1738_v46 = vld [vmem:[#allocation10 + $0x70] sm:$0xff]  ;;  %v1739_v7 = vld [vmem:[#allocation10 + $0x78] sm:$0xff] }
 0x39c   : > { %2156 = vst [vmem:[#allocation10 + $0x80] sm:$0xff] %v2028_v2 }
 0x39d   : > { %2157 = vst [vmem:[#allocation10 + $0x88] sm:$0xff] %v2029_v60  ;;  %v1728_v60 = vld [vmem:[#allocation10 + $0x20] sm:$0xff] }
 0x39e   : > { %2158 = vst [vmem:[#allocation10 + $0x90] sm:$0xff] %v2030_v48 }
 0x39f   : > { %2159 = vst [vmem:[#allocation10 + $0x98] sm:$0xff] %v2031_v50 }
 0x3a1   : > { %v1880_v11 = vpop.permute.xlu2 %1879 }
 0x3a2   : > { %v2032_v19 = vsub.f32 %v1744_v56, %v1880_v11  ;;  %v2033_v54 = vsub.f32 %v1745_v59, %v1880_v11  ;;  %v2034_v29 = vsub.f32 %v1746_v28, %v1880_v11  ;;  %v2035_v6 = vsub.f32 %v1747_v36, %v1880_v11  ;;  %v1729_v56 = vld [vmem:[#allocation10 + $0x28] sm:$0xff]  ;;  %v1730_v28 = vld [vmem:[#allocation10 + $0x30] sm:$0xff]  ;;  %v1731_v36 = vld [vmem:[#allocation10 + $0x38] sm:$0xff] }
 0x3a4   : > { %2160 = vst [vmem:[#allocation10 + $0xa0] sm:$0xff] %v2032_v19 }
 0x3a5   : > { %2161 = vst [vmem:[#allocation10 + $0xa8] sm:$0xff] %v2033_v54  ;;  %v1792_v54 = vld [vmem:[#allocation10 + $0x220] sm:$0xff] }
 0x3a6   : > { %2162 = vst [vmem:[#allocation10 + $0xb0] sm:$0xff] %v2034_v29 }
 0x3a7   : > { %2163 = vst [vmem:[#allocation10 + $0xb8] sm:$0xff] %v2035_v6 }
 0x3a9   : > { %v1895_v33 = vpop.permute.xlu2 %1894 }
 0x3aa   : > { %v2044_v57 = vsub.f32 %v1756_v15, %v1895_v33  ;;  %v2045_v0 = vsub.f32 %v1757_v31, %v1895_v33  ;;  %v2046_v22 = vsub.f32 %v1758_v44, %v1895_v33  ;;  %v2047_v51 = vsub.f32 %v1759_v5, %v1895_v33  ;;  %v1793_v15 = vld [vmem:[#allocation10 + $0x228] sm:$0xff]  ;;  %v1794_v44 = vld [vmem:[#allocation10 + $0x230] sm:$0xff]  ;;  %v1795_v5 = vld [vmem:[#allocation10 + $0x238] sm:$0xff] }
 0x3ac   : > { %2172 = vst [vmem:[#allocation10 + $0x100] sm:$0xff] %v2044_v57 }
 0x3ad   : > { %2173 = vst [vmem:[#allocation10 + $0x108] sm:$0xff] %v2045_v0  ;;  %v1752_v0 = vld [vmem:[#allocation10 + $0xe0] sm:$0xff] }
 0x3ae   : > { %2174 = vst [vmem:[#allocation10 + $0x110] sm:$0xff] %v2046_v22 }
 0x3af   : > { %2175 = vst [vmem:[#allocation10 + $0x118] sm:$0xff] %v2047_v51 }
 0x3b1   : > { %v1910_v24 = vpop.permute.xlu2 %1909 }
 0x3b2   : > { %v2056_v35 = vsub.f32 %v1768_v17, %v1910_v24  ;;  %v2057_v55 = vsub.f32 %v1769_v9, %v1910_v24  ;;  %v2058_v13 = vsub.f32 %v1770_v58, %v1910_v24  ;;  %v1865_v23 = vpop.permute.xlu1 %1864  ;;  %v2059_v49 = vsub.f32 %v1771_v1, %v1910_v24  ;;  %v1753_v17 = vld [vmem:[#allocation10 + $0xe8] sm:$0xff]  ;;  %v1754_v58 = vld [vmem:[#allocation10 + $0xf0] sm:$0xff]  ;;  %v1755_v1 = vld [vmem:[#allocation10 + $0xf8] sm:$0xff] }
 0x3b3   : > { %v2020_v38 = vsub.f32 %v1732_v52, %v1865_v23  ;;  %v2021_v20 = vsub.f32 %v1733_v8, %v1865_v23  ;;  %v1855_v3 = vpop.permute.xlu0 %1854  ;;  %v2022_v34 = vsub.f32 %v1734_v16, %v1865_v23  ;;  %v2023_v10 = vsub.f32 %v1735_v21, %v1865_v23  ;;  %v1749_v8 = vld [vmem:[#allocation10 + $0xc8] sm:$0xff]  ;;  %v1751_v16 = vld [vmem:[#allocation10 + $0xd8] sm:$0xff] }
 0x3b4   : > { %2184 = vst [vmem:[#allocation10 + $0x160] sm:$0xff] %v2056_v35  ;;  %v2012_v37 = vsub.f32 %v1724_v41, %v1855_v3  ;;  %v2013_v45 = vsub.f32 %v1725_v43, %v1855_v3  ;;  %v2014_v18 = vsub.f32 %v1726_v30, %v1855_v3  ;;  %v2015_v32 = vsub.f32 %v1727_v42, %v1855_v3  ;;  %v1748_v35 = vld [vmem:[#allocation10 + $0xc0] sm:$0xff]  ;;  %v1807_v42 = vld [vmem:[#allocation10 + $0x298] sm:$0xff] }
 0x3b5   : > { %2185 = vst [vmem:[#allocation10 + $0x168] sm:$0xff] %v2057_v55 }
 0x3b6   : > { %2186 = vst [vmem:[#allocation10 + $0x170] sm:$0xff] %v2058_v13 }
 0x3b7   : > { %2187 = vst [vmem:[#allocation10 + $0x178] sm:$0xff] %v2059_v49  ;;  %v1750_v49 = vld [vmem:[#allocation10 + $0xd0] sm:$0xff] }
 0x3b8   : > { %2148 = vst [vmem:[#allocation10 + $0x40] sm:$0xff] %v2020_v38 }
 0x3b9   : > { %2149 = vst [vmem:[#allocation10 + $0x48] sm:$0xff] %v2021_v20  ;;  %v1925_v26 = vpop.permute.xlu2 %1924  ;;  %v1804_v20 = vld [vmem:[#allocation10 + $0x280] sm:$0xff] }
 0x3ba   : > { %2150 = vst [vmem:[#allocation10 + $0x50] sm:$0xff] %v2022_v34  ;;  %v2068_v47 = vsub.f32 %v1780_v40, %v1925_v26  ;;  %v2069_v53 = vsub.f32 %v1781_v27, %v1925_v26  ;;  %v1870_v12 = vpop.permute.xlu1 %1869  ;;  %v2070_v25 = vsub.f32 %v1782_v63, %v1925_v26  ;;  %v2071_v62 = vsub.f32 %v1783_v61, %v1925_v26  ;;  %v1805_v34 = vld [vmem:[#allocation10 + $0x288] sm:$0xff]  ;;  %v1764_v40 = vld [vmem:[#allocation10 + $0x140] sm:$0xff]  ;;  %v1767_v61 = vld [vmem:[#allocation10 + $0x158] sm:$0xff] }
 0x3bb   : > { %2151 = vst [vmem:[#allocation10 + $0x58] sm:$0xff] %v2023_v10  ;;  %v2024_v39 = vsub.f32 %v1736_v14, %v1870_v12  ;;  %v2025_v2 = vsub.f32 %v1737_v4, %v1870_v12  ;;  %v1860_v48 = vpop.permute.xlu0 %1859  ;;  %v2026_v50 = vsub.f32 %v1738_v46, %v1870_v12  ;;  %v2027_v59 = vsub.f32 %v1739_v7, %v1870_v12  ;;  %v1806_v10 = vld [vmem:[#allocation10 + $0x290] sm:$0xff]  ;;  %v1760_v14 = vld [vmem:[#allocation10 + $0x120] sm:$0xff]  ;;  %v1763_v46 = vld [vmem:[#allocation10 + $0x138] sm:$0xff] }
 0x3bc   : > { %2140 = vst [vmem:[#allocation10] sm:$0xff] %v2012_v37  ;;  %v2016_v11 = vsub.f32 %v1728_v60, %v1860_v48  ;;  %v2017_v19 = vsub.f32 %v1729_v56, %v1860_v48  ;;  %v2018_v6 = vsub.f32 %v1730_v28, %v1860_v48  ;;  %v2019_v31 = vsub.f32 %v1731_v36, %v1860_v48  ;;  %v1817_v56 = vld [vmem:[#allocation10 + $0x2e8] sm:$0xff]  ;;  %v1818_v28 = vld [vmem:[#allocation10 + $0x2f0] sm:$0xff]  ;;  %v1819_v36 = vld [vmem:[#allocation10 + $0x2f8] sm:$0xff] }
 0x3bd   : > { %2141 = vst [vmem:[#allocation10 + $0x8] sm:$0xff] %v2013_v45 }
 0x3be   : > { %2142 = vst [vmem:[#allocation10 + $0x10] sm:$0xff] %v2014_v18  ;;  %v1765_v18 = vld [vmem:[#allocation10 + $0x148] sm:$0xff] }
 0x3bf   : > { %2143 = vst [vmem:[#allocation10 + $0x18] sm:$0xff] %v2015_v32  ;;  %v1766_v32 = vld [vmem:[#allocation10 + $0x150] sm:$0xff] }
 0x3c0   : > { %2196 = vst [vmem:[#allocation10 + $0x1c0] sm:$0xff] %v2068_v47 }
 0x3c1   : > { %2197 = vst [vmem:[#allocation10 + $0x1c8] sm:$0xff] %v2069_v53  ;;  %v1940_v29 = vpop.permute.xlu2 %1939 }
 0x3c2   : > { %2198 = vst [vmem:[#allocation10 + $0x1d0] sm:$0xff] %v2070_v25  ;;  %v2080_v33 = vsub.f32 %v1792_v54, %v1940_v29  ;;  %v2081_v57 = vsub.f32 %v1793_v15, %v1940_v29  ;;  %v1890_v22 = vpop.permute.xlu1 %1889  ;;  %v2082_v51 = vsub.f32 %v1794_v44, %v1940_v29  ;;  %v2083_v9 = vsub.f32 %v1795_v5, %v1940_v29  ;;  %v1761_v25 = vld [vmem:[#allocation10 + $0x128] sm:$0xff]  ;;  %v1776_v54 = vld [vmem:[#allocation10 + $0x1a0] sm:$0xff]  ;;  %v1778_v44 = vld [vmem:[#allocation10 + $0x1b0] sm:$0xff] }
 0x3c3   : > { %2199 = vst [vmem:[#allocation10 + $0x1d8] sm:$0xff] %v2071_v62  ;;  %v2040_v24 = vsub.f32 %v1752_v0, %v1890_v22  ;;  %v2041_v52 = vsub.f32 %v1753_v17, %v1890_v22  ;;  %v1885_v55 = vpop.permute.xlu0 %1884  ;;  %v2042_v13 = vsub.f32 %v1754_v58, %v1890_v22  ;;  %v2043_v23 = vsub.f32 %v1755_v1, %v1890_v22  ;;  %v1762_v62 = vld [vmem:[#allocation10 + $0x130] sm:$0xff]  ;;  %v1777_v15 = vld [vmem:[#allocation10 + $0x1a8] sm:$0xff]  ;;  %v1779_v5 = vld [vmem:[#allocation10 + $0x1b8] sm:$0xff] }
 0x3c4   : > { %2152 = vst [vmem:[#allocation10 + $0x60] sm:$0xff] %v2024_v39  ;;  %v2036_v21 = vsub.f32 %v1748_v35, %v1885_v55  ;;  %v2037_v38 = vsub.f32 %v1749_v8, %v1885_v55  ;;  %v2038_v3 = vsub.f32 %v1750_v49, %v1885_v55  ;;  %v2039_v43 = vsub.f32 %v1751_v16, %v1885_v55  ;;  %v1772_v0 = vld [vmem:[#allocation10 + $0x180] sm:$0xff]  ;;  %v1775_v1 = vld [vmem:[#allocation10 + $0x198] sm:$0xff]  ;;  %v1829_v8 = vld [vmem:[#allocation10 + $0x348] sm:$0xff] }
 0x3c5   : > { %2153 = vst [vmem:[#allocation10 + $0x68] sm:$0xff] %v2025_v2  ;;  %v1816_v2 = vld [vmem:[#allocation10 + $0x2e0] sm:$0xff]  ;;  %v1830_v49 = vld [vmem:[#allocation10 + $0x350] sm:$0xff] }
 0x3c6   : > { %2154 = vst [vmem:[#allocation10 + $0x70] sm:$0xff] %v2026_v50  ;;  %v1828_v35 = vld [vmem:[#allocation10 + $0x340] sm:$0xff] }
 0x3c7   : > { %2155 = vst [vmem:[#allocation10 + $0x78] sm:$0xff] %v2027_v59 }
 0x3c8   : > { %2144 = vst [vmem:[#allocation10 + $0x20] sm:$0xff] %v2016_v11 }
 0x3c9   : > { %2145 = vst [vmem:[#allocation10 + $0x28] sm:$0xff] %v2017_v19  ;;  %v1955_v41 = vpop.permute.xlu2 %1954 }
 0x3ca   : > { %2146 = vst [vmem:[#allocation10 + $0x30] sm:$0xff] %v2018_v6  ;;  %v1905_v30 = vpop.permute.xlu1 %1904  ;;  %v2092_v37 = vsub.f32 %v1804_v20, %v1955_v41  ;;  %v2093_v45 = vsub.f32 %v1805_v34, %v1955_v41  ;;  %v2094_v26 = vsub.f32 %v1806_v10, %v1955_v41  ;;  %v2095_v27 = vsub.f32 %v1807_v42, %v1955_v41  ;;  %v1788_v41 = vld [vmem:[#allocation10 + $0x200] sm:$0xff]  ;;  %v1789_v34 = vld [vmem:[#allocation10 + $0x208] sm:$0xff]  ;;  %v1790_v10 = vld [vmem:[#allocation10 + $0x210] sm:$0xff] }
 0x3cb   : > { %2147 = vst [vmem:[#allocation10 + $0x38] sm:$0xff] %v2019_v31  ;;  %v1900_v63 = vpop.permute.xlu0 %1899  ;;  %v2052_v47 = vsub.f32 %v1764_v40, %v1905_v30  ;;  %v2053_v53 = vsub.f32 %v1765_v18, %v1905_v30  ;;  %v2054_v12 = vsub.f32 %v1766_v32, %v1905_v30  ;;  %v2055_v4 = vsub.f32 %v1767_v61, %v1905_v30  ;;  %v1791_v30 = vld [vmem:[#allocation10 + $0x218] sm:$0xff]  ;;  %v1785_v18 = vld [vmem:[#allocation10 + $0x1e8] sm:$0xff]  ;;  %v1786_v32 = vld [vmem:[#allocation10 + $0x1f0] sm:$0xff] }
 0x3cc   : > { %2208 = vst [vmem:[#allocation10 + $0x220] sm:$0xff] %v2080_v33  ;;  %v2048_v7 = vsub.f32 %v1760_v14, %v1900_v63  ;;  %v2049_v39 = vsub.f32 %v1761_v25, %v1900_v63  ;;  %v2050_v50 = vsub.f32 %v1762_v62, %v1900_v63  ;;  %v2051_v59 = vsub.f32 %v1763_v46, %v1900_v63  ;;  %v1787_v63 = vld [vmem:[#allocation10 + $0x1f8] sm:$0xff]  ;;  %v1842_v46 = vld [vmem:[#allocation10 + $0x3b0] sm:$0xff] }
 0x3cd   : > { %2209 = vst [vmem:[#allocation10 + $0x228] sm:$0xff] %v2081_v57 }
 0x3ce   : > { %2210 = vst [vmem:[#allocation10 + $0x230] sm:$0xff] %v2082_v51  ;;  %v1773_v51 = vld [vmem:[#allocation10 + $0x188] sm:$0xff] }
 0x3cf   : > { %2211 = vst [vmem:[#allocation10 + $0x238] sm:$0xff] %v2083_v9  ;;  %v1774_v9 = vld [vmem:[#allocation10 + $0x190] sm:$0xff] }
 0x3d0   : > { %2168 = vst [vmem:[#allocation10 + $0xe0] sm:$0xff] %v2040_v24 }
 0x3d1   : > { %2169 = vst [vmem:[#allocation10 + $0xe8] sm:$0xff] %v2041_v52  ;;  %v1970_v60 = vpop.permute.xlu2 %1969 }
 0x3d2   : > { %2170 = vst [vmem:[#allocation10 + $0xf0] sm:$0xff] %v2042_v13  ;;  %v1920_v48 = vpop.permute.xlu1 %1919  ;;  %v2104_v11 = vsub.f32 %v1816_v2, %v1970_v60  ;;  %v2105_v19 = vsub.f32 %v1817_v56, %v1970_v60  ;;  %v2106_v6 = vsub.f32 %v1818_v28, %v1970_v60  ;;  %v2107_v31 = vsub.f32 %v1819_v36, %v1970_v60  ;;  %v1800_v60 = vld [vmem:[#allocation10 + $0x260] sm:$0xff]  ;;  %v1803_v36 = vld [vmem:[#allocation10 + $0x278] sm:$0xff] }
 0x3d3   : > { %2171 = vst [vmem:[#allocation10 + $0xf8] sm:$0xff] %v2043_v23  ;;  %v1915_v29 = vpop.permute.xlu0 %1914  ;;  %v2064_v33 = vsub.f32 %v1776_v54, %v1920_v48  ;;  %v2065_v57 = vsub.f32 %v1777_v15, %v1920_v48  ;;  %v2066_v22 = vsub.f32 %v1778_v44, %v1920_v48  ;;  %v2067_v17 = vsub.f32 %v1779_v5, %v1920_v48  ;;  %v1796_v54 = vld [vmem:[#allocation10 + $0x240] sm:$0xff]  ;;  %v1799_v5 = vld [vmem:[#allocation10 + $0x258] sm:$0xff] }
 0x3d4   : > { %2164 = vst [vmem:[#allocation10 + $0xc0] sm:$0xff] %v2036_v21  ;;  %v2060_v24 = vsub.f32 %v1772_v0, %v1915_v29  ;;  %v2061_v52 = vsub.f32 %v1773_v51, %v1915_v29  ;;  %v2062_v13 = vsub.f32 %v1774_v9, %v1915_v29  ;;  %v2063_v23 = vsub.f32 %v1775_v1, %v1915_v29  ;;  %v1831_v21 = vld [vmem:[#allocation10 + $0x358] sm:$0xff]  ;;  %v1812_v0 = vld [vmem:[#allocation10 + $0x2c0] sm:$0xff]  ;;  %v1813_v51 = vld [vmem:[#allocation10 + $0x2c8] sm:$0xff] }
 0x3d5   : > { %2165 = vst [vmem:[#allocation10 + $0xc8] sm:$0xff] %v2037_v38  ;;  %v1814_v9 = vld [vmem:[#allocation10 + $0x2d0] sm:$0xff] }
 0x3d6   : > { %2166 = vst [vmem:[#allocation10 + $0xd0] sm:$0xff] %v2038_v3 }
 0x3d7   : > { %2167 = vst [vmem:[#allocation10 + $0xd8] sm:$0xff] %v2039_v43 }
 0x3d8   : > { %2220 = vst [vmem:[#allocation10 + $0x280] sm:$0xff] %v2092_v37 }
 0x3d9   : > { %2221 = vst [vmem:[#allocation10 + $0x288] sm:$0xff] %v2093_v45  ;;  %v1985_v55 = vpop.permute.xlu2 %1984  ;;  %v1784_v45 = vld [vmem:[#allocation10 + $0x1e0] sm:$0xff] }
 0x3da   : > { %2222 = vst [vmem:[#allocation10 + $0x290] sm:$0xff] %v2094_v26  ;;  %v1935_v58 = vpop.permute.xlu1 %1934  ;;  %v2116_v38 = vsub.f32 %v1828_v35, %v1985_v55  ;;  %v2117_v20 = vsub.f32 %v1829_v8, %v1985_v55  ;;  %v2118_v3 = vsub.f32 %v1830_v49, %v1985_v55  ;;  %v2119_v43 = vsub.f32 %v1831_v21, %v1985_v55  ;;  %v1811_v49 = vld [vmem:[#allocation10 + $0x2b8] sm:$0xff] }
 0x3db   : > { %2223 = vst [vmem:[#allocation10 + $0x298] sm:$0xff] %v2095_v27  ;;  %v1930_v16 = vpop.permute.xlu0 %1929  ;;  %v2076_v42 = vsub.f32 %v1788_v41, %v1935_v58  ;;  %v2077_v37 = vsub.f32 %v1789_v34, %v1935_v58  ;;  %v2078_v26 = vsub.f32 %v1790_v10, %v1935_v58  ;;  %v2079_v27 = vsub.f32 %v1791_v30, %v1935_v58  ;;  %v1815_v58 = vld [vmem:[#allocation10 + $0x2d8] sm:$0xff] }
 0x3dc   : > { %2180 = vst [vmem:[#allocation10 + $0x140] sm:$0xff] %v2052_v47  ;;  %v2072_v61 = vsub.f32 %v1784_v45, %v1930_v16  ;;  %v2073_v47 = vsub.f32 %v1785_v18, %v1930_v16  ;;  %v2074_v25 = vsub.f32 %v1786_v32, %v1930_v16  ;;  %v2075_v62 = vsub.f32 %v1787_v63, %v1930_v16  ;;  %v1827_v10 = vld [vmem:[#allocation10 + $0x338] sm:$0xff]  ;;  %v1822_v18 = vld [vmem:[#allocation10 + $0x310] sm:$0xff] }
 0x3dd   : > { %2181 = vst [vmem:[#allocation10 + $0x148] sm:$0xff] %v2053_v53  ;;  %v1840_v53 = vld [vmem:[#allocation10 + $0x3a0] sm:$0xff]  ;;  %v1823_v32 = vld [vmem:[#allocation10 + $0x318] sm:$0xff] }
 0x3de   : > { %2182 = vst [vmem:[#allocation10 + $0x150] sm:$0xff] %v2054_v12 }
 0x3df   : > { %2183 = vst [vmem:[#allocation10 + $0x158] sm:$0xff] %v2055_v4  ;;  %v1841_v4 = vld [vmem:[#allocation10 + $0x3a8] sm:$0xff] }
 0x3e0   : > { %2176 = vst [vmem:[#allocation10 + $0x120] sm:$0xff] %v2048_v7  ;;  %v1843_v7 = vld [vmem:[#allocation10 + $0x3b8] sm:$0xff] }
 0x3e1   : > { %2177 = vst [vmem:[#allocation10 + $0x128] sm:$0xff] %v2049_v39  ;;  %v2000_v14 = vpop.permute.xlu2 %1999 }
 0x3e2   : > { %2178 = vst [vmem:[#allocation10 + $0x130] sm:$0xff] %v2050_v50  ;;  %v1950_v40 = vpop.permute.xlu1 %1949  ;;  %v2128_v39 = vsub.f32 %v1840_v53, %v2000_v14  ;;  %v2129_v2 = vsub.f32 %v1841_v4, %v2000_v14  ;;  %v2130_v48 = vsub.f32 %v1842_v46, %v2000_v14  ;;  %v1801_v50 = vld [vmem:[#allocation10 + $0x268] sm:$0xff]  ;;  %v2131_v56 = vsub.f32 %v1843_v7, %v2000_v14 }
 0x3e3   : > { %2179 = vst [vmem:[#allocation10 + $0x138] sm:$0xff] %v2051_v59  ;;  %v1945_v12 = vpop.permute.xlu0 %1944  ;;  %v1802_v59 = vld [vmem:[#allocation10 + $0x270] sm:$0xff]  ;;  %v2091_v15 = vsub.f32 %v1803_v36, %v1950_v40  ;;  %v1837_v14 = vld [vmem:[#allocation10 + $0x388] sm:$0xff]  ;;  %v1848_v36 = vld [vmem:[#allocation10 + $0x3e0] sm:$0xff] }
 0x3e4   : > { %2232 = vst [vmem:[#allocation10 + $0x2e0] sm:$0xff] %v2104_v11  ;;  %v2088_v11 = vsub.f32 %v1800_v60, %v1950_v40  ;;  %v2090_v29 = vsub.f32 %v1802_v59, %v1950_v40  ;;  %v1833_v60 = vld [vmem:[#allocation10 + $0x368] sm:$0xff] }
 0x3e5   : > { %2233 = vst [vmem:[#allocation10 + $0x2e8] sm:$0xff] %v2105_v19  ;;  %v2089_v19 = vsub.f32 %v1801_v50, %v1950_v40  ;;  %v1821_v40 = vld [vmem:[#allocation10 + $0x308] sm:$0xff]  ;;  %v1834_v50 = vld [vmem:[#allocation10 + $0x370] sm:$0xff] }
 0x3e6   : > { %2234 = vst [vmem:[#allocation10 + $0x2f0] sm:$0xff] %v2106_v6  ;;  %v1797_v6 = vld [vmem:[#allocation10 + $0x248] sm:$0xff] }
 0x3e7   : > { %2235 = vst [vmem:[#allocation10 + $0x2f8] sm:$0xff] %v2107_v31  ;;  %v1798_v31 = vld [vmem:[#allocation10 + $0x250] sm:$0xff] }
 0x3e8   : > { %2192 = vst [vmem:[#allocation10 + $0x1a0] sm:$0xff] %v2064_v33  ;;  %v2084_v33 = vsub.f32 %v1796_v54, %v1945_v12  ;;  %v1849_v54 = vld [vmem:[#allocation10 + $0x3e8] sm:$0xff] }
 0x3e9   : > { %2193 = vst [vmem:[#allocation10 + $0x1a8] sm:$0xff] %v2065_v57  ;;  %v2085_v57 = vsub.f32 %v1797_v6, %v1945_v12  ;;  %v1850_v6 = vld [vmem:[#allocation10 + $0x3f0] sm:$0xff] }
 0x3ea   : > { %2194 = vst [vmem:[#allocation10 + $0x1b0] sm:$0xff] %v2066_v22  ;;  %v1965_v28 = vpop.permute.xlu1 %1964  ;;  %v2086_v22 = vsub.f32 %v1798_v31, %v1945_v12 }
 0x3eb   : > { %2195 = vst [vmem:[#allocation10 + $0x1b8] sm:$0xff] %v2067_v17  ;;  %v1960_v44 = vpop.permute.xlu0 %1959  ;;  %v2087_v17 = vsub.f32 %v1799_v5, %v1945_v12  ;;  %v2100_v1 = vsub.f32 %v1812_v0, %v1965_v28  ;;  %v2102_v55 = vsub.f32 %v1814_v9, %v1965_v28  ;;  %v2103_v8 = vsub.f32 %v1815_v58, %v1965_v28  ;;  %v1844_v5 = vld [vmem:[#allocation10 + $0x3c0] sm:$0xff]  ;;  %v1845_v0 = vld [vmem:[#allocation10 + $0x3c8] sm:$0xff] }
 0x3ec   : > { %2188 = vst [vmem:[#allocation10 + $0x180] sm:$0xff] %v2060_v24  ;;  %v2101_v24 = vsub.f32 %v1813_v51, %v1965_v28  ;;  %v2099_v34 = vsub.f32 %v1811_v49, %v1960_v44  ;;  %v1846_v51 = vld [vmem:[#allocation10 + $0x3d0] sm:$0xff] }
 0x3ed   : > { %2189 = vst [vmem:[#allocation10 + $0x188] sm:$0xff] %v2061_v52  ;;  %v1808_v52 = vld [vmem:[#allocation10 + $0x2a0] sm:$0xff] }
 0x3ee   : > { %2190 = vst [vmem:[#allocation10 + $0x190] sm:$0xff] %v2062_v13  ;;  %v1809_v13 = vld [vmem:[#allocation10 + $0x2a8] sm:$0xff]  ;;  %v2096_v16 = vsub.f32 %v1808_v52, %v1960_v44 }
 0x3ef   : > { %2191 = vst [vmem:[#allocation10 + $0x198] sm:$0xff] %v2063_v23  ;;  %v1810_v23 = vld [vmem:[#allocation10 + $0x2b0] sm:$0xff]  ;;  %v2097_v21 = vsub.f32 %v1809_v13, %v1960_v44 }
 0x3f0   : > { %2244 = vst [vmem:[#allocation10 + $0x340] sm:$0xff] %v2116_v38  ;;  %v1824_v38 = vld [vmem:[#allocation10 + $0x320] sm:$0xff]  ;;  %v2098_v41 = vsub.f32 %v1810_v23, %v1960_v44 }
 0x3f1   : > { %2245 = vst [vmem:[#allocation10 + $0x348] sm:$0xff] %v2117_v20 }
 0x3f2   : > { %2246 = vst [vmem:[#allocation10 + $0x350] sm:$0xff] %v2118_v3  ;;  %v1980_v35 = vpop.permute.xlu1 %1979  ;;  %v1825_v3 = vld [vmem:[#allocation10 + $0x328] sm:$0xff] }
 0x3f3   : > { %2247 = vst [vmem:[#allocation10 + $0x358] sm:$0xff] %v2119_v43  ;;  %v1975_v20 = vpop.permute.xlu0 %1974  ;;  %v1826_v43 = vld [vmem:[#allocation10 + $0x330] sm:$0xff]  ;;  %v2112_v30 = vsub.f32 %v1824_v38, %v1980_v35 }
 0x3f4   : > { %2204 = vst [vmem:[#allocation10 + $0x200] sm:$0xff] %v2076_v42  ;;  %v2113_v42 = vsub.f32 %v1825_v3, %v1980_v35  ;;  %v2114_v45 = vsub.f32 %v1826_v43, %v1980_v35  ;;  %v2110_v53 = vsub.f32 %v1822_v18, %v1975_v20  ;;  %v2111_v12 = vsub.f32 %v1823_v32, %v1975_v20 }
 0x3f5   : > { %2205 = vst [vmem:[#allocation10 + $0x208] sm:$0xff] %v2077_v37  ;;  %v1820_v37 = vld [vmem:[#allocation10 + $0x300] sm:$0xff] }
 0x3f6   : > { %2206 = vst [vmem:[#allocation10 + $0x210] sm:$0xff] %v2078_v26  ;;  %v2115_v26 = vsub.f32 %v1827_v10, %v1980_v35  ;;  %v2108_v63 = vsub.f32 %v1820_v37, %v1975_v20 }
 0x3f7   : > { %2207 = vst [vmem:[#allocation10 + $0x218] sm:$0xff] %v2079_v27 }
 0x3f8   : > { %2200 = vst [vmem:[#allocation10 + $0x1e0] sm:$0xff] %v2072_v61  ;;  %v2109_v61 = vsub.f32 %v1821_v40, %v1975_v20 }
 0x3f9   : > { %2201 = vst [vmem:[#allocation10 + $0x1e8] sm:$0xff] %v2073_v47  ;;  %v1836_v47 = vld [vmem:[#allocation10 + $0x380] sm:$0xff] }
 0x3fa   : > { %2202 = vst [vmem:[#allocation10 + $0x1f0] sm:$0xff] %v2074_v25  ;;  %v1995_v27 = vpop.permute.xlu1 %1994  ;;  %v1838_v25 = vld [vmem:[#allocation10 + $0x390] sm:$0xff] }
 0x3fb   : > { %2203 = vst [vmem:[#allocation10 + $0x1f8] sm:$0xff] %v2075_v62  ;;  %v1990_v4 = vpop.permute.xlu0 %1989  ;;  %v1839_v62 = vld [vmem:[#allocation10 + $0x398] sm:$0xff]  ;;  %v2124_v46 = vsub.f32 %v1836_v47, %v1995_v27  ;;  %v2125_v7 = vsub.f32 %v1837_v14, %v1995_v27 }
 0x3fc   : > { %2256 = vst [vmem:[#allocation10 + $0x3a0] sm:$0xff] %v2128_v39  ;;  %v1832_v39 = vld [vmem:[#allocation10 + $0x360] sm:$0xff]  ;;  %v2121_v28 = vsub.f32 %v1833_v60, %v1990_v4 }
 0x3fd   : > { %2257 = vst [vmem:[#allocation10 + $0x3a8] sm:$0xff] %v2129_v2  ;;  %v2126_v2 = vsub.f32 %v1838_v25, %v1995_v27  ;;  %v2120_v59 = vsub.f32 %v1832_v39, %v1990_v4 }
 0x3fe   : > { %2258 = vst [vmem:[#allocation10 + $0x3b0] sm:$0xff] %v2130_v48  ;;  %v2127_v48 = vsub.f32 %v1839_v62, %v1995_v27 }
 0x3ff   : > { %2259 = vst [vmem:[#allocation10 + $0x3b8] sm:$0xff] %v2131_v56  ;;  %v1835_v56 = vld [vmem:[#allocation10 + $0x378] sm:$0xff] }
 0x400   : > { %2216 = vst [vmem:[#allocation10 + $0x260] sm:$0xff] %v2088_v11 }
 0x401   : > { %2217 = vst [vmem:[#allocation10 + $0x268] sm:$0xff] %v2089_v19  ;;  %v2122_v19 = vsub.f32 %v1834_v50, %v1990_v4 }
 0x402   : > { %2218 = vst [vmem:[#allocation10 + $0x270] sm:$0xff] %v2090_v29  ;;  %v2010_v11 = vpop.permute.xlu1 %2009  ;;  %v2123_v29 = vsub.f32 %v1835_v56, %v1990_v4 }
 0x403   : > { %2219 = vst [vmem:[#allocation10 + $0x278] sm:$0xff] %v2091_v15  ;;  %v1851_v15 = vld [vmem:[#allocation10 + $0x3f8] sm:$0xff]  ;;  %v2136_v31 = vsub.f32 %v1848_v36, %v2010_v11  ;;  %v2137_v44 = vsub.f32 %v1849_v54, %v2010_v11 }
 0x404   : > { %2212 = vst [vmem:[#allocation10 + $0x240] sm:$0xff] %v2084_v33  ;;  %v2005_v33 = vpop.permute.xlu0 %2004 }
 0x405   : > { %2213 = vst [vmem:[#allocation10 + $0x248] sm:$0xff] %v2085_v57  ;;  %v2138_v57 = vsub.f32 %v1850_v6, %v2010_v11  ;;  %v2132_v9 = vsub.f32 %v1844_v5, %v2005_v33  ;;  %v2133_v58 = vsub.f32 %v1845_v0, %v2005_v33 }
 0x406   : > { %2214 = vst [vmem:[#allocation10 + $0x250] sm:$0xff] %v2086_v22  ;;  %v2139_v22 = vsub.f32 %v1851_v15, %v2010_v11 }
 0x407   : > { %2215 = vst [vmem:[#allocation10 + $0x258] sm:$0xff] %v2087_v17  ;;  %v1847_v17 = vld [vmem:[#allocation10 + $0x3d8] sm:$0xff] }
 0x408   : > { %2228 = vst [vmem:[#allocation10 + $0x2c0] sm:$0xff] %v2100_v1  ;;  %v2134_v1 = vsub.f32 %v1846_v51, %v2005_v33 }
 0x409   : > { %2229 = vst [vmem:[#allocation10 + $0x2c8] sm:$0xff] %v2101_v24  ;;  %v2135_v24 = vsub.f32 %v1847_v17, %v2005_v33 }
 0x40a   : > { %2230 = vst [vmem:[#allocation10 + $0x2d0] sm:$0xff] %v2102_v55 }
 0x40b   : > { %2231 = vst [vmem:[#allocation10 + $0x2d8] sm:$0xff] %v2103_v8 }
 0x40c   : > { %2224 = vst [vmem:[#allocation10 + $0x2a0] sm:$0xff] %v2096_v16 }
 0x40d   : > { %2225 = vst [vmem:[#allocation10 + $0x2a8] sm:$0xff] %v2097_v21 }
 0x40e   : > { %2226 = vst [vmem:[#allocation10 + $0x2b0] sm:$0xff] %v2098_v41 }
 0x40f   : > { %2227 = vst [vmem:[#allocation10 + $0x2b8] sm:$0xff] %v2099_v34 }
 0x410   : > { %2240 = vst [vmem:[#allocation10 + $0x320] sm:$0xff] %v2112_v30 }
 0x411   : > { %2241 = vst [vmem:[#allocation10 + $0x328] sm:$0xff] %v2113_v42 }
 0x412   : > { %2242 = vst [vmem:[#allocation10 + $0x330] sm:$0xff] %v2114_v45 }
 0x413   : > { %2243 = vst [vmem:[#allocation10 + $0x338] sm:$0xff] %v2115_v26 }
 0x414   : > { %2236 = vst [vmem:[#allocation10 + $0x300] sm:$0xff] %v2108_v63 }
 0x415   : > { %2237 = vst [vmem:[#allocation10 + $0x308] sm:$0xff] %v2109_v61 }
 0x416   : > { %2238 = vst [vmem:[#allocation10 + $0x310] sm:$0xff] %v2110_v53 }
 0x417   : > { %2239 = vst [vmem:[#allocation10 + $0x318] sm:$0xff] %v2111_v12 }
 0x418   : > { %2252 = vst [vmem:[#allocation10 + $0x380] sm:$0xff] %v2124_v46 }
 0x419   : > { %2253 = vst [vmem:[#allocation10 + $0x388] sm:$0xff] %v2125_v7 }
 0x41a   : > { %2254 = vst [vmem:[#allocation10 + $0x390] sm:$0xff] %v2126_v2 }
 0x41b   : > { %2255 = vst [vmem:[#allocation10 + $0x398] sm:$0xff] %v2127_v48 }
 0x41c   : > { %2248 = vst [vmem:[#allocation10 + $0x360] sm:$0xff] %v2120_v59 }
 0x41d   : > { %2249 = vst [vmem:[#allocation10 + $0x368] sm:$0xff] %v2121_v28 }
 0x41e   : > { %2250 = vst [vmem:[#allocation10 + $0x370] sm:$0xff] %v2122_v19 }
 0x41f   : > { %2251 = vst [vmem:[#allocation10 + $0x378] sm:$0xff] %v2123_v29 }
 0x420   : > { %2264 = vst [vmem:[#allocation10 + $0x3e0] sm:$0xff] %v2136_v31 }
 0x421   : > { %2265 = vst [vmem:[#allocation10 + $0x3e8] sm:$0xff] %v2137_v44 }
 0x422   : > { %2266 = vst [vmem:[#allocation10 + $0x3f0] sm:$0xff] %v2138_v57 }
 0x423   : > { %2267 = vst [vmem:[#allocation10 + $0x3f8] sm:$0xff] %v2139_v22 }
 0x424   : > { %2260 = vst [vmem:[#allocation10 + $0x3c0] sm:$0xff] %v2132_v9 }
 0x425   : > { %2261 = vst [vmem:[#allocation10 + $0x3c8] sm:$0xff] %v2133_v58 }
 0x426   : > { %2262 = vst [vmem:[#allocation10 + $0x3d0] sm:$0xff] %v2134_v1 }
 0x427   : > { %2263 = vst [vmem:[#allocation10 + $0x3d8] sm:$0xff] %v2135_v24 }
 0x428 PF: > { %p2460_p3 = scmp.eq.s32.totalorder %s3097_s11, 1  ;;  %s2279_s30 = sshll.u32 %s4058_s3, 4  ;;  %s2280_s30 = int_to_ptr.hbm [resolvable:$true] %s2279_s30 }
 0x429   : > { %s3007_s4 = smov [#allocation10]   ;;  %s3008_s8 = smov 512  }
 0x42a   : > { %s2277_s5 = sshll.u32 %s3007_s4, 4  ;;  %s3009_s9 = smov 32   ;;  %s2278_s5 = int_to_ptr.vmem [resolvable:$true] %s2277_s5 }
 0x42b   : > { %2443 = dma.vmem_to_hbm [thread:$0]  (%p2460_p3), %s2278_s5, 16384, %s2280_s30, [#allocation6], %s3008_s8, %s3008_s8, %s3009_s9  }
 0x42c   : > { %2970 = dma.done.wait (%p2460_p3), [#allocation6], 16384  }
 0x42d   : > { %2972 = vsyncadd (%p2460_p3), [#allocation6], 4294950912 }
 0x42e PF: > { %s18_s17 = sadd.s32 1, %s2995_s17   ;;  %s4225_s12 = smov %s2979_s13 }
 0x42f   : > { %p15_p4 = scmp.ge.s32.totalorder %s18_s17, 4   ;;  %s4226_s13 = smov %s2983_s14 }
 0x430   : > { %s4227_s14 = smov %s3078_s25  ;;  %s4228_s15 = smov %s2991_s16 }
 0x431   : > { %s4229_s16 = smov %s4231_s18  ;;  %17 = sbr.rel (!%p15_p4) target bundleno = 6 (0x6), region = 96 }
 0x436   :  { %2296 = vsyncpa [#allocation5], 1 }
 0x437   :  { %2298 = vsyncpa [#allocation5 + $0x1], 1 }
 0x438   :  { %2299 = vsyncpa [#allocation8], 1 }
 0x439   :  { %2301 = vsyncpa [#allocation8 + $0x1], 1 }
 0x43a   :  { %2302 = vsyncpa [#allocation6], 1 }
 0x43b   :  { %2304 = vsyncpa [#allocation6 + $0x1], 1 }

</bundles_post_ra>
